<compile_context>
chip_gen: v5e
topology: v5e:2x2
jax: 0.10.0
libtpu: 0.0.40
codegen_flags: <defaults>
</compile_context>

<pallas_src>
import functools
import math
import numpy as np
import jax
import jax.numpy as jnp
from jax.experimental import pallas as pl
from jax.experimental.pallas import tpu as pltpu

# ---- MLPNet_T2 hyperparameters (defaults of the PyTorch module) ----
D_DEPTH = 7
W_WIDTH = 256
INPUT_CH = 3
INPUT_CH_VIEW = 3
SKIPS = [3]
HEADS = 4
D_MODEL = W_WIDTH // 2        # 128
D_K = D_MODEL // HEADS        # 32

PARAM_ORDER = [
    "w_ini", "b_ini",
    "wqkv", "bqkv", "wo", "bo",
    "w_l0", "b_l0", "w_l1", "b_l1", "w_l2", "b_l2", "w_l3", "b_l3",
    "w_l4a", "w_l4b", "b_l4", "w_l5", "b_l5",
    "w_sig_t", "b_sig", "w_rem", "b_rem",
    "w_r0a", "w_r0b", "b_r0", "w_r1_t", "b_r1",
]


def _fma_small_k(a, w):
    """[M, K] x [K, N] contraction with tiny K, as unrolled VPU broadcast-FMAs (f32)."""
    acc = a[:, 0:1] * w[0:1, :]
    for i in range(1, w.shape[0]):
        acc = acc + a[:, i:i + 1] * w[i:i + 1, :]
    return acc


def _mlpnet_t2_kernel(x_ref,
                      w_ini, b_ini,
                      wqkv, bqkv, wo, bo,
                      w_l0, b_l0, w_l1, b_l1, w_l2, b_l2, w_l3, b_l3,
                      w_l4a, w_l4b, b_l4, w_l5, b_l5,
                      w_sig_t, b_sig, w_rem, b_rem,
                      w_r0a, w_r0b, b_r0, w_r1_t, b_r1,
                      out_ref, *, block_batch, seq_len):
    f32 = jnp.float32
    bf16 = jnp.bfloat16

    x = x_ref[...]                                      # [M, 6], M = block_batch*seq_len
    m_rows = block_batch * seq_len
    pts = x[:, :INPUT_CH]                               # [M, 3]
    dirs = x[:, INPUT_CH:INPUT_CH + INPUT_CH_VIEW]      # [M, 3]

    def mm(a_bf16, w_r):                                # bf16 MXU matmul, f32 accumulate
        return jnp.dot(a_bf16, w_r[...], preferred_element_type=f32)

    # ini_layer: Linear(3, 128) + ReLU  (K=3 -> VPU broadcast-FMA, stays f32)
    h0 = jnp.maximum(_fma_small_k(pts, w_ini[...]) + b_ini[...], 0.0)    # [M, 128] f32

    # --- MultiHeadAttention(heads=4, d_model=128); dropout = identity (eval mode) ---
    # Q columns/bias are pre-scaled by 1/sqrt(d_k) at pack time.
    qkv = mm(h0.astype(bf16), wqkv) + bqkv[...]         # fused Q|K|V: [M, 384], f32

    def gather_heads(col0):
        # per-head 32-lane slices row-stacked into one batched operand [H*Bt, S, D_K]
        parts = [
            qkv[:, col0 + h * D_K: col0 + (h + 1) * D_K]
            .reshape(block_batch, seq_len, D_K)
            for h in range(HEADS)
        ]
        return jnp.concatenate(parts, axis=0).astype(bf16)

    q_b = gather_heads(0)                               # [H*Bt, S, D_K] (pre-scaled)
    k_b = gather_heads(D_MODEL)
    v_b = gather_heads(2 * D_MODEL)

    # single batched score einsum + single softmax + single batched PV einsum
    s = jnp.einsum('bqd,bkd->bqk', q_b, k_b, preferred_element_type=f32)  # [H*Bt,S,S]
    s = s - jnp.max(s, axis=-1, keepdims=True)
    p = jnp.exp(s)
    p = p * pl.reciprocal(jnp.sum(p, axis=-1, keepdims=True), approx=True)
    o = jnp.einsum('bqk,bkd->bqd', p.astype(bf16), v_b,
                   preferred_element_type=f32)                            # [H*Bt,S,D_K]

    # reassemble: head h (rows h*Bt..(h+1)*Bt) goes to lanes h*D_K..(h+1)*D_K
    heads_out = [o[h * block_batch:(h + 1) * block_batch].reshape(m_rows, D_K)
                 for h in range(HEADS)]
    concat = jnp.concatenate(heads_out, axis=-1)        # [M, 128] f32
    attn_out = mm(concat.astype(bf16), wo) + bo[...]    # single output projection

    # residual (+ identity dropout1); activations kept in bf16 between layers
    base = (h0 + attn_out).astype(bf16)                 # [M, 128]

    # base_layers[0..5]; skip at i==3 folded into split weights (w_l4a | w_l4b)
    base = jnp.maximum(mm(base, w_l0) + b_l0[...], 0.0).astype(bf16)     # [M, 256]
    base = jnp.maximum(mm(base, w_l1) + b_l1[...], 0.0).astype(bf16)
    base = jnp.maximum(mm(base, w_l2) + b_l2[...], 0.0).astype(bf16)
    base = jnp.maximum(mm(base, w_l3) + b_l3[...], 0.0).astype(bf16)
    base = jnp.maximum(_fma_small_k(pts, w_l4a[...]) + mm(base, w_l4b) + b_l4[...],
                       0.0).astype(bf16)
    base = jnp.maximum(mm(base, w_l5) + b_l5[...], 0.0).astype(bf16)

    # sigma head: Linear(256, 1) + ReLU -> VPU multiply + XLU lane reduction (off MXU)
    base_f32 = base.astype(f32)
    sigma = jnp.maximum(
        jnp.sum(base_f32 * w_sig_t[...], axis=-1, keepdims=True) + b_sig[...], 0.0)

    # rgb head: base_remap (MXU), cat with viewdirs (split-weight FMA), Linear+ReLU,
    # final Linear(128,3)+Sigmoid as 3 VPU dots (off MXU)
    rem = (mm(base, w_rem) + b_rem[...]).astype(bf16)                    # [M, 256]
    r0 = jnp.maximum(mm(rem, w_r0a) + _fma_small_k(dirs, w_r0b[...]) + b_r0[...], 0.0)
    w_r1v = w_r1_t[...]                                                  # [3, 128] f32
    rgb_cols = [jnp.sum(r0 * w_r1v[c:c + 1, :], axis=-1, keepdims=True)
                for c in range(3)]
    rgb = jax.nn.sigmoid(jnp.concatenate(rgb_cols, axis=-1) + b_r1[...])  # [M, 3]

    # packed output: [..., :3] = rgb, [..., 3:4] = sigma
    out_ref[...] = jnp.concatenate([rgb, sigma], axis=-1).astype(out_ref.dtype)


def _pack_params(P):
    """Fuse Q/K/V (with the 1/sqrt(d_k) scale folded into Q), cast MXU weight operands
    to bf16; biases, tiny-K weights and the VPU-dot heads (w_sig, w_r1) stay f32."""
    bf16 = jnp.bfloat16
    scale = 1.0 / math.sqrt(D_K)
    packed = {
        "w_ini": P["w_ini"], "b_ini": P["b_ini"],
        "wqkv": jnp.concatenate([P["wq"] * scale, P["wk"], P["wv"]], axis=1).astype(bf16),
        "bqkv": jnp.concatenate([P["bq"] * scale, P["bk"], P["bv"]], axis=1),
        "wo": P["wo"].astype(bf16), "bo": P["bo"],
        "w_l4a": P["w_l4a"], "w_l4b": P["w_l4b"].astype(bf16), "b_l4": P["b_l4"],
        "w_sig_t": P["w_sig"].T, "b_sig": P["b_sig"],          # [1,256] f32, VPU head
        "w_r0a": P["w_r0a"].astype(bf16), "w_r0b": P["w_r0b"], "b_r0": P["b_r0"],
        "w_r1_t": P["w_r1"].T, "b_r1": P["b_r1"],              # [3,128] f32, VPU head
    }
    for name in ["w_l0", "w_l1", "w_l2", "w_l3", "w_l5", "w_rem"]:
        packed[name] = P[name].astype(bf16)
    for name in ["b_l0", "b_l1", "b_l2", "b_l3", "b_l5", "b_rem"]:
        packed[name] = P[name]
    return [packed[name] for name in PARAM_ORDER]


def _choose_block_batch(B, S, target_rows=1024):
    """Block batch whose row tile (bt*S) is a multiple of 8, close to target_rows,
    while still giving the grid at least 2 steps when B allows (pipelining; v7x TCs)."""
    unit = 8 // math.gcd(S, 8)                       # smallest bt with (bt*S) % 8 == 0
    bt = max(unit, (max(target_rows, S) // S) // unit * unit)
    while bt > unit and -(-B // bt) < 2:             # prefer >= 2 grid steps
        bt = max(unit, (bt // 2) // unit * unit)
    return bt


def mlpnet_t2_forward(x, params, block_batch=None, target_rows=1024):
    B, S, C = x.shape
    assert C == INPUT_CH + INPUT_CH_VIEW
    if block_batch is None:
        block_batch = _choose_block_batch(B, S, target_rows)
    mt = block_batch * S
    assert mt % 8 == 0, "row tile (block_batch * seq_len) must be a multiple of 8"

    # Pad the batch up to a multiple of block_batch (attention is per-sequence, so the
    # zero-padded sequences are computed independently and simply discarded).
    n_tiles = pl.cdiv(B, block_batch)
    B_pad = n_tiles * block_batch
    x_p = x if B_pad == B else jnp.concatenate(
        [x, jnp.zeros((B_pad - B, S, C), x.dtype)], axis=0)

    flat_params = _pack_params(params)
    x2 = x_p.reshape(B_pad * S, C)
    rows = B_pad * S

    in_specs = [pl.BlockSpec((mt, C), lambda i: (i, 0))]
    # Grid-invariant weights: constant index_map -> DMA'd once, never re-fetched.
    in_specs += [pl.BlockSpec(p.shape, lambda i: (0, 0)) for p in flat_params]

    # Advisory cost estimate for the XLA scheduler.
    macs_per_row = (INPUT_CH * D_MODEL + D_MODEL * 3 * D_MODEL
                    + HEADS * 2 * S * D_K + D_MODEL * D_MODEL
                    + D_MODEL * W_WIDTH + 3 * W_WIDTH * W_WIDTH
                    + (INPUT_CH + W_WIDTH) * W_WIDTH + W_WIDTH * W_WIDTH
                    + W_WIDTH * 1 + W_WIDTH * 256
                    + (256 + INPUT_CH_VIEW) * D_MODEL + D_MODEL * 3)
    weight_bytes = sum(int(np.prod(p.shape)) * p.dtype.itemsize for p in flat_params)
    cost = pl.CostEstimate(
        flops=int(2 * rows * macs_per_row),
        transcendentals=int(rows * (HEADS * S + 4)),
        bytes_accessed=int(rows * C * 4 + rows * 4 * 4 + weight_bytes))

    out = pl.pallas_call(
        functools.partial(_mlpnet_t2_kernel, block_batch=block_batch, seq_len=S),
        out_shape=jax.ShapeDtypeStruct((rows, 4), jnp.float32),
        grid_spec=pltpu.PrefetchScalarGridSpec(
            num_scalar_prefetch=0,
            grid=(n_tiles,),
            in_specs=in_specs,
            out_specs=pl.BlockSpec((mt, 4), lambda i: (i, 0))),
        compiler_params=pltpu.CompilerParams(
            dimension_semantics=("parallel",),        # row tiles are independent
            vmem_limit_bytes=32 * 1024 * 1024),       # explicit; safe on v5e/v6e/v7x
        cost_estimate=cost,
    )(x2, *flat_params)

    out = out[:B * S]
    rgb = out[:, :3].reshape(B, S, 3)
    sigma = out[:, 3].reshape(B, S)
    return rgb, sigma   # ('rgb': [B,S,3], 'sigma': [B,S])


def init_params(key):
    """Deterministic PyTorch-default-style init: U(-1/sqrt(fan_in), 1/sqrt(fan_in))."""
    keys = iter(jax.random.split(key, 40))

    def linear(fan_in, fan_out):
        bound = 1.0 / math.sqrt(fan_in)
        w = jax.random.uniform(next(keys), (fan_in, fan_out), jnp.float32, -bound, bound)
        b = jax.random.uniform(next(keys), (1, fan_out), jnp.float32, -bound, bound)
        return w, b

    P = {}
    P["w_ini"], P["b_ini"] = linear(INPUT_CH, D_MODEL)
    P["wq"], P["bq"] = linear(D_MODEL, D_MODEL)
    P["wk"], P["bk"] = linear(D_MODEL, D_MODEL)
    P["wv"], P["bv"] = linear(D_MODEL, D_MODEL)
    P["wo"], P["bo"] = linear(D_MODEL, D_MODEL)
    P["w_l0"], P["b_l0"] = linear(D_MODEL, W_WIDTH)
    P["w_l1"], P["b_l1"] = linear(W_WIDTH, W_WIDTH)
    P["w_l2"], P["b_l2"] = linear(W_WIDTH, W_WIDTH)
    P["w_l3"], P["b_l3"] = linear(W_WIDTH, W_WIDTH)
    w_l4, P["b_l4"] = linear(INPUT_CH + W_WIDTH, W_WIDTH)     # skip layer (fan_in = 259)
    P["w_l4a"], P["w_l4b"] = w_l4[:INPUT_CH], w_l4[INPUT_CH:]
    P["w_l5"], P["b_l5"] = linear(W_WIDTH, W_WIDTH)
    P["w_sig"], P["b_sig"] = linear(W_WIDTH, 1)
    P["w_rem"], P["b_rem"] = linear(W_WIDTH, 256)
    w_r0, P["b_r0"] = linear(256 + INPUT_CH_VIEW, D_MODEL)    # rgb layer 0 (fan_in = 259)
    P["w_r0a"], P["w_r0b"] = w_r0[:256], w_r0[256:]
    P["w_r1"], P["b_r1"] = linear(D_MODEL, 3)
    return P


def reference_forward(x, P):
    """Pure-JAX f32 reference reproducing the PyTorch forward (eval mode)."""
    B, S, _ = x.shape
    pts = x[..., :INPUT_CH]
    dirs = x[..., -INPUT_CH_VIEW:]
    h0 = jax.nn.relu(pts @ P["w_ini"] + P["b_ini"])
    q = (h0 @ P["wq"] + P["bq"]).reshape(B, S, HEADS, D_K).transpose(0, 2, 1, 3)
    k = (h0 @ P["wk"] + P["bk"]).reshape(B, S, HEADS, D_K).transpose(0, 2, 1, 3)
    v = (h0 @ P["wv"] + P["bv"]).reshape(B, S, HEADS, D_K).transpose(0, 2, 1, 3)
    scores = jnp.einsum('bhqd,bhkd->bhqk', q, k) / math.sqrt(D_K)
    scores = jax.nn.softmax(scores, axis=-1)
    out = jnp.einsum('bhqk,bhkd->bhqd', scores, v)
    concat = out.transpose(0, 2, 1, 3).reshape(B, S, D_MODEL)
    attn = concat @ P["wo"] + P["bo"]
    base = h0 + attn
    base = jax.nn.relu(base @ P["w_l0"] + P["b_l0"])
    base = jax.nn.relu(base @ P["w_l1"] + P["b_l1"])
    base = jax.nn.relu(base @ P["w_l2"] + P["b_l2"])
    base = jax.nn.relu(base @ P["w_l3"] + P["b_l3"])
    base = jnp.concatenate([pts, base], axis=-1)
    w_l4 = jnp.concatenate([P["w_l4a"], P["w_l4b"]], axis=0)
    base = jax.nn.relu(base @ w_l4 + P["b_l4"])
    base = jax.nn.relu(base @ P["w_l5"] + P["b_l5"])
    sigma = jax.nn.relu(base @ P["w_sig"] + P["b_sig"])
    rem = base @ P["w_rem"] + P["b_rem"]
    r_in = jnp.concatenate([rem, dirs], axis=-1)
    w_r0 = jnp.concatenate([P["w_r0a"], P["w_r0b"]], axis=0)
    r0 = jax.nn.relu(r_in @ w_r0 + P["b_r0"])
    rgb = jax.nn.sigmoid(r0 @ P["w_r1"] + P["b_r1"])
    return rgb, sigma[..., 0]


if __name__ == "__main__":
    key = jax.random.PRNGKey(0)
    kp, kx = jax.random.split(key)
    params = init_params(kp)

    B, S = 4, 8
    x = jax.random.normal(kx, (B, S, INPUT_CH + INPUT_CH_VIEW), jnp.float32)

    rgb_ref, sigma_ref = reference_forward(x, params)

    # Tolerances reflect bf16 matmul operands AND bf16 inter-layer activations
    # (with f32 accumulation) vs. a pure-f32 reference.
    TOL = dict(rtol=4e-2, atol=4e-2)

    # 1) Explicit small row tile -> multi-step grid (2 steps of 16 rows).
    rgb, sigma = mlpnet_t2_forward(x, params, block_batch=2)
    jax.block_until_ready((rgb, sigma))
    np.testing.assert_allclose(np.asarray(rgb), np.asarray(rgb_ref), **TOL)
    np.testing.assert_allclose(np.asarray(sigma), np.asarray(sigma_ref), **TOL)

    # 2) Default (auto) row tiling.
    rgb2, sigma2 = mlpnet_t2_forward(x, params)
    jax.block_until_ready((rgb2, sigma2))
    np.testing.assert_allclose(np.asarray(rgb2), np.asarray(rgb_ref), **TOL)
    np.testing.assert_allclose(np.asarray(sigma2), np.asarray(sigma_ref), **TOL)

    # 3) Batch that does not divide the block batch -> exercises the padded-batch path.
    x3 = x[:3]
    rgb3_ref, sigma3_ref = reference_forward(x3, params)
    rgb3, sigma3 = mlpnet_t2_forward(x3, params)
    jax.block_until_ready((rgb3, sigma3))
    np.testing.assert_allclose(np.asarray(rgb3), np.asarray(rgb3_ref), **TOL)
    np.testing.assert_allclose(np.asarray(sigma3), np.asarray(sigma3_ref), **TOL)

    print("KERNEL_OK")
</pallas_src>

<mosaic_0001>
module attributes {stable_mosaic.version = 11 : i64} {
  func.func @_mlpnet_t2_kernel(%arg0: i32, %arg1: memref<16x6xf32, #tpu.memory_space<vmem>>, %arg2: memref<3x128xf32, #tpu.memory_space<vmem>>, %arg3: memref<1x128xf32, #tpu.memory_space<vmem>>, %arg4: memref<128x384xbf16, #tpu.memory_space<vmem>>, %arg5: memref<1x384xf32, #tpu.memory_space<vmem>>, %arg6: memref<128x128xbf16, #tpu.memory_space<vmem>>, %arg7: memref<1x128xf32, #tpu.memory_space<vmem>>, %arg8: memref<128x256xbf16, #tpu.memory_space<vmem>>, %arg9: memref<1x256xf32, #tpu.memory_space<vmem>>, %arg10: memref<256x256xbf16, #tpu.memory_space<vmem>>, %arg11: memref<1x256xf32, #tpu.memory_space<vmem>>, %arg12: memref<256x256xbf16, #tpu.memory_space<vmem>>, %arg13: memref<1x256xf32, #tpu.memory_space<vmem>>, %arg14: memref<256x256xbf16, #tpu.memory_space<vmem>>, %arg15: memref<1x256xf32, #tpu.memory_space<vmem>>, %arg16: memref<3x256xf32, #tpu.memory_space<vmem>>, %arg17: memref<256x256xbf16, #tpu.memory_space<vmem>>, %arg18: memref<1x256xf32, #tpu.memory_space<vmem>>, %arg19: memref<256x256xbf16, #tpu.memory_space<vmem>>, %arg20: memref<1x256xf32, #tpu.memory_space<vmem>>, %arg21: memref<1x256xf32, #tpu.memory_space<vmem>>, %arg22: memref<1x1xf32, #tpu.memory_space<vmem>>, %arg23: memref<256x256xbf16, #tpu.memory_space<vmem>>, %arg24: memref<1x256xf32, #tpu.memory_space<vmem>>, %arg25: memref<256x128xbf16, #tpu.memory_space<vmem>>, %arg26: memref<3x128xf32, #tpu.memory_space<vmem>>, %arg27: memref<1x128xf32, #tpu.memory_space<vmem>>, %arg28: memref<3x128xf32, #tpu.memory_space<vmem>>, %arg29: memref<1x3xf32, #tpu.memory_space<vmem>>, %arg30: memref<16x4xf32, #tpu.memory_space<vmem>>) attributes {dimension_semantics = [#tpu.dimension_semantics<parallel>], iteration_bounds = array<i64: 2>, scalar_prefetch = 0 : i64, scratch_operands = 0 : i64, tpu.core_type = #tpu.core_type<tc>, window_params = [{transform_indices = @transform_0, window_bounds = array<i64: 16, 6>}, {pipeline_mode = #tpu.pipeline_mode<synchronous>, transform_indices = @transform_1, window_bounds = array<i64: 3, 128>}, {pipeline_mode = #tpu.pipeline_mode<synchronous>, transform_indices = @transform_2, window_bounds = array<i64: 1, 128>}, {pipeline_mode = #tpu.pipeline_mode<synchronous>, transform_indices = @transform_3, window_bounds = array<i64: 128, 384>}, {pipeline_mode = #tpu.pipeline_mode<synchronous>, transform_indices = @transform_4, window_bounds = array<i64: 1, 384>}, {pipeline_mode = #tpu.pipeline_mode<synchronous>, transform_indices = @transform_5, window_bounds = array<i64: 128, 128>}, {pipeline_mode = #tpu.pipeline_mode<synchronous>, transform_indices = @transform_6, window_bounds = array<i64: 1, 128>}, {pipeline_mode = #tpu.pipeline_mode<synchronous>, transform_indices = @transform_7, window_bounds = array<i64: 128, 256>}, {pipeline_mode = #tpu.pipeline_mode<synchronous>, transform_indices = @transform_8, window_bounds = array<i64: 1, 256>}, {pipeline_mode = #tpu.pipeline_mode<synchronous>, transform_indices = @transform_9, window_bounds = array<i64: 256, 256>}, {pipeline_mode = #tpu.pipeline_mode<synchronous>, transform_indices = @transform_10, window_bounds = array<i64: 1, 256>}, {pipeline_mode = #tpu.pipeline_mode<synchronous>, transform_indices = @transform_11, window_bounds = array<i64: 256, 256>}, {pipeline_mode = #tpu.pipeline_mode<synchronous>, transform_indices = @transform_12, window_bounds = array<i64: 1, 256>}, {pipeline_mode = #tpu.pipeline_mode<synchronous>, transform_indices = @transform_13, window_bounds = array<i64: 256, 256>}, {pipeline_mode = #tpu.pipeline_mode<synchronous>, transform_indices = @transform_14, window_bounds = array<i64: 1, 256>}, {pipeline_mode = #tpu.pipeline_mode<synchronous>, transform_indices = @transform_15, window_bounds = array<i64: 3, 256>}, {pipeline_mode = #tpu.pipeline_mode<synchronous>, transform_indices = @transform_16, window_bounds = array<i64: 256, 256>}, {pipeline_mode = #tpu.pipeline_mode<synchronous>, transform_indices = @transform_17, window_bounds = array<i64: 1, 256>}, {pipeline_mode = #tpu.pipeline_mode<synchronous>, transform_indices = @transform_18, window_bounds = array<i64: 256, 256>}, {pipeline_mode = #tpu.pipeline_mode<synchronous>, transform_indices = @transform_19, window_bounds = array<i64: 1, 256>}, {pipeline_mode = #tpu.pipeline_mode<synchronous>, transform_indices = @transform_20, window_bounds = array<i64: 1, 256>}, {pipeline_mode = #tpu.pipeline_mode<synchronous>, transform_indices = @transform_21, window_bounds = array<i64: 1, 1>}, {pipeline_mode = #tpu.pipeline_mode<synchronous>, transform_indices = @transform_22, window_bounds = array<i64: 256, 256>}, {pipeline_mode = #tpu.pipeline_mode<synchronous>, transform_indices = @transform_23, window_bounds = array<i64: 1, 256>}, {pipeline_mode = #tpu.pipeline_mode<synchronous>, transform_indices = @transform_24, window_bounds = array<i64: 256, 128>}, {pipeline_mode = #tpu.pipeline_mode<synchronous>, transform_indices = @transform_25, window_bounds = array<i64: 3, 128>}, {pipeline_mode = #tpu.pipeline_mode<synchronous>, transform_indices = @transform_26, window_bounds = array<i64: 1, 128>}, {pipeline_mode = #tpu.pipeline_mode<synchronous>, transform_indices = @transform_27, window_bounds = array<i64: 3, 128>}, {pipeline_mode = #tpu.pipeline_mode<synchronous>, transform_indices = @transform_28, window_bounds = array<i64: 1, 3>}, {transform_indices = @transform_29, window_bounds = array<i64: 16, 4>}]} {
    %c0 = arith.constant 0 : index
    %c0_0 = arith.constant 0 : index
    %0 = vector.load %arg1[%c0, %c0_0] : memref<16x6xf32, #tpu.memory_space<vmem>>, vector<16x6xf32>
    %1 = vector.extract_strided_slice %0 {offsets = [0, 0], sizes = [16, 3], strides = [1, 1]} : vector<16x6xf32> to vector<16x3xf32>
    %2 = vector.extract_strided_slice %0 {offsets = [0, 3], sizes = [16, 3], strides = [1, 1]} : vector<16x6xf32> to vector<16x3xf32>
    %c0_1 = arith.constant 0 : index
    %c0_2 = arith.constant 0 : index
    %3 = vector.load %arg2[%c0_1, %c0_2] : memref<3x128xf32, #tpu.memory_space<vmem>>, vector<3x128xf32>
    %4 = vector.extract_strided_slice %1 {offsets = [0, 0], sizes = [16, 1], strides = [1, 1]} : vector<16x3xf32> to vector<16x1xf32>
    %5 = vector.extract_strided_slice %3 {offsets = [0, 0], sizes = [1, 128], strides = [1, 1]} : vector<3x128xf32> to vector<1x128xf32>
    %6 = vector.broadcast %4 : vector<16x1xf32> to vector<16x128xf32>
    %7 = vector.broadcast %5 : vector<1x128xf32> to vector<16x128xf32>
    %8 = arith.mulf %6, %7 : vector<16x128xf32>
    %9 = vector.extract_strided_slice %1 {offsets = [0, 1], sizes = [16, 1], strides = [1, 1]} : vector<16x3xf32> to vector<16x1xf32>
    %10 = vector.extract_strided_slice %3 {offsets = [1, 0], sizes = [1, 128], strides = [1, 1]} : vector<3x128xf32> to vector<1x128xf32>
    %11 = vector.broadcast %9 : vector<16x1xf32> to vector<16x128xf32>
    %12 = vector.broadcast %10 : vector<1x128xf32> to vector<16x128xf32>
    %13 = arith.mulf %11, %12 : vector<16x128xf32>
    %14 = arith.addf %8, %13 : vector<16x128xf32>
    %15 = vector.extract_strided_slice %1 {offsets = [0, 2], sizes = [16, 1], strides = [1, 1]} : vector<16x3xf32> to vector<16x1xf32>
    %16 = vector.extract_strided_slice %3 {offsets = [2, 0], sizes = [1, 128], strides = [1, 1]} : vector<3x128xf32> to vector<1x128xf32>
    %17 = vector.broadcast %15 : vector<16x1xf32> to vector<16x128xf32>
    %18 = vector.broadcast %16 : vector<1x128xf32> to vector<16x128xf32>
    %19 = arith.mulf %17, %18 : vector<16x128xf32>
    %20 = arith.addf %14, %19 : vector<16x128xf32>
    %c0_3 = arith.constant 0 : index
    %c0_4 = arith.constant 0 : index
    %21 = vector.load %arg3[%c0_3, %c0_4] : memref<1x128xf32, #tpu.memory_space<vmem>>, vector<1x128xf32>
    %22 = vector.broadcast %21 : vector<1x128xf32> to vector<16x128xf32>
    %23 = arith.addf %20, %22 : vector<16x128xf32>
    %cst = arith.constant 0.000000e+00 : f32
    %24 = vector.broadcast %cst : f32 to vector<16x128xf32>
    %25 = arith.maximumf %23, %24 : vector<16x128xf32>
    %26 = arith.truncf %25 : vector<16x128xf32> to vector<16x128xbf16>
    %c0_5 = arith.constant 0 : index
    %c0_6 = arith.constant 0 : index
    %27 = vector.load %arg4[%c0_5, %c0_6] : memref<128x384xbf16, #tpu.memory_space<vmem>>, vector<128x384xbf16>
    %cst_7 = arith.constant dense<0.000000e+00> : vector<16x384xf32>
    %28 = tpu.matmul %26, %27, %cst_7 {dimension_numbers = #tpu.dot_dimension_numbers<[1], [0], [0], [1], [0, 0, 1, 1], [], []>} : vector<16x128xbf16>, vector<128x384xbf16>, vector<16x384xf32> -> vector<16x384xf32>
    %c0_8 = arith.constant 0 : index
    %c0_9 = arith.constant 0 : index
    %29 = vector.load %arg5[%c0_8, %c0_9] : memref<1x384xf32, #tpu.memory_space<vmem>>, vector<1x384xf32>
    %30 = vector.broadcast %29 : vector<1x384xf32> to vector<16x384xf32>
    %31 = arith.addf %28, %30 : vector<16x384xf32>
    %32 = vector.extract_strided_slice %31 {offsets = [0, 0], sizes = [16, 32], strides = [1, 1]} : vector<16x384xf32> to vector<16x32xf32>
    %33 = vector.shape_cast %32 : vector<16x32xf32> to vector<2x8x32xf32>
    %34 = vector.extract_strided_slice %31 {offsets = [0, 32], sizes = [16, 32], strides = [1, 1]} : vector<16x384xf32> to vector<16x32xf32>
    %35 = vector.shape_cast %34 : vector<16x32xf32> to vector<2x8x32xf32>
    %36 = vector.extract_strided_slice %31 {offsets = [0, 64], sizes = [16, 32], strides = [1, 1]} : vector<16x384xf32> to vector<16x32xf32>
    %37 = vector.shape_cast %36 : vector<16x32xf32> to vector<2x8x32xf32>
    %38 = vector.extract_strided_slice %31 {offsets = [0, 96], sizes = [16, 32], strides = [1, 1]} : vector<16x384xf32> to vector<16x32xf32>
    %39 = vector.shape_cast %38 : vector<16x32xf32> to vector<2x8x32xf32>
    %40 = tpu.concatenate %33, %35, %37, %39 in 0 : vector<2x8x32xf32>, vector<2x8x32xf32>, vector<2x8x32xf32>, vector<2x8x32xf32> -> vector<8x8x32xf32>
    %41 = arith.truncf %40 : vector<8x8x32xf32> to vector<8x8x32xbf16>
    %42 = vector.extract_strided_slice %31 {offsets = [0, 128], sizes = [16, 32], strides = [1, 1]} : vector<16x384xf32> to vector<16x32xf32>
    %43 = vector.shape_cast %42 : vector<16x32xf32> to vector<2x8x32xf32>
    %44 = vector.extract_strided_slice %31 {offsets = [0, 160], sizes = [16, 32], strides = [1, 1]} : vector<16x384xf32> to vector<16x32xf32>
    %45 = vector.shape_cast %44 : vector<16x32xf32> to vector<2x8x32xf32>
    %46 = vector.extract_strided_slice %31 {offsets = [0, 192], sizes = [16, 32], strides = [1, 1]} : vector<16x384xf32> to vector<16x32xf32>
    %47 = vector.shape_cast %46 : vector<16x32xf32> to vector<2x8x32xf32>
    %48 = vector.extract_strided_slice %31 {offsets = [0, 224], sizes = [16, 32], strides = [1, 1]} : vector<16x384xf32> to vector<16x32xf32>
    %49 = vector.shape_cast %48 : vector<16x32xf32> to vector<2x8x32xf32>
    %50 = tpu.concatenate %43, %45, %47, %49 in 0 : vector<2x8x32xf32>, vector<2x8x32xf32>, vector<2x8x32xf32>, vector<2x8x32xf32> -> vector<8x8x32xf32>
    %51 = arith.truncf %50 : vector<8x8x32xf32> to vector<8x8x32xbf16>
    %52 = vector.extract_strided_slice %31 {offsets = [0, 256], sizes = [16, 32], strides = [1, 1]} : vector<16x384xf32> to vector<16x32xf32>
    %53 = vector.shape_cast %52 : vector<16x32xf32> to vector<2x8x32xf32>
    %54 = vector.extract_strided_slice %31 {offsets = [0, 288], sizes = [16, 32], strides = [1, 1]} : vector<16x384xf32> to vector<16x32xf32>
    %55 = vector.shape_cast %54 : vector<16x32xf32> to vector<2x8x32xf32>
    %56 = vector.extract_strided_slice %31 {offsets = [0, 320], sizes = [16, 32], strides = [1, 1]} : vector<16x384xf32> to vector<16x32xf32>
    %57 = vector.shape_cast %56 : vector<16x32xf32> to vector<2x8x32xf32>
    %58 = vector.extract_strided_slice %31 {offsets = [0, 352], sizes = [16, 32], strides = [1, 1]} : vector<16x384xf32> to vector<16x32xf32>
    %59 = vector.shape_cast %58 : vector<16x32xf32> to vector<2x8x32xf32>
    %60 = tpu.concatenate %53, %55, %57, %59 in 0 : vector<2x8x32xf32>, vector<2x8x32xf32>, vector<2x8x32xf32>, vector<2x8x32xf32> -> vector<8x8x32xf32>
    %61 = arith.truncf %60 : vector<8x8x32xf32> to vector<8x8x32xbf16>
    "tpu.trace_start"() <{level = 10 : i32, message = "bqd,bkd->bqk"}> : () -> ()
    %cst_10 = arith.constant dense<0.000000e+00> : vector<8x8x8xf32>
    %62 = tpu.matmul %41, %51, %cst_10 {dimension_numbers = #tpu.dot_dimension_numbers<[2], [2], [1], [1], [0, 0, 0, 1, 1, 1], [0], [0]>} : vector<8x8x32xbf16>, vector<8x8x32xbf16>, vector<8x8x8xf32> -> vector<8x8x8xf32>
    "tpu.trace_stop"() : () -> ()
    %cst_11 = arith.constant dense<0xFF800000> : vector<8x8xf32>
    %63 = vector.multi_reduction <maximumf>, %62, %cst_11 [2] : vector<8x8x8xf32> to vector<8x8xf32>
    %64 = vector.shape_cast %63 : vector<8x8xf32> to vector<8x8x1xf32>
    %65 = vector.broadcast %64 : vector<8x8x1xf32> to vector<8x8x8xf32>
    %66 = arith.subf %62, %65 : vector<8x8x8xf32>
    %67 = math.exp %66 : vector<8x8x8xf32>
    %cst_12 = arith.constant dense<0.000000e+00> : vector<8x8xf32>
    %68 = vector.multi_reduction <add>, %67, %cst_12 [2] : vector<8x8x8xf32> to vector<8x8xf32>
    %69 = vector.shape_cast %68 : vector<8x8xf32> to vector<8x8x1xf32>
    %70 = tpu.reciprocal %69 {approx = true} : vector<8x8x1xf32> -> vector<8x8x1xf32>
    %71 = vector.broadcast %70 : vector<8x8x1xf32> to vector<8x8x8xf32>
    %72 = arith.mulf %67, %71 : vector<8x8x8xf32>
    %73 = arith.truncf %72 : vector<8x8x8xf32> to vector<8x8x8xbf16>
    "tpu.trace_start"() <{level = 10 : i32, message = "bqk,bkd->bqd"}> : () -> ()
    %cst_13 = arith.constant dense<0.000000e+00> : vector<8x8x32xf32>
    %74 = tpu.matmul %73, %61, %cst_13 {dimension_numbers = #tpu.dot_dimension_numbers<[2], [1], [1], [2], [0, 0, 0, 1, 1, 2], [0], [0]>} : vector<8x8x8xbf16>, vector<8x8x32xbf16>, vector<8x8x32xf32> -> vector<8x8x32xf32>
    "tpu.trace_stop"() : () -> ()
    %75 = vector.extract_strided_slice %74 {offsets = [0, 0, 0], sizes = [2, 8, 32], strides = [1, 1, 1]} : vector<8x8x32xf32> to vector<2x8x32xf32>
    %76 = vector.shape_cast %75 : vector<2x8x32xf32> to vector<16x32xf32>
    %77 = vector.extract_strided_slice %74 {offsets = [2, 0, 0], sizes = [2, 8, 32], strides = [1, 1, 1]} : vector<8x8x32xf32> to vector<2x8x32xf32>
    %78 = vector.shape_cast %77 : vector<2x8x32xf32> to vector<16x32xf32>
    %79 = vector.extract_strided_slice %74 {offsets = [4, 0, 0], sizes = [2, 8, 32], strides = [1, 1, 1]} : vector<8x8x32xf32> to vector<2x8x32xf32>
    %80 = vector.shape_cast %79 : vector<2x8x32xf32> to vector<16x32xf32>
    %81 = vector.extract_strided_slice %74 {offsets = [6, 0, 0], sizes = [2, 8, 32], strides = [1, 1, 1]} : vector<8x8x32xf32> to vector<2x8x32xf32>
    %82 = vector.shape_cast %81 : vector<2x8x32xf32> to vector<16x32xf32>
    %83 = tpu.concatenate %76, %78, %80, %82 in 1 : vector<16x32xf32>, vector<16x32xf32>, vector<16x32xf32>, vector<16x32xf32> -> vector<16x128xf32>
    %84 = arith.truncf %83 : vector<16x128xf32> to vector<16x128xbf16>
    %c0_14 = arith.constant 0 : index
    %c0_15 = arith.constant 0 : index
    %85 = vector.load %arg6[%c0_14, %c0_15] : memref<128x128xbf16, #tpu.memory_space<vmem>>, vector<128x128xbf16>
    %cst_16 = arith.constant dense<0.000000e+00> : vector<16x128xf32>
    %86 = tpu.matmul %84, %85, %cst_16 {dimension_numbers = #tpu.dot_dimension_numbers<[1], [0], [0], [1], [0, 0, 1, 1], [], []>} : vector<16x128xbf16>, vector<128x128xbf16>, vector<16x128xf32> -> vector<16x128xf32>
    %c0_17 = arith.constant 0 : index
    %c0_18 = arith.constant 0 : index
    %87 = vector.load %arg7[%c0_17, %c0_18] : memref<1x128xf32, #tpu.memory_space<vmem>>, vector<1x128xf32>
    %88 = vector.broadcast %87 : vector<1x128xf32> to vector<16x128xf32>
    %89 = arith.addf %86, %88 : vector<16x128xf32>
    %90 = arith.addf %25, %89 : vector<16x128xf32>
    %91 = arith.truncf %90 : vector<16x128xf32> to vector<16x128xbf16>
    %c0_19 = arith.constant 0 : index
    %c0_20 = arith.constant 0 : index
    %92 = vector.load %arg8[%c0_19, %c0_20] : memref<128x256xbf16, #tpu.memory_space<vmem>>, vector<128x256xbf16>
    %cst_21 = arith.constant dense<0.000000e+00> : vector<16x256xf32>
    %93 = tpu.matmul %91, %92, %cst_21 {dimension_numbers = #tpu.dot_dimension_numbers<[1], [0], [0], [1], [0, 0, 1, 1], [], []>} : vector<16x128xbf16>, vector<128x256xbf16>, vector<16x256xf32> -> vector<16x256xf32>
    %c0_22 = arith.constant 0 : index
    %c0_23 = arith.constant 0 : index
    %94 = vector.load %arg9[%c0_22, %c0_23] : memref<1x256xf32, #tpu.memory_space<vmem>>, vector<1x256xf32>
    %95 = vector.broadcast %94 : vector<1x256xf32> to vector<16x256xf32>
    %96 = arith.addf %93, %95 : vector<16x256xf32>
    %cst_24 = arith.constant 0.000000e+00 : f32
    %97 = vector.broadcast %cst_24 : f32 to vector<16x256xf32>
    %98 = arith.maximumf %96, %97 : vector<16x256xf32>
    %99 = arith.truncf %98 : vector<16x256xf32> to vector<16x256xbf16>
    %c0_25 = arith.constant 0 : index
    %c0_26 = arith.constant 0 : index
    %100 = vector.load %arg10[%c0_25, %c0_26] : memref<256x256xbf16, #tpu.memory_space<vmem>>, vector<256x256xbf16>
    %cst_27 = arith.constant dense<0.000000e+00> : vector<16x256xf32>
    %101 = tpu.matmul %99, %100, %cst_27 {dimension_numbers = #tpu.dot_dimension_numbers<[1], [0], [0], [1], [0, 0, 1, 1], [], []>} : vector<16x256xbf16>, vector<256x256xbf16>, vector<16x256xf32> -> vector<16x256xf32>
    %c0_28 = arith.constant 0 : index
    %c0_29 = arith.constant 0 : index
    %102 = vector.load %arg11[%c0_28, %c0_29] : memref<1x256xf32, #tpu.memory_space<vmem>>, vector<1x256xf32>
    %103 = vector.broadcast %102 : vector<1x256xf32> to vector<16x256xf32>
    %104 = arith.addf %101, %103 : vector<16x256xf32>
    %cst_30 = arith.constant 0.000000e+00 : f32
    %105 = vector.broadcast %cst_30 : f32 to vector<16x256xf32>
    %106 = arith.maximumf %104, %105 : vector<16x256xf32>
    %107 = arith.truncf %106 : vector<16x256xf32> to vector<16x256xbf16>
    %c0_31 = arith.constant 0 : index
    %c0_32 = arith.constant 0 : index
    %108 = vector.load %arg12[%c0_31, %c0_32] : memref<256x256xbf16, #tpu.memory_space<vmem>>, vector<256x256xbf16>
    %cst_33 = arith.constant dense<0.000000e+00> : vector<16x256xf32>
    %109 = tpu.matmul %107, %108, %cst_33 {dimension_numbers = #tpu.dot_dimension_numbers<[1], [0], [0], [1], [0, 0, 1, 1], [], []>} : vector<16x256xbf16>, vector<256x256xbf16>, vector<16x256xf32> -> vector<16x256xf32>
    %c0_34 = arith.constant 0 : index
    %c0_35 = arith.constant 0 : index
    %110 = vector.load %arg13[%c0_34, %c0_35] : memref<1x256xf32, #tpu.memory_space<vmem>>, vector<1x256xf32>
    %111 = vector.broadcast %110 : vector<1x256xf32> to vector<16x256xf32>
    %112 = arith.addf %109, %111 : vector<16x256xf32>
    %cst_36 = arith.constant 0.000000e+00 : f32
    %113 = vector.broadcast %cst_36 : f32 to vector<16x256xf32>
    %114 = arith.maximumf %112, %113 : vector<16x256xf32>
    %115 = arith.truncf %114 : vector<16x256xf32> to vector<16x256xbf16>
    %c0_37 = arith.constant 0 : index
    %c0_38 = arith.constant 0 : index
    %116 = vector.load %arg14[%c0_37, %c0_38] : memref<256x256xbf16, #tpu.memory_space<vmem>>, vector<256x256xbf16>
    %cst_39 = arith.constant dense<0.000000e+00> : vector<16x256xf32>
    %117 = tpu.matmul %115, %116, %cst_39 {dimension_numbers = #tpu.dot_dimension_numbers<[1], [0], [0], [1], [0, 0, 1, 1], [], []>} : vector<16x256xbf16>, vector<256x256xbf16>, vector<16x256xf32> -> vector<16x256xf32>
    %c0_40 = arith.constant 0 : index
    %c0_41 = arith.constant 0 : index
    %118 = vector.load %arg15[%c0_40, %c0_41] : memref<1x256xf32, #tpu.memory_space<vmem>>, vector<1x256xf32>
    %119 = vector.broadcast %118 : vector<1x256xf32> to vector<16x256xf32>
    %120 = arith.addf %117, %119 : vector<16x256xf32>
    %cst_42 = arith.constant 0.000000e+00 : f32
    %121 = vector.broadcast %cst_42 : f32 to vector<16x256xf32>
    %122 = arith.maximumf %120, %121 : vector<16x256xf32>
    %123 = arith.truncf %122 : vector<16x256xf32> to vector<16x256xbf16>
    %c0_43 = arith.constant 0 : index
    %c0_44 = arith.constant 0 : index
    %124 = vector.load %arg16[%c0_43, %c0_44] : memref<3x256xf32, #tpu.memory_space<vmem>>, vector<3x256xf32>
    %125 = vector.extract_strided_slice %1 {offsets = [0, 0], sizes = [16, 1], strides = [1, 1]} : vector<16x3xf32> to vector<16x1xf32>
    %126 = vector.extract_strided_slice %124 {offsets = [0, 0], sizes = [1, 256], strides = [1, 1]} : vector<3x256xf32> to vector<1x256xf32>
    %127 = vector.broadcast %125 : vector<16x1xf32> to vector<16x256xf32>
    %128 = vector.broadcast %126 : vector<1x256xf32> to vector<16x256xf32>
    %129 = arith.mulf %127, %128 : vector<16x256xf32>
    %130 = vector.extract_strided_slice %1 {offsets = [0, 1], sizes = [16, 1], strides = [1, 1]} : vector<16x3xf32> to vector<16x1xf32>
    %131 = vector.extract_strided_slice %124 {offsets = [1, 0], sizes = [1, 256], strides = [1, 1]} : vector<3x256xf32> to vector<1x256xf32>
    %132 = vector.broadcast %130 : vector<16x1xf32> to vector<16x256xf32>
    %133 = vector.broadcast %131 : vector<1x256xf32> to vector<16x256xf32>
    %134 = arith.mulf %132, %133 : vector<16x256xf32>
    %135 = arith.addf %129, %134 : vector<16x256xf32>
    %136 = vector.extract_strided_slice %1 {offsets = [0, 2], sizes = [16, 1], strides = [1, 1]} : vector<16x3xf32> to vector<16x1xf32>
    %137 = vector.extract_strided_slice %124 {offsets = [2, 0], sizes = [1, 256], strides = [1, 1]} : vector<3x256xf32> to vector<1x256xf32>
    %138 = vector.broadcast %136 : vector<16x1xf32> to vector<16x256xf32>
    %139 = vector.broadcast %137 : vector<1x256xf32> to vector<16x256xf32>
    %140 = arith.mulf %138, %139 : vector<16x256xf32>
    %141 = arith.addf %135, %140 : vector<16x256xf32>
    %c0_45 = arith.constant 0 : index
    %c0_46 = arith.constant 0 : index
    %142 = vector.load %arg17[%c0_45, %c0_46] : memref<256x256xbf16, #tpu.memory_space<vmem>>, vector<256x256xbf16>
    %cst_47 = arith.constant dense<0.000000e+00> : vector<16x256xf32>
    %143 = tpu.matmul %123, %142, %cst_47 {dimension_numbers = #tpu.dot_dimension_numbers<[1], [0], [0], [1], [0, 0, 1, 1], [], []>} : vector<16x256xbf16>, vector<256x256xbf16>, vector<16x256xf32> -> vector<16x256xf32>
    %144 = arith.addf %141, %143 : vector<16x256xf32>
    %c0_48 = arith.constant 0 : index
    %c0_49 = arith.constant 0 : index
    %145 = vector.load %arg18[%c0_48, %c0_49] : memref<1x256xf32, #tpu.memory_space<vmem>>, vector<1x256xf32>
    %146 = vector.broadcast %145 : vector<1x256xf32> to vector<16x256xf32>
    %147 = arith.addf %144, %146 : vector<16x256xf32>
    %cst_50 = arith.constant 0.000000e+00 : f32
    %148 = vector.broadcast %cst_50 : f32 to vector<16x256xf32>
    %149 = arith.maximumf %147, %148 : vector<16x256xf32>
    %150 = arith.truncf %149 : vector<16x256xf32> to vector<16x256xbf16>
    %c0_51 = arith.constant 0 : index
    %c0_52 = arith.constant 0 : index
    %151 = vector.load %arg19[%c0_51, %c0_52] : memref<256x256xbf16, #tpu.memory_space<vmem>>, vector<256x256xbf16>
    %cst_53 = arith.constant dense<0.000000e+00> : vector<16x256xf32>
    %152 = tpu.matmul %150, %151, %cst_53 {dimension_numbers = #tpu.dot_dimension_numbers<[1], [0], [0], [1], [0, 0, 1, 1], [], []>} : vector<16x256xbf16>, vector<256x256xbf16>, vector<16x256xf32> -> vector<16x256xf32>
    %c0_54 = arith.constant 0 : index
    %c0_55 = arith.constant 0 : index
    %153 = vector.load %arg20[%c0_54, %c0_55] : memref<1x256xf32, #tpu.memory_space<vmem>>, vector<1x256xf32>
    %154 = vector.broadcast %153 : vector<1x256xf32> to vector<16x256xf32>
    %155 = arith.addf %152, %154 : vector<16x256xf32>
    %cst_56 = arith.constant 0.000000e+00 : f32
    %156 = vector.broadcast %cst_56 : f32 to vector<16x256xf32>
    %157 = arith.maximumf %155, %156 : vector<16x256xf32>
    %158 = arith.truncf %157 : vector<16x256xf32> to vector<16x256xbf16>
    %159 = arith.extf %158 : vector<16x256xbf16> to vector<16x256xf32>
    %c0_57 = arith.constant 0 : index
    %c0_58 = arith.constant 0 : index
    %160 = vector.load %arg21[%c0_57, %c0_58] : memref<1x256xf32, #tpu.memory_space<vmem>>, vector<1x256xf32>
    %161 = vector.broadcast %160 : vector<1x256xf32> to vector<16x256xf32>
    %162 = arith.mulf %159, %161 : vector<16x256xf32>
    %cst_59 = arith.constant dense<0.000000e+00> : vector<16xf32>
    %163 = vector.multi_reduction <add>, %162, %cst_59 [1] : vector<16x256xf32> to vector<16xf32>
    %164 = vector.shape_cast %163 : vector<16xf32> to vector<16x1xf32>
    %c0_60 = arith.constant 0 : index
    %c0_61 = arith.constant 0 : index
    %165 = vector.load %arg22[%c0_60, %c0_61] : memref<1x1xf32, #tpu.memory_space<vmem>>, vector<1x1xf32>
    %166 = vector.broadcast %165 : vector<1x1xf32> to vector<16x1xf32>
    %167 = arith.addf %164, %166 : vector<16x1xf32>
    %cst_62 = arith.constant 0.000000e+00 : f32
    %168 = vector.broadcast %cst_62 : f32 to vector<16x1xf32>
    %169 = arith.maximumf %167, %168 : vector<16x1xf32>
    %c0_63 = arith.constant 0 : index
    %c0_64 = arith.constant 0 : index
    %170 = vector.load %arg23[%c0_63, %c0_64] : memref<256x256xbf16, #tpu.memory_space<vmem>>, vector<256x256xbf16>
    %cst_65 = arith.constant dense<0.000000e+00> : vector<16x256xf32>
    %171 = tpu.matmul %158, %170, %cst_65 {dimension_numbers = #tpu.dot_dimension_numbers<[1], [0], [0], [1], [0, 0, 1, 1], [], []>} : vector<16x256xbf16>, vector<256x256xbf16>, vector<16x256xf32> -> vector<16x256xf32>
    %c0_66 = arith.constant 0 : index
    %c0_67 = arith.constant 0 : index
    %172 = vector.load %arg24[%c0_66, %c0_67] : memref<1x256xf32, #tpu.memory_space<vmem>>, vector<1x256xf32>
    %173 = vector.broadcast %172 : vector<1x256xf32> to vector<16x256xf32>
    %174 = arith.addf %171, %173 : vector<16x256xf32>
    %175 = arith.truncf %174 : vector<16x256xf32> to vector<16x256xbf16>
    %c0_68 = arith.constant 0 : index
    %c0_69 = arith.constant 0 : index
    %176 = vector.load %arg25[%c0_68, %c0_69] : memref<256x128xbf16, #tpu.memory_space<vmem>>, vector<256x128xbf16>
    %cst_70 = arith.constant dense<0.000000e+00> : vector<16x128xf32>
    %177 = tpu.matmul %175, %176, %cst_70 {dimension_numbers = #tpu.dot_dimension_numbers<[1], [0], [0], [1], [0, 0, 1, 1], [], []>} : vector<16x256xbf16>, vector<256x128xbf16>, vector<16x128xf32> -> vector<16x128xf32>
    %c0_71 = arith.constant 0 : index
    %c0_72 = arith.constant 0 : index
    %178 = vector.load %arg26[%c0_71, %c0_72] : memref<3x128xf32, #tpu.memory_space<vmem>>, vector<3x128xf32>
    %179 = vector.extract_strided_slice %2 {offsets = [0, 0], sizes = [16, 1], strides = [1, 1]} : vector<16x3xf32> to vector<16x1xf32>
    %180 = vector.extract_strided_slice %178 {offsets = [0, 0], sizes = [1, 128], strides = [1, 1]} : vector<3x128xf32> to vector<1x128xf32>
    %181 = vector.broadcast %179 : vector<16x1xf32> to vector<16x128xf32>
    %182 = vector.broadcast %180 : vector<1x128xf32> to vector<16x128xf32>
    %183 = arith.mulf %181, %182 : vector<16x128xf32>
    %184 = vector.extract_strided_slice %2 {offsets = [0, 1], sizes = [16, 1], strides = [1, 1]} : vector<16x3xf32> to vector<16x1xf32>
    %185 = vector.extract_strided_slice %178 {offsets = [1, 0], sizes = [1, 128], strides = [1, 1]} : vector<3x128xf32> to vector<1x128xf32>
    %186 = vector.broadcast %184 : vector<16x1xf32> to vector<16x128xf32>
    %187 = vector.broadcast %185 : vector<1x128xf32> to vector<16x128xf32>
    %188 = arith.mulf %186, %187 : vector<16x128xf32>
    %189 = arith.addf %183, %188 : vector<16x128xf32>
    %190 = vector.extract_strided_slice %2 {offsets = [0, 2], sizes = [16, 1], strides = [1, 1]} : vector<16x3xf32> to vector<16x1xf32>
    %191 = vector.extract_strided_slice %178 {offsets = [2, 0], sizes = [1, 128], strides = [1, 1]} : vector<3x128xf32> to vector<1x128xf32>
    %192 = vector.broadcast %190 : vector<16x1xf32> to vector<16x128xf32>
    %193 = vector.broadcast %191 : vector<1x128xf32> to vector<16x128xf32>
    %194 = arith.mulf %192, %193 : vector<16x128xf32>
    %195 = arith.addf %189, %194 : vector<16x128xf32>
    %196 = arith.addf %177, %195 : vector<16x128xf32>
    %c0_73 = arith.constant 0 : index
    %c0_74 = arith.constant 0 : index
    %197 = vector.load %arg27[%c0_73, %c0_74] : memref<1x128xf32, #tpu.memory_space<vmem>>, vector<1x128xf32>
    %198 = vector.broadcast %197 : vector<1x128xf32> to vector<16x128xf32>
    %199 = arith.addf %196, %198 : vector<16x128xf32>
    %cst_75 = arith.constant 0.000000e+00 : f32
    %200 = vector.broadcast %cst_75 : f32 to vector<16x128xf32>
    %201 = arith.maximumf %199, %200 : vector<16x128xf32>
    %c0_76 = arith.constant 0 : index
    %c0_77 = arith.constant 0 : index
    %202 = vector.load %arg28[%c0_76, %c0_77] : memref<3x128xf32, #tpu.memory_space<vmem>>, vector<3x128xf32>
    %203 = vector.extract_strided_slice %202 {offsets = [0, 0], sizes = [1, 128], strides = [1, 1]} : vector<3x128xf32> to vector<1x128xf32>
    %204 = vector.broadcast %203 : vector<1x128xf32> to vector<16x128xf32>
    %205 = arith.mulf %201, %204 : vector<16x128xf32>
    %cst_78 = arith.constant dense<0.000000e+00> : vector<16xf32>
    %206 = vector.multi_reduction <add>, %205, %cst_78 [1] : vector<16x128xf32> to vector<16xf32>
    %207 = vector.shape_cast %206 : vector<16xf32> to vector<16x1xf32>
    %208 = vector.extract_strided_slice %202 {offsets = [1, 0], sizes = [1, 128], strides = [1, 1]} : vector<3x128xf32> to vector<1x128xf32>
    %209 = vector.broadcast %208 : vector<1x128xf32> to vector<16x128xf32>
    %210 = arith.mulf %201, %209 : vector<16x128xf32>
    %cst_79 = arith.constant dense<0.000000e+00> : vector<16xf32>
    %211 = vector.multi_reduction <add>, %210, %cst_79 [1] : vector<16x128xf32> to vector<16xf32>
    %212 = vector.shape_cast %211 : vector<16xf32> to vector<16x1xf32>
    %213 = vector.extract_strided_slice %202 {offsets = [2, 0], sizes = [1, 128], strides = [1, 1]} : vector<3x128xf32> to vector<1x128xf32>
    %214 = vector.broadcast %213 : vector<1x128xf32> to vector<16x128xf32>
    %215 = arith.mulf %201, %214 : vector<16x128xf32>
    %cst_80 = arith.constant dense<0.000000e+00> : vector<16xf32>
    %216 = vector.multi_reduction <add>, %215, %cst_80 [1] : vector<16x128xf32> to vector<16xf32>
    %217 = vector.shape_cast %216 : vector<16xf32> to vector<16x1xf32>
    %218 = tpu.concatenate %207, %212, %217 in 1 : vector<16x1xf32>, vector<16x1xf32>, vector<16x1xf32> -> vector<16x3xf32>
    %c0_81 = arith.constant 0 : index
    %c0_82 = arith.constant 0 : index
    %219 = vector.load %arg29[%c0_81, %c0_82] : memref<1x3xf32, #tpu.memory_space<vmem>>, vector<1x3xf32>
    %220 = vector.broadcast %219 : vector<1x3xf32> to vector<16x3xf32>
    %221 = arith.addf %218, %220 : vector<16x3xf32>
    %222 = arith.negf %221 : vector<16x3xf32>
    %223 = math.exp %222 : vector<16x3xf32>
    %cst_83 = arith.constant 1.000000e+00 : f32
    %224 = vector.broadcast %cst_83 : f32 to vector<16x3xf32>
    %225 = arith.addf %224, %223 : vector<16x3xf32>
    %226 = arith.divf %224, %225 : vector<16x3xf32>
    %227 = tpu.concatenate %226, %169 in 1 : vector<16x3xf32>, vector<16x1xf32> -> vector<16x4xf32>
    %c0_84 = arith.constant 0 : index
    %c0_85 = arith.constant 0 : index
    %228 = vector.load %arg30[%c0_84, %c0_85] : memref<16x4xf32, #tpu.memory_space<vmem>>, vector<16x4xf32>
    tpu.vector_store %arg30[%c0_84, %c0_85], %227 {strides = array<i32>} : memref<16x4xf32, #tpu.memory_space<vmem>>, vector<16x4xf32>,
    return
  }
  func.func @transform_0(%arg0: i32) -> (i32, i32) {
    %c0_i32 = arith.constant 0 : i32
    %c0_i32_0 = arith.constant 0 : i32
    return %arg0, %c0_i32 : i32, i32
  }
  func.func @transform_1(%arg0: i32) -> (i32, i32) {
    %c0_i32 = arith.constant 0 : i32
    %c0_i32_0 = arith.constant 0 : i32
    %c0_i32_1 = arith.constant 0 : i32
    return %c0_i32, %c0_i32_0 : i32, i32
  }
  func.func @transform_2(%arg0: i32) -> (i32, i32) {
    %c0_i32 = arith.constant 0 : i32
    %c0_i32_0 = arith.constant 0 : i32
    %c0_i32_1 = arith.constant 0 : i32
    return %c0_i32, %c0_i32_0 : i32, i32
  }
  func.func @transform_3(%arg0: i32) -> (i32, i32) {
    %c0_i32 = arith.constant 0 : i32
    %c0_i32_0 = arith.constant 0 : i32
    %c0_i32_1 = arith.constant 0 : i32
    return %c0_i32, %c0_i32_0 : i32, i32
  }
  func.func @transform_4(%arg0: i32) -> (i32, i32) {
    %c0_i32 = arith.constant 0 : i32
    %c0_i32_0 = arith.constant 0 : i32
    %c0_i32_1 = arith.constant 0 : i32
    return %c0_i32, %c0_i32_0 : i32, i32
  }
  func.func @transform_5(%arg0: i32) -> (i32, i32) {
    %c0_i32 = arith.constant 0 : i32
    %c0_i32_0 = arith.constant 0 : i32
    %c0_i32_1 = arith.constant 0 : i32
    return %c0_i32, %c0_i32_0 : i32, i32
  }
  func.func @transform_6(%arg0: i32) -> (i32, i32) {
    %c0_i32 = arith.constant 0 : i32
    %c0_i32_0 = arith.constant 0 : i32
    %c0_i32_1 = arith.constant 0 : i32
    return %c0_i32, %c0_i32_0 : i32, i32
  }
  func.func @transform_7(%arg0: i32) -> (i32, i32) {
    %c0_i32 = arith.constant 0 : i32
    %c0_i32_0 = arith.constant 0 : i32
    %c0_i32_1 = arith.constant 0 : i32
    return %c0_i32, %c0_i32_0 : i32, i32
  }
  func.func @transform_8(%arg0: i32) -> (i32, i32) {
    %c0_i32 = arith.constant 0 : i32
    %c0_i32_0 = arith.constant 0 : i32
    %c0_i32_1 = arith.constant 0 : i32
    return %c0_i32, %c0_i32_0 : i32, i32
  }
  func.func @transform_9(%arg0: i32) -> (i32, i32) {
    %c0_i32 = arith.constant 0 : i32
    %c0_i32_0 = arith.constant 0 : i32
    %c0_i32_1 = arith.constant 0 : i32
    return %c0_i32, %c0_i32_0 : i32, i32
  }
  func.func @transform_10(%arg0: i32) -> (i32, i32) {
    %c0_i32 = arith.constant 0 : i32
    %c0_i32_0 = arith.constant 0 : i32
    %c0_i32_1 = arith.constant 0 : i32
    return %c0_i32, %c0_i32_0 : i32, i32
  }
  func.func @transform_11(%arg0: i32) -> (i32, i32) {
    %c0_i32 = arith.constant 0 : i32
    %c0_i32_0 = arith.constant 0 : i32
    %c0_i32_1 = arith.constant 0 : i32
    return %c0_i32, %c0_i32_0 : i32, i32
  }
  func.func @transform_12(%arg0: i32) -> (i32, i32) {
    %c0_i32 = arith.constant 0 : i32
    %c0_i32_0 = arith.constant 0 : i32
    %c0_i32_1 = arith.constant 0 : i32
    return %c0_i32, %c0_i32_0 : i32, i32
  }
  func.func @transform_13(%arg0: i32) -> (i32, i32) {
    %c0_i32 = arith.constant 0 : i32
    %c0_i32_0 = arith.constant 0 : i32
    %c0_i32_1 = arith.constant 0 : i32
    return %c0_i32, %c0_i32_0 : i32, i32
  }
  func.func @transform_14(%arg0: i32) -> (i32, i32) {
    %c0_i32 = arith.constant 0 : i32
    %c0_i32_0 = arith.constant 0 : i32
    %c0_i32_1 = arith.constant 0 : i32
    return %c0_i32, %c0_i32_0 : i32, i32
  }
  func.func @transform_15(%arg0: i32) -> (i32, i32) {
    %c0_i32 = arith.constant 0 : i32
    %c0_i32_0 = arith.constant 0 : i32
    %c0_i32_1 = arith.constant 0 : i32
    return %c0_i32, %c0_i32_0 : i32, i32
  }
  func.func @transform_16(%arg0: i32) -> (i32, i32) {
    %c0_i32 = arith.constant 0 : i32
    %c0_i32_0 = arith.constant 0 : i32
    %c0_i32_1 = arith.constant 0 : i32
    return %c0_i32, %c0_i32_0 : i32, i32
  }
  func.func @transform_17(%arg0: i32) -> (i32, i32) {
    %c0_i32 = arith.constant 0 : i32
    %c0_i32_0 = arith.constant 0 : i32
    %c0_i32_1 = arith.constant 0 : i32
    return %c0_i32, %c0_i32_0 : i32, i32
  }
  func.func @transform_18(%arg0: i32) -> (i32, i32) {
    %c0_i32 = arith.constant 0 : i32
    %c0_i32_0 = arith.constant 0 : i32
    %c0_i32_1 = arith.constant 0 : i32
    return %c0_i32, %c0_i32_0 : i32, i32
  }
  func.func @transform_19(%arg0: i32) -> (i32, i32) {
    %c0_i32 = arith.constant 0 : i32
    %c0_i32_0 = arith.constant 0 : i32
    %c0_i32_1 = arith.constant 0 : i32
    return %c0_i32, %c0_i32_0 : i32, i32
  }
  func.func @transform_20(%arg0: i32) -> (i32, i32) {
    %c0_i32 = arith.constant 0 : i32
    %c0_i32_0 = arith.constant 0 : i32
    %c0_i32_1 = arith.constant 0 : i32
    return %c0_i32, %c0_i32_0 : i32, i32
  }
  func.func @transform_21(%arg0: i32) -> (i32, i32) {
    %c0_i32 = arith.constant 0 : i32
    %c0_i32_0 = arith.constant 0 : i32
    %c0_i32_1 = arith.constant 0 : i32
    return %c0_i32, %c0_i32_0 : i32, i32
  }
  func.func @transform_22(%arg0: i32) -> (i32, i32) {
    %c0_i32 = arith.constant 0 : i32
    %c0_i32_0 = arith.constant 0 : i32
    %c0_i32_1 = arith.constant 0 : i32
    return %c0_i32, %c0_i32_0 : i32, i32
  }
  func.func @transform_23(%arg0: i32) -> (i32, i32) {
    %c0_i32 = arith.constant 0 : i32
    %c0_i32_0 = arith.constant 0 : i32
    %c0_i32_1 = arith.constant 0 : i32
    return %c0_i32, %c0_i32_0 : i32, i32
  }
  func.func @transform_24(%arg0: i32) -> (i32, i32) {
    %c0_i32 = arith.constant 0 : i32
    %c0_i32_0 = arith.constant 0 : i32
    %c0_i32_1 = arith.constant 0 : i32
    return %c0_i32, %c0_i32_0 : i32, i32
  }
  func.func @transform_25(%arg0: i32) -> (i32, i32) {
    %c0_i32 = arith.constant 0 : i32
    %c0_i32_0 = arith.constant 0 : i32
    %c0_i32_1 = arith.constant 0 : i32
    return %c0_i32, %c0_i32_0 : i32, i32
  }
  func.func @transform_26(%arg0: i32) -> (i32, i32) {
    %c0_i32 = arith.constant 0 : i32
    %c0_i32_0 = arith.constant 0 : i32
    %c0_i32_1 = arith.constant 0 : i32
    return %c0_i32, %c0_i32_0 : i32, i32
  }
  func.func @transform_27(%arg0: i32) -> (i32, i32) {
    %c0_i32 = arith.constant 0 : i32
    %c0_i32_0 = arith.constant 0 : i32
    %c0_i32_1 = arith.constant 0 : i32
    return %c0_i32, %c0_i32_0 : i32, i32
  }
  func.func @transform_28(%arg0: i32) -> (i32, i32) {
    %c0_i32 = arith.constant 0 : i32
    %c0_i32_0 = arith.constant 0 : i32
    %c0_i32_1 = arith.constant 0 : i32
    return %c0_i32, %c0_i32_0 : i32, i32
  }
  func.func @transform_29(%arg0: i32) -> (i32, i32) {
    %c0_i32 = arith.constant 0 : i32
    %c0_i32_0 = arith.constant 0 : i32
    return %arg0, %c0_i32 : i32, i32
  }
}

</mosaic_0001>

<bundles_post_ra>
// kernel: tpu_custom_call.1
= control target key start
LH: loop header
LB: loop body
LE: loop exit
PB: predicated region body
PF: predicated region fallthrough
CT: control target
= control target key end

     0   :  { %s6091_s6 = smov 1   ;;  %s6092_s10 = smov 2   ;;  %s6697_s0 = inlined_call_operand.smem [shape: u32[30], index: -1, kind: input, shape index: {}] }
   0x1   :  { %s6154_s5 = sld [smem:[%s6697_s0]]   ;;  %s6093_s14 = smov 3  }
   0x2   :  { %s6159_s9 = sld [smem:[%s6697_s0 + %s6091_s6]]   ;;  %s6094_s18 = smov 4  }
   0x3   :  { %s6164_s13 = sld [smem:[%s6697_s0 + %s6092_s10]]   ;;  %s6095_s22 = smov 5  }
   0x4   :  { %s6169_s17 = sld [smem:[%s6697_s0 + %s6093_s14]]   ;;  %s6096_s26 = smov 6  }
   0x5   :  { %s6174_s21 = sld [smem:[%s6697_s0 + %s6094_s18]]   ;;  %s6097_s30 = smov 7  }
   0x6   :  { %s6179_s25 = sld [smem:[%s6697_s0 + %s6095_s22]]   ;;  %s6098_s4 = smov 8  }
   0x7   :  { %s6184_s29 = sld [smem:[%s6697_s0 + %s6096_s26]]   ;;  %s6099_s10 = smov 9  }
   0x8   :  { %s6189_s3 = sld [smem:[%s6697_s0 + %s6097_s30]]   ;;  %s6100_s15 = smov 10  }
   0x9   :  { %s6194_s8 = sld [smem:[%s6697_s0 + %s6098_s4]]   ;;  %s6101_s20 = smov 11  }
   0xa   :  { %s6199_s14 = sld [smem:[%s6697_s0 + %s6099_s10]]   ;;  %s6102_s26 = smov 12  }
   0xb   :  { %6706 = sst [smem:[#allocation25_spill]] %s6174_s21  ;;  %s6103_s1 = smov 13  }
   0xc   :  { %6707 = sst [smem:[#allocation26_spill]] %s6179_s25  ;;  %s6104_s7 = smov 14  }
   0xd   :  { %6708 = sst [smem:[#allocation27_spill]] %s6184_s29  ;;  %s6106_s22 = smov 16  }
   0xe   :  { %s6204_s19 = sld [smem:[%s6697_s0 + %s6100_s15]]   ;;  %s6105_s15 = smov 15  }
   0xf   :  { %6709 = sst [smem:[#allocation28_spill]] %s6194_s8  ;;  %s6107_s28 = smov 17  }
  0x10   :  { %s6209_s24 = sld [smem:[%s6697_s0 + %s6101_s20]]   ;;  %s6112_s10 = smov 22  }
  0x11   :  { %s6214_s30 = sld [smem:[%s6697_s0 + %s6102_s26]]   ;;  %s6113_s16 = smov 23  }
  0x12   :  { %s6219_s6 = sld [smem:[%s6697_s0 + %s6103_s1]]   ;;  %s6114_s23 = smov 24  }
  0x13   :  { %s6224_s12 = sld [smem:[%s6697_s0 + %s6104_s7]]   ;;  %s6108_s7 = smov 18  }
  0x14   :  { %6710 = sst [smem:[#allocation29_spill]] %s6204_s19  ;;  %s6115_s1 = smov 25  }
  0x15   :  { %s6229_s20 = sld [smem:[%s6697_s0 + %s6105_s15]]   ;;  %s6109_s15 = smov 19  }
  0x16   :  { %s6234_s27 = sld [smem:[%s6697_s0 + %s6106_s22]]   ;;  %s6110_s22 = smov 20  }
  0x17   :  { %6711 = sst [smem:[#allocation30_spill]] %s6214_s30 }
  0x18   :  { %s6239_s4 = sld [smem:[%s6697_s0 + %s6107_s28]]   ;;  %s6111_s28 = smov 21  }
  0x19   :  { %6712 = sst [smem:[#allocation31_spill]] %s6224_s12 }
  0x1a   :  { %s6244_s12 = sld [smem:[%s6697_s0 + %s6108_s7]]  }
  0x1b   :  { %s6249_s30 = sld [smem:[%s6697_s0 + %s6109_s15]]  }
  0x1c   :  { %s6254_s19 = sld [smem:[%s6697_s0 + %s6110_s22]]  }
  0x1d   :  { %s6262_s8 = sld [smem:[%s6697_s0 + %s6112_s10]]   ;;  %s6116_s10 = smov 26  }
  0x1e   :  { %6713 = sst [smem:[#allocation32_spill]] %s6239_s4 }
  0x1f   :  { %s4181_s4 = sld [smem:[%s6697_s0 + %s6111_s28]]  }
  0x20   :  { %s6277_s29 = sld [smem:[%s6697_s0 + %s6115_s1]]   ;;  %s6119_s1 = smov 29  }
  0x21   :  { %6714 = sst [smem:[#allocation33_spill]] %s6249_s30 }
  0x22   :  { %6715 = sst [smem:[#allocation34_spill]] %s6254_s19 }
  0x23   :  { %s6267_s30 = sld [smem:[%s6697_s0 + %s6113_s16]]   ;;  %s6117_s16 = smov 27  }
  0x24   :  { %s6272_s19 = sld [smem:[%s6697_s0 + %s6114_s23]]   ;;  %s6118_s23 = smov 28  }
  0x25   :  { %s6282_s21 = sld [smem:[%s6697_s0 + %s6116_s10]]   ;;  %v64_v0 = vstv %s4181_s4 }
  0x26   :  { %6717 = sst [smem:[#allocation36_spill]] %s6277_s29  ;;  %65 = vst [vmem:[#allocation2] sm:$0x1] %v64_v0 }
  0x27   :  { %s6292_s28 = sld [smem:[%s6697_s0 + %s6118_s23]]  }
  0x28   :  { %s6297_s10 = sld [smem:[%s6697_s0 + %s6119_s1]]  }
  0x29   :  { %6716 = sst [smem:[#allocation35_spill]] %s6267_s30 }
  0x2a   :  { %s6287_s30 = sld [smem:[%s6697_s0 + %s6117_s16]]  }
  0x2d   :  { %6718 = sst [smem:[#allocation37_spill]] %s6292_s28 }
  0x2e   :  { %6719 = sst [smem:[#allocation38_spill]] %s6297_s10 }
  0x2f   :  { %66 = vsyncpa [#allocation4], 0 }
  0x30   :  { %67 = vsyncpa [#allocation6], 0 }
  0x31   :  { %68 = vsyncpa [#allocation9], 0 }
  0x32   :  { %69 = vsyncpa [#allocation12], 0 }
  0x33   :  { %70 = vsyncpa [#allocation15], 0 }
  0x34   :  { %71 = vsyncpa [#allocation18], 0  ;;  %s6299_s4 = smov 0  }
  0x35 LB: > { %s6720_s25 = sld [smem:[#allocation26_spill]]  ;;  %s6698_s29 = sadd.s32 4294967295, %s6089_s4   ;;  %s6089_s4 = sphi %s6299_s4, %s77_s4  }
  0x36   : > { %p4192_p0 = scmp.ge.s32.totalorder %s6089_s4, 1  ;;  %p722_p1 = scmp.lt.s32.totalorder %s6089_s4, 3 }
  0x37   : > { %p6312_p2 = scmp.eq.s32.totalorder %s6698_s29, 0  ;;  %s6120_s16 = smov [#allocation5]  }
  0x38   : > { %p6316_p3 = pnand %p4192_p0, %p722_p1  ;;  %s758_s15 = sshll.u32 %s6120_s16, 4  ;;  %s759_s15 = int_to_ptr.vmem [resolvable:$true] %s758_s15 }
  0x39   : > { %s790_s23 = sshll.u32 %s6199_s14, 4  ;;  %s6121_s22 = smov [#allocation8]   ;;  %s6329_s23 = int_to_ptr.hbm [resolvable:$true] %s790_s23 }
  0x3a   : > { %p5559_p4 = pneg %p6316_p3  ;;  %s6331_s26 = sshll.u32 %s6121_s22, 4  ;;  %s793_s26 = int_to_ptr.vmem [resolvable:$true] %s6331_s26 }
  0x3b   : > { %s756_s0 = sshll.u32 %s6720_s25, 4  ;;  %s5766_s29 = scalar_lea.hbm %s6720_s25, 64  ;;  %s6305_s0 = int_to_ptr.hbm [resolvable:$true] %s756_s0 }
  0x3c   : > { %p6324_p5 = pnand %p6312_p2, %p5559_p4  ;;  %s5759_s1 = sshra.s32 %s6305_s0, 4  ;;  %s5760_s1 = int_to_ptr.hbm [resolvable:$true] %s5759_s1 }
  0x3d   : > { %s5761_s2 = scalar_lea.hbm %s5760_s1, 64  ;;  %p5767_p10 = scmp.lt.s32.totalorder %s5760_s1, %s6720_s25 }
  0x3e   : > { %p5762_p6 = scmp.ne.s32.totalorder %s5760_s1, %s5761_s2  ;;  %p6336_p7 = pneg %p6324_p5 }
  0x3f   : > { %p5768_p11 = scmp.lt.s32.totalorder %s5766_s29, %s5761_s2 }
  0x40   : > { %p5764_p8 = pnand %p6336_p7, %p5762_p6 }
  0x41   : > { %p5769_p12 = por %p5768_p11, %p5767_p10 }
  0x42   : > { %p5765_p9 = pneg %p5764_p8 }
  0x44   : > { %p5770_p13 = pnand %p5769_p12, %p5765_p9 }
  0x46   : > { %5773 = shalt.err (!%p5770_p13)
}
  0x47   : > { %s6700_s22 = smov 64   ;;  %s6701_s10 = smov 4  }
  0x48   : > { %5565 = dma.hbm_to_vmem [thread:$0]  (!%p6324_p5), %s6305_s0, 1024, %s759_s15, [#allocation6], %s6700_s22, %s6700_s22, %s6701_s10  }
  0x49   : > { %s824_s29 = sshll.u32 %s6219_s6, 4  ;;  %s5789_s1 = sshra.s32 %s6329_s23, 4  ;;  %s5790_s1 = int_to_ptr.hbm [resolvable:$true] %s5789_s1  ;;  %s825_s29 = int_to_ptr.hbm [resolvable:$true] %s824_s29 }
  0x4a   : > { %s5791_s2 = scalar_lea.hbm %s5790_s1, 256  ;;  %s5796_s25 = scalar_lea.hbm %s6199_s14, 256 }
  0x4b   : > { %p5792_p0 = scmp.ne.s32.totalorder %s5790_s1, %s5791_s2  ;;  %p5797_p6 = scmp.lt.s32.totalorder %s5790_s1, %s6199_s14 }
  0x4c   : > { %p5798_p8 = scmp.lt.s32.totalorder %s5796_s25, %s5791_s2 }
  0x4d   : > { %p5794_p1 = pnand %p5792_p0, %p6336_p7 }
  0x4e   : > { %p5799_p9 = por %p5798_p8, %p5797_p6 }
  0x4f   : > { %p5795_p4 = pneg %p5794_p1 }
  0x51   : > { %p5800_p10 = pnand %p5799_p9, %p5795_p4 }
  0x53   : > { %5803 = shalt.err (!%p5800_p10)
}
  0x54   : > { %s6702_s28 = smov 128   ;;  %s6704_s0 = smov 8  }
  0x55   : > { %5571 = dma.hbm_to_vmem [thread:$0]  (!%p6324_p5), %s6329_s23, 4096, %s793_s26, [#allocation9], %s6702_s28, %s6702_s28, %s6704_s0  }
  0x56   : > { %s6126_s15 = smov [#allocation11]   ;;  %s861_s25 = sshll.u32 %s6244_s12, 4  ;;  %s6364_s25 = int_to_ptr.hbm [resolvable:$true] %s861_s25 }
  0x57   : > { %s826_s1 = sshll.u32 %s6126_s15, 4  ;;  %s5819_s2 = sshra.s32 %s825_s29, 4  ;;  %s827_s1 = int_to_ptr.vmem [resolvable:$true] %s826_s1  ;;  %s5820_s2 = int_to_ptr.hbm [resolvable:$true] %s5819_s2 }
  0x58   : > { %s5821_s22 = scalar_lea.hbm %s5820_s2, 256  ;;  %s5826_s10 = scalar_lea.hbm %s6219_s6, 256 }
  0x59   : > { %p5822_p11 = scmp.ne.s32.totalorder %s5820_s2, %s5821_s22  ;;  %p5827_p0 = scmp.lt.s32.totalorder %s5820_s2, %s6219_s6 }
  0x5a   : > { %p5828_p1 = scmp.lt.s32.totalorder %s5826_s10, %s5821_s22 }
  0x5b   : > { %p5824_p12 = pnand %p5822_p11, %p6336_p7 }
  0x5c   : > { %p5829_p4 = por %p5828_p1, %p5827_p0 }
  0x5d   : > { %p5825_p13 = pneg %p5824_p12 }
  0x5f   : > { %p5830_p6 = pnand %p5829_p4, %p5825_p13 }
  0x61   : > { %5833 = shalt.err (!%p5830_p6)
}
  0x62   : > { %5577 = dma.hbm_to_vmem [thread:$0]  (!%p6324_p5), %s825_s29, 4096, %s827_s1, [#allocation12], %s6702_s28, %s6702_s28, %s6704_s0  }
  0x63   : > { %s739_s23 = sshll.u32 %s6169_s17, 4  ;;  %s6127_s26 = smov [#allocation14]   ;;  %s6376_s23 = int_to_ptr.hbm [resolvable:$true] %s739_s23 }
  0x64   : > { %s863_s15 = sshll.u32 %s6127_s26, 4  ;;  %s5849_s10 = sshra.s32 %s6364_s25, 4  ;;  %s864_s15 = int_to_ptr.vmem [resolvable:$true] %s863_s15  ;;  %s5850_s10 = int_to_ptr.hbm [resolvable:$true] %s5849_s10 }
  0x65   : > { %s5851_s22 = scalar_lea.hbm %s5850_s10, 256  ;;  %s5856_s2 = scalar_lea.hbm %s6244_s12, 256 }
  0x66   : > { %p5852_p8 = scmp.ne.s32.totalorder %s5850_s10, %s5851_s22  ;;  %p5857_p11 = scmp.lt.s32.totalorder %s5850_s10, %s6244_s12 }
  0x67   : > { %p5858_p12 = scmp.lt.s32.totalorder %s5856_s2, %s5851_s22 }
  0x68   : > { %p5854_p9 = pnand %p5852_p8, %p6336_p7 }
  0x69   : > { %p5859_p13 = por %p5858_p12, %p5857_p11 }
  0x6a   : > { %p5855_p10 = pneg %p5854_p9 }
  0x6c   : > { %p5860_p0 = pnand %p5859_p13, %p5855_p10 }
  0x6e   : > { %5863 = shalt.err (!%p5860_p0)
}
  0x6f   : > { %5583 = dma.hbm_to_vmem [thread:$0]  (!%p6324_p5), %s6364_s25, 4096, %s864_s15, [#allocation15], %s6702_s28, %s6702_s28, %s6704_s0  }
  0x70   : > { %s6128_s29 = smov [#allocation3]   ;;  %s5879_s26 = sshra.s32 %s6376_s23, 4  ;;  %s5880_s26 = int_to_ptr.hbm [resolvable:$true] %s5879_s26 }
  0x71   : > { %s741_s1 = sshll.u32 %s6128_s29, 4  ;;  %s5881_s10 = scalar_lea.hbm %s5880_s26, 192  ;;  %s742_s1 = int_to_ptr.vmem [resolvable:$true] %s741_s1 }
  0x72   : > { %p5882_p1 = scmp.ne.s32.totalorder %s5880_s26, %s5881_s10  ;;  %s5886_s22 = scalar_lea.hbm %s6169_s17, 192 }
  0x73   : > { %p5887_p8 = scmp.lt.s32.totalorder %s5880_s26, %s6169_s17  ;;  %p5888_p9 = scmp.lt.s32.totalorder %s5886_s22, %s5881_s10 }
  0x74   : > { %p5884_p4 = pnand %p5882_p1, %p6336_p7 }
  0x75   : > { %p5889_p10 = por %p5888_p9, %p5887_p8 }
  0x76   : > { %p5885_p6 = pneg %p5884_p4 }
  0x78   : > { %p5890_p11 = pnand %p5889_p10, %p5885_p6 }
  0x7a   : > { %5893 = shalt.err (!%p5890_p11)
}
  0x7b   : > { %s6129_s2 = smov 192   ;;  %s6130_s25 = smov 12  }
  0x7c   : > { %5562 = dma.hbm_to_vmem [thread:$0]  (!%p6324_p5), %s6376_s23, 3072, %s742_s1, [#allocation4], %s6129_s2, %s6129_s2, %s6130_s25  }
  0x7d   : > { %s773_s15 = sshll.u32 %s6189_s3, 4  ;;  %s6131_s29 = smov [#allocation7]   ;;  %s774_s15 = int_to_ptr.hbm [resolvable:$true] %s773_s15 }
  0x7e   : > { %s775_s28 = sshll.u32 %s6131_s29, 4  ;;  %s807_s26 = sshll.u32 %s6209_s24, 4  ;;  %s776_s28 = int_to_ptr.vmem [resolvable:$true] %s775_s28  ;;  %s808_s26 = int_to_ptr.hbm [resolvable:$true] %s807_s26 }
  0x7f   : > { %s5909_s10 = sshra.s32 %s774_s15, 4  ;;  %s5916_s0 = scalar_lea.hbm %s6189_s3, 128  ;;  %s5910_s10 = int_to_ptr.hbm [resolvable:$true] %s5909_s10 }
  0x80   : > { %s5911_s22 = scalar_lea.hbm %s5910_s10, 128  ;;  %p5917_p1 = scmp.lt.s32.totalorder %s5910_s10, %s6189_s3 }
  0x81   : > { %p5912_p12 = scmp.ne.s32.totalorder %s5910_s10, %s5911_s22  ;;  %p5918_p4 = scmp.lt.s32.totalorder %s5916_s0, %s5911_s22 }
  0x83   : > { %p5914_p13 = pnand %p5912_p12, %p6336_p7  ;;  %p5919_p6 = por %p5918_p4, %p5917_p1 }
  0x85   : > { %p5915_p0 = pneg %p5914_p13 }
  0x87   : > { %p5920_p8 = pnand %p5919_p6, %p5915_p0 }
  0x89   : > { %5923 = shalt.err (!%p5920_p8)
}
  0x8a   : > { %s6725_s23 = smov 8   ;;  %s6726_s1 = smov 128  }
  0x8b   : > { %5568 = dma.hbm_to_vmem [thread:$0]  (!%p6324_p5), %s774_s15, 2048, %s776_s28, [#allocation6], %s6726_s1, %s6726_s1, %s6725_s23  }
  0x8c   : > { %s6132_s2 = smov [#allocation10]   ;;  %s844_s29 = sshll.u32 %s6234_s27, 4  ;;  %s6409_s29 = int_to_ptr.hbm [resolvable:$true] %s844_s29 }
  0x8d   : > { %s809_s25 = sshll.u32 %s6132_s2, 4  ;;  %s5939_s0 = sshra.s32 %s808_s26, 4  ;;  %s810_s25 = int_to_ptr.vmem [resolvable:$true] %s809_s25  ;;  %s5940_s0 = int_to_ptr.hbm [resolvable:$true] %s5939_s0 }
  0x8e   : > { %s5941_s10 = scalar_lea.hbm %s5940_s0, 256  ;;  %s5946_s22 = scalar_lea.hbm %s6209_s24, 256 }
  0x8f   : > { %p5942_p9 = scmp.ne.s32.totalorder %s5940_s0, %s5941_s10  ;;  %p5947_p12 = scmp.lt.s32.totalorder %s5940_s0, %s6209_s24 }
  0x90   : > { %p5948_p13 = scmp.lt.s32.totalorder %s5946_s22, %s5941_s10 }
  0x91   : > { %p5944_p10 = pnand %p5942_p9, %p6336_p7 }
  0x92   : > { %p5949_p0 = por %p5948_p13, %p5947_p12 }
  0x93   : > { %p5945_p11 = pneg %p5944_p10 }
  0x95   : > { %p5950_p1 = pnand %p5949_p0, %p5945_p11 }
  0x97   : > { %5953 = shalt.err (!%p5950_p1)
}
  0x98   : > { %5574 = dma.hbm_to_vmem [thread:$0]  (!%p6324_p5), %s808_s26, 4096, %s810_s25, [#allocation9], %s6726_s1, %s6726_s1, %s6725_s23  }
  0x99   : > { %s884_s28 = sshll.u32 %s6262_s8, 4  ;;  %s6133_s15 = smov [#allocation13]   ;;  %s6421_s28 = int_to_ptr.hbm [resolvable:$true] %s884_s28 }
  0x9a   : > { %s846_s2 = sshll.u32 %s6133_s15, 4  ;;  %s5969_s0 = sshra.s32 %s6409_s29, 4  ;;  %s847_s2 = int_to_ptr.vmem [resolvable:$true] %s846_s2  ;;  %s5970_s0 = int_to_ptr.hbm [resolvable:$true] %s5969_s0 }
  0x9b   : > { %s5971_s10 = scalar_lea.hbm %s5970_s0, 256  ;;  %s5976_s22 = scalar_lea.hbm %s6234_s27, 256 }
  0x9c   : > { %p5972_p4 = scmp.ne.s32.totalorder %s5970_s0, %s5971_s10  ;;  %p5977_p9 = scmp.lt.s32.totalorder %s5970_s0, %s6234_s27 }
  0x9d   : > { %p5978_p10 = scmp.lt.s32.totalorder %s5976_s22, %s5971_s10 }
  0x9e   : > { %p5974_p6 = pnand %p5972_p4, %p6336_p7 }
  0x9f   : > { %p5979_p11 = por %p5978_p10, %p5977_p9 }
  0xa0   : > { %p5975_p8 = pneg %p5974_p6 }
  0xa2   : > { %p5980_p12 = pnand %p5979_p11, %p5975_p8 }
  0xa4   : > { %5983 = shalt.err (!%p5980_p12)
}
  0xa5   : > { %5580 = dma.hbm_to_vmem [thread:$0]  (!%p6324_p5), %s6409_s29, 4096, %s847_s2, [#allocation12], %s6726_s1, %s6726_s1, %s6725_s23  }
  0xa6   : > { %s6134_s26 = smov [#allocation16]   ;;  %s901_s15 = sshll.u32 %s6272_s19, 4  ;;  %s902_s15 = int_to_ptr.hbm [resolvable:$true] %s901_s15 }
  0xa7   : > { %s886_s25 = sshll.u32 %s6134_s26, 4  ;;  %s5999_s0 = sshra.s32 %s6421_s28, 4  ;;  %s887_s25 = int_to_ptr.vmem [resolvable:$true] %s886_s25  ;;  %s6000_s0 = int_to_ptr.hbm [resolvable:$true] %s5999_s0 }
  0xa8   : > { %s6001_s10 = scalar_lea.hbm %s6000_s0, 256  ;;  %s6006_s22 = scalar_lea.hbm %s6262_s8, 256 }
  0xa9   : > { %p6002_p13 = scmp.ne.s32.totalorder %s6000_s0, %s6001_s10  ;;  %p6007_p4 = scmp.lt.s32.totalorder %s6000_s0, %s6262_s8 }
  0xaa   : > { %p6008_p6 = scmp.lt.s32.totalorder %s6006_s22, %s6001_s10 }
  0xab   : > { %p6004_p0 = pnand %p6002_p13, %p6336_p7 }
  0xac   : > { %p6009_p8 = por %p6008_p6, %p6007_p4 }
  0xad   : > { %p6005_p1 = pneg %p6004_p0 }
  0xaf   : > { %p6010_p9 = pnand %p6009_p8, %p6005_p1 }
  0xb1   : > { %6013 = shalt.err (!%p6010_p9)
}
  0xb2   : > { %5586 = dma.hbm_to_vmem [thread:$0]  (!%p6324_p5), %s6421_s28, 4096, %s887_s25, [#allocation15], %s6726_s1, %s6726_s1, %s6725_s23  }
  0xb3   : > { %s6135_s29 = smov [#allocation17]   ;;  %s6029_s26 = sshra.s32 %s902_s15, 4  ;;  %s6030_s26 = int_to_ptr.hbm [resolvable:$true] %s6029_s26 }
  0xb4   : > { %s903_s2 = sshll.u32 %s6135_s29, 4  ;;  %s6031_s0 = scalar_lea.hbm %s6030_s26, 128  ;;  %s904_s2 = int_to_ptr.vmem [resolvable:$true] %s903_s2 }
  0xb5   : > { %p6032_p10 = scmp.ne.s32.totalorder %s6030_s26, %s6031_s0  ;;  %s6036_s10 = scalar_lea.hbm %s6272_s19, 128 }
  0xb6   : > { %p6037_p13 = scmp.lt.s32.totalorder %s6030_s26, %s6272_s19  ;;  %p6038_p0 = scmp.lt.s32.totalorder %s6036_s10, %s6031_s0 }
  0xb7   : > { %p6034_p11 = pnand %p6032_p10, %p6336_p7 }
  0xb8   : > { %p6039_p1 = por %p6038_p0, %p6037_p13 }
  0xb9   : > { %p6035_p12 = pneg %p6034_p11 }
  0xbb   : > { %p6040_p4 = pnand %p6039_p1, %p6035_p12 }
  0xbd   : > { %6043 = shalt.err (!%p6040_p4)
}
  0xbe   : > { %s6727_s23 = smov 4   ;;  %s6728_s1 = smov 64  }
  0xbf   : > { %5589 = dma.hbm_to_vmem [thread:$0]  (!%p6324_p5), %s902_s15, 2048, %s904_s2, [#allocation18], %s6728_s1, %s6728_s1, %s6727_s23  }
  0xc0   : > { %940 = sbr.rel (%p6316_p3) target bundleno = 2743 (0xab7), region = 136 }
  0xc5   : > { %6064 = dma.done.wait (%p6312_p2), [#allocation4], 3072  }
  0xc6   : > { %6066 = vsyncadd (%p6312_p2), [#allocation4], 4294964224 }
  0xc7   : > { %6068 = dma.done.wait (%p6312_p2), [#allocation6], 3072  }
  0xc8   : > { %6070 = vsyncadd (%p6312_p2), [#allocation6], 4294964224 }
  0xc9   : > { %6072 = dma.done.wait (%p6312_p2), [#allocation9], 8192  }
  0xca   : > { %6074 = vsyncadd (%p6312_p2), [#allocation9], 4294959104 }
  0xcb   : > { %6076 = dma.done.wait (%p6312_p2), [#allocation12], 8192  }
  0xcc   : > { %6078 = vsyncadd (%p6312_p2), [#allocation12], 4294959104 }
  0xcd   : > { %6080 = dma.done.wait (%p6312_p2), [#allocation15], 8192  }
  0xce   : > { %6082 = vsyncadd (%p6312_p2), [#allocation15], 4294959104 }
  0xcf   : > { %6084 = dma.done.wait (%p6312_p2), [#allocation18], 2048  }
  0xd0   : > { %6086 = vsyncadd (%p6312_p2), [#allocation18], 4294965248  ;;  %s6729_s11 = sadd.s32 4294967295, %s6089_s4   ;;  %v6136_v1 = vmov 1   ;;  %v6137_v2 = vmov 0   ;;  %v6138_v3 = vmov 2  }
  0xd1   : > { %s4215_s18 = sshll.u32 %s6729_s11, 1  ;;  %5674 = vset.pattern.permute.xlu1 %v6136_v1  ;;  %5673 = vset.pattern.permute.xlu0 %v6137_v2  ;;  %v4305_v5 = vld [vmem:[#allocation3 + $0xa8] sm:$0xf]  ;;  %v5285_v6 = vld [vmem:[#allocation3 + $0xb0] sm:$0xf0]  ;;  %s6730_s7 = sld [smem:[#allocation25_spill]] }
  0xd2   : > { %p1063_p3 = scmp.lt.s32.totalorder %s4215_s18, 3  ;;  %5675 = vset.pattern.permute.xlu2 %v6138_v3  ;;  %v5284_v7 = vld [vmem:[#allocation3 + $0xac] sm:$0xf]  ;;  %v4307_v8 = vld [vmem:[#allocation3 + $0xb4] sm:$0xf0]  ;;  %v4306_v9 = vor.u32 %v5285_v6, %v4305_v5  ;;  %vm1420_vm0 = vcmask 261120  }
  0xd3   : > { %v4310_v10 = vor.u32 %v5284_v7, %v4307_v8  ;;  %v4313_v11 = vld [vmem:[#allocation3 + $0xb0] sm:$0xf]  ;;  %v5286_v12 = vld [vmem:[#allocation3 + $0xb8] sm:$0xf0]  ;;  %v5281_v16 = vld [vmem:[#allocation3 + $0x94] sm:$0xf] }
  0xd4   : > { %s6744_s18 = smov (!%p1063_p3, %s4215_s18), 3  ;;  %v4293_v13 = vld [vmem:[#allocation3 + $0x90] sm:$0xf]  ;;  %v4314_v14 = vor.u32 %v5286_v12, %v4313_v11  ;;  %v5282_v15 = vld [vmem:[#allocation3 + $0x98] sm:$0xf0]  ;;  %1294 = vmatpush.bf16.msra.mxu0 %v4306_v9  ;;  %s6139_s25 = smov 96  }
  0xd5   : > { %s4216_s16 = sshll.u32 %s6744_s18, 3  ;;  %v4295_v17 = vld [vmem:[#allocation3 + $0x9c] sm:$0xf0]  ;;  %1308 = vmatpush.bf16.msra.mxu1 %v4310_v10  ;;  %v4294_v18 = vor.u32 %v5282_v15, %v4293_v13  ;;  %v4301_v20 = vld [vmem:[#allocation3 + $0x98] sm:$0xf]  ;;  %s6140_s15 = smov 64  }
  0xd6   : > { %s6489_s28 = scalar_lea.vmem %s6154_s5, %s4216_s16  ;;  %v4298_v19 = vor.u32 %v5281_v16, %v4295_v17  ;;  %v5283_v21 = vld [vmem:[#allocation3 + $0xa0] sm:$0xf0]  ;;  %1322 = vmatpush.bf16.msra.mxu2 %v4314_v14  ;;  %v4281_v24 = vld [vmem:[#allocation3 + $0x78] sm:$0xf]  ;;  %v5278_v26 = vld [vmem:[#allocation3 + $0x7c] sm:$0xf] }
  0xd7   : > { %v1075_v4 = vld [vmem:[%s6489_s28] sm:$0xff]  ;;  %v1076_v22 = vld [vmem:[%s6489_s28 + $0x8] sm:$0xff]  ;;  %v4302_v23 = vor.u32 %v5283_v21, %v4301_v20  ;;  %v4271_v37 = vld [vmem:[#allocation3 + $0x6c] sm:$0xf0]  ;;  %vm1673_vm1 = vcmask 1043456   ;;  %s6141_s22 = smov 32  }
  0xd8   : > { %1092 = vperm.xlu1 %5674, %v1075_v4   ;;  %1080 = vperm.xlu0 %5673, %v1075_v4   ;;  %v5279_v25 = vld [vmem:[#allocation3 + $0x80] sm:$0xf0]  ;;  %v4283_v28 = vld [vmem:[#allocation3 + $0x84] sm:$0xf0]  ;;  %v4289_v29 = vld [vmem:[#allocation3 + $0x80] sm:$0xf] }
  0xd9   : > { %1105 = vperm.xlu2 %5675, %v1075_v4   ;;  %1295 = vmatpush.bf16.msra.mxu0 %v4294_v18  ;;  %v4282_v27 = vor.u32 %v5279_v25, %v4281_v24  ;;  %v5280_v30 = vld [vmem:[#allocation3 + $0x88] sm:$0xf0]  ;;  %v4286_v31 = vor.u32 %v5278_v26, %v4283_v28  ;;  %v4269_v33 = vld [vmem:[#allocation3 + $0x60] sm:$0xf]  ;;  %v5275_v35 = vld [vmem:[#allocation3 + $0x64] sm:$0xf] }
  0xda   : > { %1309 = vmatpush.bf16.msra.mxu1 %v4298_v19  ;;  %1323 = vmatpush.bf16.msra.mxu2 %v4302_v23  ;;  %v4290_v32 = vor.u32 %v5280_v30, %v4289_v29  ;;  %v5276_v34 = vld [vmem:[#allocation3 + $0x68] sm:$0xf0]  ;;  %v4277_v38 = vld [vmem:[#allocation3 + $0x68] sm:$0xf]  ;;  %v5277_v39 = vld [vmem:[#allocation3 + $0x70] sm:$0xf0]  ;;  %v4274_v40 = vor.u32 %v5275_v35, %v4271_v37 }
  0xdb   : > { %v4270_v36 = vor.u32 %v5276_v34, %v4269_v33  ;;  %v4278_v41 = vor.u32 %v5277_v39, %v4277_v38  ;;  %v4257_v42 = vld [vmem:[#allocation3 + $0x48] sm:$0xf]  ;;  %v5273_v43 = vld [vmem:[#allocation3 + $0x50] sm:$0xf0]  ;;  %v5272_v44 = vld [vmem:[#allocation3 + $0x4c] sm:$0xf] }
  0xdc   : > { %v4258_v45 = vor.u32 %v5273_v43, %v4257_v42  ;;  %v4259_v46 = vld [vmem:[#allocation3 + $0x54] sm:$0xf0]  ;;  %v4265_v47 = vld [vmem:[#allocation3 + $0x50] sm:$0xf]  ;;  %v5274_v48 = vld [vmem:[#allocation3 + $0x58] sm:$0xf0] }
  0xdd   : > { %1296 = vmatpush.bf16.msra.mxu0 %v4282_v27  ;;  %v4262_v49 = vor.u32 %v5272_v44, %v4259_v46  ;;  %v4266_v50 = vor.u32 %v5274_v48, %v4265_v47  ;;  %v4245_v51 = vld [vmem:[#allocation3 + $0x30] sm:$0xf]  ;;  %v5270_v52 = vld [vmem:[#allocation3 + $0x38] sm:$0xf0]  ;;  %v5269_v53 = vld [vmem:[#allocation3 + $0x34] sm:$0xf] }
  0xde   : > { %1310 = vmatpush.bf16.msra.mxu1 %v4286_v31  ;;  %1324 = vmatpush.bf16.msra.mxu2 %v4290_v32  ;;  %v4246_v54 = vor.u32 %v5270_v52, %v4245_v51  ;;  %v4247_v55 = vld [vmem:[#allocation3 + $0x3c] sm:$0xf0]  ;;  %v4253_v56 = vld [vmem:[#allocation3 + $0x38] sm:$0xf]  ;;  %v5271_v57 = vld [vmem:[#allocation3 + $0x40] sm:$0xf0] }
  0xdf   : > { %v4250_v58 = vor.u32 %v5269_v53, %v4247_v55  ;;  %v4254_v59 = vor.u32 %v5271_v57, %v4253_v56  ;;  %v4233_v60 = vld [vmem:[#allocation3 + $0x18] sm:$0xf]  ;;  %v5267_v61 = vld [vmem:[#allocation3 + $0x20] sm:$0xf0]  ;;  %v5266_v62 = vld [vmem:[#allocation3 + $0x1c] sm:$0xf] }
  0xe0   : > { %1096 = vperm.xlu1 %5674, %v1076_v22   ;;  %1085 = vperm.xlu0 %5673, %v1076_v22   ;;  %v4234_v63 = vor.u32 %v5267_v61, %v4233_v60  ;;  %v4235_v0 = vld [vmem:[#allocation3 + $0x24] sm:$0xf0]  ;;  %v4241_v1 = vld [vmem:[#allocation3 + $0x20] sm:$0xf]  ;;  %v5268_v2 = vld [vmem:[#allocation3 + $0x28] sm:$0xf0] }
  0xe1   : > { %1109 = vperm.xlu2 %5675, %v1076_v22   ;;  %1297 = vmatpush.bf16.msra.mxu0 %v4270_v36  ;;  %v4238_v3 = vor.u32 %v5266_v62, %v4235_v0  ;;  %v4242_v4 = vor.u32 %v5268_v2, %v4241_v1  ;;  %v4221_v5 = vld [vmem:[#allocation3] sm:$0xf]  ;;  %v5264_v6 = vld [vmem:[#allocation3 + $0x8] sm:$0xf0]  ;;  %v5263_v7 = vld [vmem:[#allocation3 + $0x4] sm:$0xf] }
  0xe2   : > { %1311 = vmatpush.bf16.msra.mxu1 %v4274_v40  ;;  %1325 = vmatpush.bf16.msra.mxu2 %v4278_v41  ;;  %v4222_v8 = vor.u32 %v5264_v6, %v4221_v5  ;;  %v4223_v9 = vld [vmem:[#allocation3 + $0xc] sm:$0xf0]  ;;  %v4229_v10 = vld [vmem:[#allocation3 + $0x8] sm:$0xf]  ;;  %v5265_v11 = vld [vmem:[#allocation3 + $0x10] sm:$0xf0] }
  0xe3   : > { %v4226_v12 = vor.u32 %v5263_v7, %v4223_v9  ;;  %v4230_v13 = vor.u32 %v5265_v11, %v4229_v10  ;;  %v2857_v14 = vld [vmem:[%s6229_s20] sm:$0x77]  ;;  %vm1573_vm2 = vcmask 64512   ;;  %vm1849_vm3 = vcmask 523264   ;;  %s6731_s29 = sld [smem:[#allocation27_spill]] }
  0xe4   : > { %v2869_v15 = vperm.slane %v2857_v14, 1  ;;  %v2870_v16 = vperm.slane %v2857_v14, 5  ;;  %v1077_v17 = vld [vmem:[%s6159_s9] sm:$0x7]  ;;  %v2883_v18 = vperm.slane %v2857_v14, 2  ;;  %v2884_v19 = vperm.slane %v2857_v14, 6 }
  0xe5   : > { %1298 = vmatpush.bf16.msra.mxu0 %v4258_v45  ;;  %v2859_v20 = vperm.slane %v2857_v14, 0  ;;  %v2860_v21 = vperm.slane %v2857_v14, 4  ;;  %v1099_v23 = vperm.slane %v1077_v17, 1  ;;  %v1088_v26 = vperm.slane %v1077_v17, 0  ;;  %s6732_s2 = sld [smem:[#allocation28_spill]] }
  0xe6   : > { %1312 = vmatpush.bf16.msra.mxu1 %v4262_v49  ;;  %1326 = vmatpush.bf16.msra.mxu2 %v4266_v50  ;;  %v6495_v24 = vperm.slane %v2869_v15, 1  ;;  %v6497_v25 = vperm.slane %v2870_v16, 1  ;;  %v6499_v27 = vperm.slane %v2883_v18, 2  ;;  %v6501_v28 = vperm.slane %v2884_v19, 2  ;;  %s6733_s26 = sld [smem:[#allocation29_spill]] }
  0xe7   : > { %v6503_v29 = vperm.slane %v2859_v20, 0  ;;  %v6505_v30 = vperm.slane %v2860_v21, 0  ;;  %v1112_v31 = vperm.slane %v1077_v17, 2  ;;  %vm1852_vm4 = vcmask 785408   ;;  %s6734_s0 = sld [smem:[#allocation30_spill]] }
  0xe8   : > { %s6735_s10 = sld [smem:[#allocation31_spill]]  ;;  %vm3943_vm5 = vcmask 7168   ;;  %vm3946_vm6 = vcmask 15360   ;;  %vm4001_vm11 = vcmask 23552   ;;  %vm4004_vm12 = vcmask 31744  }
  0xe9   : > { %1299 = vmatpush.bf16.msra.mxu0 %v4246_v54  ;;  %v5712_v54 = vld [vmem:[%s6164_s13] ss:$0 sm:$0xff]  ;;  %s6736_s23 = sld [smem:[#allocation32_spill]] }
  0xea   : > { %1313 = vmatpush.bf16.msra.mxu1 %v4250_v58  ;;  %1327 = vmatpush.bf16.msra.mxu2 %v4254_v59  ;;  %s6737_s1 = sld [smem:[#allocation33_spill]] }
  0xeb   : > { %s6738_s11 = sld [smem:[#allocation34_spill]] }
  0xed   : > { %1300 = vmatpush.bf16.msra.mxu0 %v4234_v63  ;;  %v1158_v63 = vld [vmem:[%s6730_s7] sm:$0x7]  ;;  %s6740_s7 = sld [smem:[#allocation36_spill]] }
  0xee   : > { %1314 = vmatpush.bf16.msra.mxu1 %v4238_v3  ;;  %1328 = vmatpush.bf16.msra.mxu2 %v4242_v4  ;;  %v1160_v0 = vperm.slane %v1158_v63, 0  ;;  %v1161_v1 = vperm.slane %v1158_v63, 1  ;;  %v1162_v7 = vperm.slane %v1158_v63, 2 }
  0xf1   : > { %1301 = vmatpush.bf16.msra.mxu0 %v4222_v8 }
  0xf2   : > { %1315 = vmatpush.bf16.msra.mxu1 %v4226_v12  ;;  %1329 = vmatpush.bf16.msra.mxu2 %v4230_v13 }
 0x133   : > { %v1106_v22 = vpop.permute.xlu2 %1105 }
 0x134   : > { %v2889_v38 = vmul.f32 %v6499_v27, %v1106_v22  ;;  %v2890_v39 = vmul.f32 %v6501_v28, %v1106_v22  ;;  %v1113_v44 = vmul.f32 %v1112_v31, %v1106_v22 }
 0x13b   : > { %v6517_v48 = vpop.permute.xlu2 %1109 }
 0x13c   : > { %v1114_v55 = vmul.f32 %v1112_v31, %v6517_v48 }
 0x14a   : > { %v1093_v32 = vpop.permute.xlu1 %1092  ;;  %v1081_v33 = vpop.permute.xlu0 %1080 }
 0x14b   : > { %v1100_v34 = vmul.f32 %v1099_v23, %v1093_v32  ;;  %v2875_v35 = vmul.f32 %v6495_v24, %v1093_v32  ;;  %v2876_v36 = vmul.f32 %v6497_v25, %v1093_v32  ;;  %v1089_v37 = vmul.f32 %v1088_v26, %v1081_v33 }
 0x14c   : > { %v2865_v40 = vmul.f32 %v6503_v29, %v1081_v33  ;;  %v2866_v41 = vmul.f32 %v6505_v30, %v1081_v33 }
 0x14d   : > { %v1102_v45 = vadd.f32 %v1100_v34, %v1089_v37 }
 0x14e   : > { %v2879_v42 = vadd.f32 %v2875_v35, %v2865_v40  ;;  %v2880_v43 = vadd.f32 %v2876_v36, %v2866_v41 }
 0x14f   : > { %v1115_v51 = vadd.f32 %v1113_v44, %v1102_v45 }
 0x150   : > { %v6513_v46 = vadd.f32 %v2889_v38, %v2879_v42  ;;  %v6515_v47 = vadd.f32 %v2890_v39, %v2880_v43 }
 0x151   : > { %v6527_v58 = vadd.f32 %v5712_v54, %v1115_v51 }
 0x152   : > { %v6519_v49 = vpop.permute.xlu1 %1096  ;;  %v6521_v50 = vpop.permute.xlu0 %1085 }
 0x153   : > { %v1101_v52 = vmul.f32 %v1099_v23, %v6519_v49  ;;  %v1090_v53 = vmul.f32 %v1088_v26, %v6521_v50  ;;  %v1123_v60 = vmax.f32 %v6527_v58, 0.0 }
 0x155   : > { %v1103_v56 = vadd.f32 %v1101_v52, %v1090_v53 }
 0x157   : > { %v1116_v57 = vadd.f32 %v1114_v55, %v1103_v56 }
 0x159   : > { %v6529_v59 = vadd.f32 %v5712_v54, %v1116_v57 }
 0x15b   : > { %v1124_v61 = vmax.f32 %v6529_v59, 0.0  ;;  %v4445_v59 = vld [vmem:[#allocation8 + $0x20] sm:$0xf] }
 0x15d   : > { %v1125_v62 = vpack.c.bf16 %v1124_v61, %v1123_v60 }
 0x15f   : > { %1302 = vmatmul.bf16.vlgmr.msra.gmra.mxu0 %v1125_v62  ;;  %1316 = vmatmul.bf16.vlgmr.msra.gmra.mxu1 %v1125_v62 }
 0x160   : > { %1330 = vmatmul.bf16.vlgmr.msra.gmra.mxu2 %v1125_v62 }
 0x1dc   : > { %v1303_v2 = vpop.f32.mrf.mxu0  ;;  %v1317_v3 = vpop.f32.mrf.mxu1 }
 0x1dd   : > { %v1304_v4 = vadd.f32 %v1303_v2, %v1160_v0  ;;  %v1318_v5 = vadd.f32 %v1317_v3, %v1161_v1 }
 0x1df   : > { %1366 = vrot.lane.b32.xlu1 %v1318_v5, %s6139_s25  ;;  %1372 = vrot.lane.b32.xlu0 %v1318_v5, %s6140_s15  ;;  %v1384_v6 = vpack.c.bf16 %v1318_v5, %v1318_v5  ;;  %v1356_v17 = vpack.c.bf16 %v1304_v4, %v1304_v4 }
 0x1e0   : > { %1344 = vrot.lane.b32.xlu2 %v1304_v4, %s6140_s15 }
 0x1e1   : > { %v1425_v8 = vsel %vm1420_vm0, %v1384_v6, 0 }
 0x1e2   : > { %1434 = vmatpush.bf16.xpose.msra.mxu3 %v1425_v8 }
 0x1e3   : > { %v1331_v9 = vpop.f32.mrf.mxu2 }
 0x1e4   : > { %v6542_v10 = vadd.f32 %v1331_v9, %v1162_v7  ;;  %v1319_v11 = vpop.f32.mrf.mxu1  ;;  %v1305_v19 = vpop.f32.mrf.mxu0 }
 0x1e5   : > { %v1320_v12 = vadd.f32 %v1319_v11, %v1161_v1  ;;  %v1306_v20 = vadd.f32 %v1305_v19, %v1160_v0 }
 0x1e6   : > { %v1412_v13 = vpack.c.bf16 %v6542_v10, %v6542_v10 }
 0x1e7   : > { %1374 = vrot.lane.b32.xlu1 %v1320_v12, %s6140_s15  ;;  %v5676_v14 = vpack.i.bf16 %v1320_v12, %v1304_v4  ;;  %v1385_v15 = vpack.c.bf16 %v1320_v12, %v1320_v12  ;;  %v1357_v21 = vpack.c.bf16 %v1306_v20, %v1306_v20 }
 0x1e8   : > { %1378 = vrot.lane.b32.xlu2 %v1318_v5, %s6141_s22  ;;  %v1675_v16 = vsel %vm1673_vm1, %v1412_v13, 0 }
 0x1e9   : > { %1684 = vmatpush.bf16.msrb.mxu1 %v1675_v16  ;;  %5677 = vrot.lane.b32.xlu0 %v5676_v14, %s6139_s25  ;;  %v1444_v18 = vsel %vm1420_vm0, %v1385_v15, 0 }
 0x1ea   : > { %4315 = vmatmul.msk.bf16.vlgmr.msra.gmra.mxu3 %vm1420_vm0, %v1356_v17 }
 0x1eb   : > { %1453 = vmatpush.bf16.xpose.msrb.mxu3 %v1444_v18  ;;  %v1333_v33 = vpop.f32.mrf.mxu2 }
 0x1ec   : > { %v6560_v38 = vadd.f32 %v1333_v33, %v1162_v7 }
 0x1ee   : > { %v1413_v41 = vpack.c.bf16 %v6560_v38, %v6560_v38 }
 0x1ef   : > { %1346 = vrot.lane.b32.xlu1 %v1306_v20, %s6140_s15 }
 0x1f0   : > { %1350 = vrot.lane.b32.xlu2 %v1304_v4, %s6141_s22  ;;  %v1694_v53 = vsel %vm1673_vm1, %v1413_v41, 0 }
 0x1f1   : > { %1340 = vrot.lane.b32.xlu0 %v1306_v20, %s6139_s25 }
 0x1f7   : > { %1352 = vrot.lane.b32.xlu1 %v1306_v20, %s6141_s22 }
 0x1f9   : > { %1380 = vrot.lane.b32.xlu0 %v1320_v12, %s6141_s22 }
 0x1fa   : > { %4316 = vmatmul.msk.bf16.vlgmr.msrb.gmra.mxu3 %vm1420_vm0, %v1357_v21 }
 0x23a   : > { %v1345_v22 = vpop.permute.xlu2 %1344 }
 0x23b   : > { %v1360_v42 = vpack.c.bf16 %v1345_v22, %v1345_v22 }
 0x242   : > { %v1379_v23 = vpop.permute.xlu2 %1378 }
 0x243   : > { %v1390_v26 = vpack.c.bf16 %v1379_v23, %v1379_v23 }
 0x245   : > { %v1539_v39 = vsel %vm1420_vm0, %v1390_v26, 0 }
 0x24a   : > { %v1351_v1 = vpop.permute.xlu2 %1350 }
 0x24b   : > { %v1362_v5 = vpack.c.bf16 %v1351_v1, %v1351_v1 }
 0x251   : > { %v1367_v31 = vpop.permute.xlu1 %1366  ;;  %v1373_v32 = vpop.permute.xlu0 %1372 }
 0x252   : > { %v1386_v34 = vpack.c.bf16 %v1367_v31, %v1367_v31  ;;  %v1388_v35 = vpack.c.bf16 %v1373_v32, %v1373_v32 }
 0x254   : > { %v1463_v36 = vsel %vm1420_vm0, %v1386_v34, 0  ;;  %v1501_v37 = vsel %vm1420_vm0, %v1388_v35, 0 }
 0x255   : > { %1472 = vmatpush.bf16.xpose.msra.mxu3 %v1463_v36  ;;  %1510 = vmatpush.bf16.xpose.msrb.mxu2 %v1501_v37 }
 0x259   : > { %v1375_v40 = vpop.permute.xlu1 %1374 }
 0x25a   : > { %v1389_v43 = vpack.c.bf16 %v1375_v40, %v1375_v40 }
 0x25b   : > { %v5678_v44 = vpop.permute.xlu0 %5677 }
 0x25c   : > { %v1520_v45 = vsel %vm1420_vm0, %v1389_v43, 0  ;;  %v5680_v51 = vunpack.i.h.bf16 %v5678_v44  ;;  %v5679_v52 = vunpack.i.l.bf16 %v5678_v44  ;;  %4319 = vmatmul.msk.bf16.vlgmr.msrb.gmra.mxu2 %vm1420_vm0, %v1360_v42 }
 0x25d   : > { %1548 = vmatpush.bf16.xpose.msrb.mxu3 %v1539_v39  ;;  %1529 = vmatpush.bf16.xpose.msra.mxu2 %v1520_v45  ;;  %v5681_v45 = vpack.i.bf16 %v6560_v38, %v6542_v10 }
 0x25e   : > { %v1387_v54 = vpack.c.bf16 %v5680_v51, %v5680_v51  ;;  %v1358_v55 = vpack.c.bf16 %v5679_v52, %v5679_v52 }
 0x260   : > { %4317 = vmatmul.msk.bf16.vlgmr.msra.gmra.mxu3 %vm1420_vm0, %v1358_v55  ;;  %v1482_v56 = vsel %vm1420_vm0, %v1387_v54, 0 }
 0x261   : > { %1491 = vmatpush.bf16.xpose.msrb.mxu0 %v1482_v56  ;;  %v1347_v63 = vpop.permute.xlu1 %1346 }
 0x262   : > { %v1361_v0 = vpack.c.bf16 %v1347_v63, %v1347_v63 }
 0x263   : > { %v1341_v57 = vpop.permute.xlu0 %1340 }
 0x264   : > { %v1359_v62 = vpack.c.bf16 %v1341_v57, %v1341_v57 }
 0x265   : > { %1703 = vmatpush.bf16.msrb.mxu2 %v1694_v53 }
 0x268   : > { %4318 = vmatmul.msk.bf16.vlgmr.msrb.gmra.mxu0 %vm1420_vm0, %v1359_v62 }
 0x269   : > { %v1353_v8 = vpop.permute.xlu1 %1352 }
 0x26a   : > { %v1363_v11 = vpack.c.bf16 %v1353_v8, %v1353_v8 }
 0x26b   : > { %v1381_v2 = vpop.permute.xlu0 %1380 }
 0x26c   : > { %v1391_v3 = vpack.c.bf16 %v1381_v2, %v1381_v2  ;;  %4320 = vmatmul.msk.bf16.vlgmr.msra.gmra.mxu2 %vm1420_vm0, %v1361_v0 }
 0x26d   : > { %v1436_v4 = vpop.f32.mrf.mxu3 }
 0x26e   : > { %v1558_v6 = vsel %vm1420_vm0, %v1391_v3, 0  ;;  %v1574_v7 = vsel %vm1573_vm2, %v1436_v4, -inf }
 0x26f   : > { %1575 = vmax.xlane.f32.xlu1 %v1574_v7  ;;  %1567 = vmatpush.bf16.xpose.msra.mxu0 %v1558_v6 }
 0x270   : > { %4321 = vmatmul.msk.bf16.vlgmr.msrb.gmra.mxu3 %vm1420_vm0, %v1362_v5 }
 0x275   : > { %v1438_v9 = vpop.f32.mrf.mxu3 }
 0x278   : > { %4322 = vmatmul.msk.bf16.vlgmr.msra.gmra.mxu0 %vm1420_vm0, %v1363_v11 }
 0x27d   : > { %v1455_v12 = vpop.f32.mrf.mxu3 }
 0x27e   : > { %v1577_v13 = vsel %vm1573_vm2, %v1455_v12, -inf }
 0x27f   : > { %1578 = vmax.xlane.f32.xlu2 %v1577_v13 }
 0x285   : > { %v1457_v14 = vpop.f32.mrf.mxu3 }
 0x2df   : > { %v1512_v15 = vpop.f32.mrf.mxu2 }
 0x2e0   : > { %v1586_v16 = vsel %vm1573_vm2, %v1512_v15, -inf }
 0x2e1   : > { %1587 = vmax.xlane.f32.xlu1 %v1586_v16 }
 0x2e2   : > { %v1576_v23 = vpop.xlane.xlu1 %1575 }
 0x2e3   : > { %v1474_v17 = vpop.f32.mrf.mxu3  ;;  %v1598_v31 = vsub.f32 %v1436_v4, %v1576_v23 }
 0x2e4   : > { %v1580_v18 = vsel %vm1573_vm2, %v1474_v17, -inf }
 0x2e5   : > { %v1493_v19 = vpop.f32.mrf.mxu0  ;;  %1581 = vmax.xlane.f32.xlu0 %v1580_v18  ;;  %v1606_v34 = vmul.f32 1.442695, %v1598_v31 }
 0x2e6   : > { %v1583_v20 = vsel %vm1573_vm2, %v1493_v19, -inf }
 0x2e7   : > { %v1514_v21 = vpop.f32.mrf.mxu2  ;;  %1584 = vmax.xlane.f32.xlu2 %v1583_v20  ;;  %5717 = vpow2.f32 %v1606_v34 }
 0x2eb   : > { %v1476_v22 = vpop.f32.mrf.mxu3 }
 0x2ed   : > { %v1495_v26 = vpop.f32.mrf.mxu0  ;;  %v5718_v42 = vpop.eup %5717 }
 0x2ee   : > { %v1622_v44 = vsel %vm1573_vm2, %v5718_v42, 0.0 }
 0x2ef   : > { %v1531_v32 = vpop.f32.mrf.mxu2 }
 0x2f0   : > { %v1589_v33 = vsel %vm1573_vm2, %v1531_v32, -inf }
 0x2f1   : > { %1590 = vmax.xlane.f32.xlu2 %v1589_v33 }
 0x2f2   : > { %v1579_v51 = vpop.xlane.xlu2 %1578 }
 0x2f3   : > { %v1550_v35 = vpop.f32.mrf.mxu3  ;;  %v1599_v52 = vsub.f32 %v1455_v12, %v1579_v51 }
 0x2f4   : > { %v1592_v36 = vsel %vm1573_vm2, %v1550_v35, -inf }
 0x2f5   : > { %v1569_v37 = vpop.f32.mrf.mxu0  ;;  %1593 = vmax.xlane.f32.xlu0 %v1592_v36  ;;  %v1608_v53 = vmul.f32 1.442695, %v1599_v52 }
 0x2f6   : > { %v1595_v40 = vsel %vm1573_vm2, %v1569_v37, -inf }
 0x2f7   : > { %v1533_v39 = vpop.f32.mrf.mxu2  ;;  %5719 = vpow2.f32 %v1608_v53 }
 0x2f9   : > { %1596 = vmax.xlane.f32.xlu2 %v1595_v40 }
 0x2fb   : > { %v1552_v41 = vpop.f32.mrf.mxu3 }
 0x2fd   : > { %v1571_v43 = vpop.f32.mrf.mxu0  ;;  %v6587_v54 = vpop.eup %5719 }
 0x2fe   : > { %v1625_v55 = vsel %vm1573_vm2, %v6587_v54, 0.0 }
 0x301   : > { %1623 = vadd.xlane.f32.xlu2 %v1622_v44 }
 0x309   : > { %5682 = vrot.lane.b32.xlu0 %v5681_v45, %s6139_s25  ;;  %v5686_v45 = vpack.i.bf16 %v6542_v10, %v6560_v38 }
 0x333   : > { %1626 = vadd.xlane.f32.xlu0 %v1625_v55 }
 0x347   : > { %1406 = vrot.lane.b32.xlu0 %v6542_v10, %s6141_s22 }
 0x34f   : > { %1408 = vrot.lane.b32.xlu0 %v6560_v38, %s6141_s22 }
 0x354   : > { %v1588_v2 = vpop.xlane.xlu1 %1587 }
 0x355   : > { %v1602_v4 = vsub.f32 %v1512_v15, %v1588_v2 }
 0x357   : > { %v1614_v8 = vmul.f32 1.442695, %v1602_v4 }
 0x358   : > { %v1582_v56 = vpop.xlane.xlu0 %1581 }
 0x359   : > { %v1600_v57 = vsub.f32 %v1474_v17, %v1582_v56 }
 0x35a   : > { %v1585_v62 = vpop.xlane.xlu2 %1584 }
 0x35b   : > { %v1610_v63 = vmul.f32 1.442695, %v1600_v57  ;;  %v1601_v0 = vsub.f32 %v1493_v19, %v1585_v62 }
 0x35d   : > { %5721 = vpow2.f32 %v1610_v63  ;;  %v1612_v1 = vmul.f32 1.442695, %v1601_v0 }
 0x35f   : > { %5723 = vpow2.f32 %v1612_v1 }
 0x363   : > { %v6595_v3 = vpop.eup %5721 }
 0x364   : > { %v1591_v5 = vpop.xlane.xlu2 %1590  ;;  %v1628_v6 = vsel %vm1573_vm2, %v6595_v3, 0.0 }
 0x365   : > { %v1603_v7 = vsub.f32 %v1531_v32, %v1591_v5  ;;  %1629 = vadd.xlane.f32.xlu1 %v1628_v6  ;;  %v6599_v12 = vpop.eup %5723 }
 0x366   : > { %v1631_v16 = vsel %vm1573_vm2, %v6599_v12, 0.0 }
 0x367   : > { %v1616_v9 = vmul.f32 1.442695, %v1603_v7 }
 0x368   : > { %v1594_v11 = vpop.xlane.xlu0 %1593 }
 0x369   : > { %5725 = vpow2.f32 %v1616_v9  ;;  %v1604_v13 = vsub.f32 %v1550_v35, %v1594_v11 }
 0x36a   : > { %5727 = vpow2.f32 %v1614_v8 }
 0x36b   : > { %v1618_v17 = vmul.f32 1.442695, %v1604_v13 }
 0x36c   : > { %v1597_v14 = vpop.xlane.xlu2 %1596 }
 0x36d   : > { %1632 = vadd.xlane.f32.xlu1 %v1631_v16  ;;  %5729 = vpow2.f32 %v1618_v17  ;;  %v1605_v20 = vsub.f32 %v1569_v37, %v1597_v14 }
 0x36f   : > { %v6603_v15 = vpop.eup %5725  ;;  %v1620_v23 = vmul.f32 1.442695, %v1605_v20 }
 0x370   : > { %v1637_v18 = vsel %vm1573_vm2, %v6603_v15, 0.0  ;;  %v6607_v19 = vpop.eup %5727 }
 0x371   : > { %1638 = vadd.xlane.f32.xlu2 %v1637_v18  ;;  %v1634_v22 = vsel %vm1573_vm2, %v6607_v19, 0.0 }
 0x373   : > { %v6611_v26 = vpop.eup %5729 }
 0x374   : > { %v1624_v21 = vpop.xlane.xlu2 %1623  ;;  %v1640_v36 = vsel %vm1573_vm2, %v6611_v26, 0.0 }
 0x375   : > { %5731 = vrcp.f32 %v1624_v21  ;;  %1635 = vadd.xlane.f32.xlu1 %v1634_v22 }
 0x376   : > { %5733 = vpow2.f32 %v1620_v23 }
 0x37b   : > { %v5732_v31 = vpop.eup %5731  ;;  %v5683_v32 = vpop.permute.xlu0 %5682 }
 0x37c   : > { %v1654_v33 = vmul.f32 %v5732_v31, %v5718_v42  ;;  %v5685_v34 = vunpack.i.h.bf16 %v5683_v32  ;;  %v5684_v35 = vunpack.i.l.bf16 %v5683_v32  ;;  %v6618_v44 = vpop.eup %5733 }
 0x37d   : > { %1641 = vadd.xlane.f32.xlu1 %v1640_v36  ;;  %v1643_v42 = vsel %vm1573_vm2, %v6618_v44, 0.0 }
 0x37e   : > { %v1415_v37 = vpack.c.bf16 %v5685_v34, %v5685_v34  ;;  %v1414_v39 = vpack.c.bf16 %v5684_v35, %v5684_v35  ;;  %v1662_v40 = vpack.c.bf16 %v1654_v33, %v1654_v33 }
 0x380   : > { %4323 = vmatmul.msk.bf16.vlgmr.msrb.gmra.mxu1 %vm1573_vm2, %v1662_v40  ;;  %v1713_v41 = vsel %vm1673_vm1, %v1414_v39, 0  ;;  %v1732_v43 = vsel %vm1673_vm1, %v1415_v37, 0 }
 0x381   : > { %1722 = vmatpush.bf16.msra.mxu3 %v1713_v41  ;;  %1741 = vmatpush.bf16.msrb.mxu0 %v1732_v43 }
 0x385   : > { %1644 = vadd.xlane.f32.xlu1 %v1643_v42 }
 0x389   : > { %5687 = vrot.lane.b32.xlu2 %v5686_v45, %s6140_s15 }
 0x3a6   : > { %v1627_v51 = vpop.xlane.xlu0 %1626 }
 0x3a7   : > { %5735 = vrcp.f32 %v1627_v51 }
 0x3ad   : > { %v5736_v52 = vpop.eup %5735 }
 0x3ae   : > { %v1655_v53 = vmul.f32 %v5736_v52, %v6587_v54  ;;  %v5293_v52 = vld [vmem:[#allocation5 + $0x30] sm:$0xff] }
 0x3b0   : > { %v1663_v55 = vpack.c.bf16 %v1655_v53, %v1655_v53 }
 0x3b2   : > { %4324 = vmatmul.msk.bf16.vlgmr.msrb.gmra.mxu2 %vm1573_vm2, %v1663_v55  ;;  %v5292_v55 = vld [vmem:[#allocation5 + $0x28] sm:$0xff] }
 0x3b9   : > { %v1407_v56 = vpop.permute.xlu0 %1406 }
 0x3ba   : > { %v1418_v57 = vpack.c.bf16 %v1407_v56, %v1407_v56 }
 0x3bc   : > { %v1789_v62 = vsel %vm1673_vm1, %v1418_v57, 0 }
 0x3bd   : > { %1798 = vmatpush.bf16.msrb.mxu3 %v1789_v62 }
 0x3c1   : > { %v1409_v63 = vpop.permute.xlu0 %1408 }
 0x3c2   : > { %v1419_v0 = vpack.c.bf16 %v1409_v63, %v1409_v63 }
 0x3c4   : > { %v1808_v1 = vsel %vm1673_vm1, %v1419_v0, 0 }
 0x3c5   : > { %1817 = vmatpush.bf16.msra.mxu0 %v1808_v1 }
 0x3d8   : > { %v1630_v10 = vpop.xlane.xlu1 %1629 }
 0x3d9   : > { %5737 = vrcp.f32 %v1630_v10 }
 0x3df   : > { %v5738_v38 = vpop.eup %5737 }
 0x3e0   : > { %v1656_v2 = vmul.f32 %v5738_v38, %v6595_v3  ;;  %v1633_v4 = vpop.xlane.xlu1 %1632 }
 0x3e1   : > { %5739 = vrcp.f32 %v1633_v4 }
 0x3e2   : > { %v1664_v54 = vpack.c.bf16 %v1656_v2, %v1656_v2 }
 0x3e4   : > { %v1639_v5 = vpop.xlane.xlu2 %1638  ;;  %4325 = vmatmul.msk.bf16.vlgmr.msra.gmra.mxu3 %vm1573_vm2, %v1664_v54  ;;  %v5291_v54 = vld [vmem:[#allocation5 + $0x20] sm:$0xff] }
 0x3e5   : > { %5741 = vrcp.f32 %v1639_v5  ;;  %v5290_v5 = vld [vmem:[#allocation5 + $0x18] sm:$0xff] }
 0x3e7   : > { %v5740_v6 = vpop.eup %5739 }
 0x3e8   : > { %v1657_v7 = vmul.f32 %v5740_v6, %v6599_v12  ;;  %v1636_v8 = vpop.xlane.xlu1 %1635  ;;  %v5289_v6 = vld [vmem:[#allocation5 + $0x10] sm:$0xff] }
 0x3e9   : > { %5743 = vrcp.f32 %v1636_v8  ;;  %v5287_v8 = vld [vmem:[#allocation5] sm:$0xff] }
 0x3ea   : > { %v1665_v9 = vpack.c.bf16 %v1657_v7, %v1657_v7  ;;  %v5288_v7 = vld [vmem:[#allocation5 + $0x8] sm:$0xff] }
 0x3eb   : > { %v5742_v11 = vpop.eup %5741 }
 0x3ec   : > { %v5688_v13 = vpop.permute.xlu2 %5687  ;;  %4326 = vmatmul.msk.bf16.vlgmr.msrb.gmra.mxu0 %vm1573_vm2, %v1665_v9  ;;  %v1659_v17 = vmul.f32 %v5742_v11, %v6603_v15  ;;  %v4421_v9 = vld [vmem:[#allocation7 + $0x70] sm:$0xf]  ;;  %v5310_v11 = vld [vmem:[#allocation7 + $0x74] sm:$0xf0] }
 0x3ed   : > { %v5690_v14 = vunpack.i.h.bf16 %v5688_v13  ;;  %v5689_v16 = vunpack.i.l.bf16 %v5688_v13  ;;  %v5309_v13 = vld [vmem:[#allocation7 + $0x74] sm:$0xf] }
 0x3ee   : > { %v1667_v32 = vpack.c.bf16 %v1659_v17, %v1659_v17  ;;  %v5308_v17 = vld [vmem:[#allocation7 + $0x64] sm:$0xf0] }
 0x3ef   : > { %v5744_v3 = vpop.eup %5743  ;;  %v1416_v18 = vpack.c.bf16 %v5690_v14, %v5690_v14  ;;  %v1417_v20 = vpack.c.bf16 %v5689_v16, %v5689_v16  ;;  %v4422_v14 = vor.u32 %v5310_v11, %v4421_v9  ;;  %v4423_v16 = vld [vmem:[#allocation7 + $0x78] sm:$0xf0]  ;;  %v5299_v9 = vld [vmem:[#allocation7 + $0x24] sm:$0xf]  ;;  %v4383_v11 = vld [vmem:[#allocation7 + $0x28] sm:$0xf0] }
 0x3f0   : > { %v1658_v21 = vmul.f32 %v5744_v3, %v6607_v19  ;;  %v1642_v22 = vpop.xlane.xlu1 %1641  ;;  %v4413_v3 = vld [vmem:[#allocation7 + $0x60] sm:$0xf] }
 0x3f1   : > { %5745 = vrcp.f32 %v1642_v22  ;;  %v1751_v12 = vsel %vm1673_vm1, %v1416_v18, 0  ;;  %v1770_v23 = vsel %vm1673_vm1, %v1417_v20, 0  ;;  %v4426_v18 = vor.u32 %v5309_v13, %v4423_v16  ;;  %v5307_v20 = vld [vmem:[#allocation7 + $0x64] sm:$0xf]  ;;  %v5298_v16 = vld [vmem:[#allocation7 + $0x14] sm:$0xf0] }
 0x3f2   : > { %v1666_v31 = vpack.c.bf16 %v1658_v21, %v1658_v21  ;;  %1760 = vmatpush.bf16.msra.mxu1 %v1751_v12  ;;  %1779 = vmatpush.bf16.msra.mxu2 %v1770_v23  ;;  %v4415_v21 = vld [vmem:[#allocation7 + $0x68] sm:$0xf0]  ;;  %v4414_v22 = vor.u32 %v5308_v17, %v4413_v3  ;;  %v4405_v23 = vld [vmem:[#allocation7 + $0x50] sm:$0xf]  ;;  %v4386_v13 = vor.u32 %v5299_v9, %v4383_v11  ;;  %v5297_v3 = vld [vmem:[#allocation7 + $0x14] sm:$0xf] }
 0x3f3   : > { %2057 = vmatpush.bf16.msra.mxu3 %v4426_v18  ;;  %v4418_v12 = vor.u32 %v5307_v20, %v4415_v21  ;;  %v4375_v18 = vld [vmem:[#allocation7 + $0x18] sm:$0xf0]  ;;  %v4365_v21 = vld [vmem:[#allocation7] sm:$0xf] }
 0x3f4   : > { %v4378_v20 = vor.u32 %v5297_v3, %v4375_v18  ;;  %v4461_v11 = vld [vmem:[#allocation8 + $0x40] sm:$0xf]  ;;  %v5336_v3 = vld [vmem:[#allocation8 + $0xc4] sm:$0xf0]  ;;  %v4463_v18 = vld [vmem:[#allocation8 + $0x48] sm:$0xf0] }
 0x3f5   : > { %4327 = vmatmul.msk.bf16.vlgmr.msra.gmra.mxu1 %vm1573_vm2, %v1666_v31  ;;  %4328 = vmatmul.msk.bf16.vlgmr.msra.gmra.mxu2 %vm1573_vm2, %v1667_v32  ;;  %v5306_v31 = vld [vmem:[#allocation7 + $0x54] sm:$0xf0]  ;;  %v5305_v32 = vld [vmem:[#allocation7 + $0x54] sm:$0xf] }
 0x3f6   : > { %2043 = vmatpush.bf16.msrb.mxu2 %v4422_v14  ;;  %v4373_v14 = vld [vmem:[#allocation7 + $0x10] sm:$0xf] }
 0x3f7   : > { %v5746_v33 = vpop.eup %5745  ;;  %2058 = vmatpush.bf16.msra.mxu3 %v4418_v12  ;;  %v4374_v17 = vor.u32 %v5298_v16, %v4373_v14  ;;  %v5295_v12 = vld [vmem:[#allocation7 + $0x4] sm:$0xf]  ;;  %v4525_v14 = vld [vmem:[#allocation8 + $0xc0] sm:$0xf] }
 0x3f8   : > { %v1660_v15 = vmul.f32 %v5746_v33, %v6611_v26  ;;  %v1645_v34 = vpop.xlane.xlu1 %1644  ;;  %v5294_v26 = vld [vmem:[#allocation5 + $0x38] sm:$0xff] }
 0x3f9   : > { %5747 = vrcp.f32 %v1645_v34  ;;  %1924 = vmatpush.bf16.msrb.mxu1 %v5294_v26  ;;  %v4407_v33 = vld [vmem:[#allocation7 + $0x58] sm:$0xf0] }
 0x3fa   : > { %v1668_v19 = vpack.c.bf16 %v1660_v15, %v1660_v15  ;;  %2044 = vmatpush.bf16.msrb.mxu2 %v4414_v22  ;;  %v4406_v15 = vor.u32 %v5306_v31, %v4405_v23  ;;  %v4410_v34 = vor.u32 %v5305_v32, %v4407_v33  ;;  %v5296_v22 = vld [vmem:[#allocation7 + $0x4] sm:$0xf0]  ;;  %v4367_v31 = vld [vmem:[#allocation7 + $0x8] sm:$0xf0]  ;;  %v4485_v33 = vld [vmem:[#allocation8 + $0x70] sm:$0xf] }
 0x3fb   : > { %v4366_v23 = vor.u32 %v5296_v22, %v4365_v21  ;;  %v4370_v32 = vor.u32 %v5295_v12, %v4367_v31  ;;  %v4527_v21 = vld [vmem:[#allocation8 + $0xc8] sm:$0xf0]  ;;  %v4526_v12 = vor.u32 %v5336_v3, %v4525_v14  ;;  %v4503_v14 = vld [vmem:[#allocation8 + $0x98] sm:$0xf0]  ;;  %v4429_v3 = vld [vmem:[#allocation8] sm:$0xf] }
 0x3fc   : > { %4329 = vmatmul.msk.bf16.vlgmr.msrb.gmra.mxu3 %vm1573_vm2, %v1668_v19  ;;  %v4397_v19 = vld [vmem:[#allocation7 + $0x40] sm:$0xf] }
 0x3fd   : > { %v6641_v35 = vpop.f32.mrf.mxu1  ;;  %1925 = vmatpush.bf16.msrb.mxu1 %v5293_v52  ;;  %2059 = vmatpush.bf16.msra.mxu3 %v4410_v34  ;;  %v4549_v34 = vld [vmem:[#allocation8 + $0xf0] sm:$0xf] }
 0x3fe   : > { %2045 = vmatpush.bf16.msrb.mxu2 %v4406_v15  ;;  %v5326_v15 = vld [vmem:[#allocation8 + $0x74] sm:$0xf0] }
 0x3ff   : > { %v5748_v36 = vpop.eup %5747 }
 0x400   : > { %v1661_v37 = vmul.f32 %v5748_v36, %v6618_v44  ;;  %v5304_v36 = vld [vmem:[#allocation7 + $0x44] sm:$0xf0] }
 0x401   : > { %1926 = vmatpush.bf16.msrb.mxu1 %v5292_v55 }
 0x402   : > { %v1669_v39 = vpack.c.bf16 %v1661_v37, %v1661_v37  ;;  %v5303_v37 = vld [vmem:[#allocation7 + $0x44] sm:$0xf] }
 0x404   : > { %4330 = vmatmul.msk.bf16.vlgmr.msra.gmra.mxu0 %vm1573_vm2, %v1669_v39  ;;  %v4399_v39 = vld [vmem:[#allocation7 + $0x48] sm:$0xf0] }
 0x405   : > { %v1688_v40 = vpop.f32.mrf.mxu1  ;;  %1927 = vmatpush.bf16.msrb.mxu1 %v5291_v54  ;;  %v5301_v54 = vld [vmem:[#allocation7 + $0x34] sm:$0xf] }
 0x406   : > { %v4398_v40 = vor.u32 %v5304_v36, %v4397_v19  ;;  %v4486_v19 = vor.u32 %v5326_v15, %v4485_v33  ;;  %v5342_v36 = vld [vmem:[#allocation8 + $0xf4] sm:$0xf0]  ;;  %v5713_v33 = vld [vmem:[%s6731_s29] ss:$0 sm:$0xff] }
 0x408   : > { %2046 = vmatpush.bf16.msrb.mxu2 %v4398_v40  ;;  %v4550_v40 = vor.u32 %v5342_v36, %v4549_v34  ;;  %2275 = vmatpush.bf16.msrb.mxu0 %v4486_v19 }
 0x409   : > { %1928 = vmatpush.bf16.msrb.mxu1 %v5290_v5 }
 0x40d   : > { %1929 = vmatpush.bf16.msrb.mxu1 %v5289_v6  ;;  %v4391_v6 = vld [vmem:[#allocation7 + $0x38] sm:$0xf0] }
 0x411   : > { %1930 = vmatpush.bf16.msrb.mxu1 %v5288_v7  ;;  %v4394_v7 = vor.u32 %v5301_v54, %v4391_v6  ;;  %v5338_v54 = vld [vmem:[#allocation8 + $0xd4] sm:$0xf0] }
 0x415   : > { %1931 = vmatpush.bf16.msrb.mxu1 %v5287_v8  ;;  %v5300_v8 = vld [vmem:[#allocation7 + $0x24] sm:$0xf0] }
 0x419   : > { %2289 = vmatpush.bf16.msra.mxu1 %v4550_v40  ;;  %v4453_v40 = vld [vmem:[#allocation8 + $0x30] sm:$0xf] }
 0x435   : > { %v6645_v41 = vpop.f32.mrf.mxu2 }
 0x43d   : > { %v1707_v43 = vpop.f32.mrf.mxu2 }
 0x43e   : > { %v4402_v43 = vor.u32 %v5303_v37, %v4399_v39  ;;  %v5325_v37 = vld [vmem:[#allocation8 + $0x74] sm:$0xf]  ;;  %v4487_v39 = vld [vmem:[#allocation8 + $0x78] sm:$0xf0] }
 0x440   : > { %2060 = vmatpush.bf16.msra.mxu3 %v4402_v43  ;;  %v4490_v43 = vor.u32 %v5325_v37, %v4487_v39 }
 0x444   : > { %2061 = vmatpush.bf16.msra.mxu3 %v4394_v7  ;;  %v4471_v7 = vld [vmem:[#allocation8 + $0x58] sm:$0xf0] }
 0x448   : > { %2062 = vmatpush.bf16.msra.mxu3 %v4386_v13  ;;  %v5320_v13 = vld [vmem:[#allocation8 + $0x44] sm:$0xf0] }
 0x449   : > { %v4462_v22 = vor.u32 %v5320_v13, %v4461_v11  ;;  %v5329_v13 = vld [vmem:[#allocation8 + $0x94] sm:$0xf] }
 0x44c   : > { %2063 = vmatpush.bf16.msra.mxu3 %v4378_v20  ;;  %v5335_v20 = vld [vmem:[#allocation8 + $0xc4] sm:$0xf] }
 0x44d   : > { %v4530_v31 = vor.u32 %v5335_v20, %v4527_v21  ;;  %v5328_v21 = vld [vmem:[#allocation8 + $0x84] sm:$0xf0] }
 0x450   : > { %2064 = vmatpush.bf16.msra.mxu3 %v4370_v32 }
 0x467   : > { %v1724_v42 = vpop.f32.mrf.mxu3 }
 0x469   : > { %v1743_v45 = vpop.f32.mrf.mxu0 }
 0x46a   : > { %v5691_v51 = vpack.i.bf16 %v1743_v45, %v1724_v42 }
 0x46c   : > { %5692 = vrot.lane.b32.xlu1 %v5691_v51, %s6141_s22  ;;  %s6742_s22 = sld [smem:[#allocation38_spill]] }
 0x46f   : > { %v1726_v53 = vpop.f32.mrf.mxu3 }
 0x471   : > { %v1745_v56 = vpop.f32.mrf.mxu0 }
 0x472   : > { %v1762_v44 = vpop.f32.mrf.mxu1  ;;  %s1072_s29 = scalar_lea.vmem %s6742_s22, %s4216_s16 }
 0x478   : > { %v1781_v57 = vpop.f32.mrf.mxu2 }
 0x479   : > { %v5696_v62 = vpack.i.bf16 %v1781_v57, %v1762_v44 }
 0x47a   : > { %v1764_v63 = vpop.f32.mrf.mxu1 }
 0x47b   : > { %5697 = vrot.lane.b32.xlu0 %v5696_v62, %s6140_s15  ;;  %s6145_s15 = smov 3  }
 0x47f   : > { %v1800_v0 = vpop.f32.mrf.mxu3 }
 0x480   : > { %v1783_v1 = vpop.f32.mrf.mxu2 }
 0x481   : > { %v1819_v10 = vpop.f32.mrf.mxu0 }
 0x482   : > { %v5701_v38 = vpack.i.bf16 %v1819_v10, %v1800_v0 }
 0x484   : > { %5702 = vrot.lane.b32.xlu2 %v5701_v38, %s6139_s25  ;;  %s6741_s25 = sld [smem:[#allocation37_spill]] }
 0x487   : > { %v1802_v2 = vpop.f32.mrf.mxu3 }
 0x488   : > { %v4389_v2 = vld [vmem:[#allocation7 + $0x30] sm:$0xf] }
 0x489   : > { %v1821_v4 = vpop.f32.mrf.mxu0 }
 0x48a   : > { %v5302_v4 = vld [vmem:[#allocation7 + $0x34] sm:$0xf0] }
 0x48b   : > { %v4390_v5 = vor.u32 %v5302_v4, %v4389_v2  ;;  %v4533_v4 = vld [vmem:[#allocation8 + $0xd0] sm:$0xf] }
 0x48c   : > { %v4534_v9 = vor.u32 %v5338_v54, %v4533_v4  ;;  %v4437_v54 = vld [vmem:[#allocation8 + $0x10] sm:$0xf] }
 0x48d   : > { %2047 = vmatpush.bf16.msrb.mxu2 %v4390_v5  ;;  %v5321_v5 = vld [vmem:[#allocation8 + $0x54] sm:$0xf] }
 0x4de   : > { %v5693_v42 = vpop.permute.xlu1 %5692  ;;  %v5703_v51 = vpop.permute.xlu2 %5702 }
 0x4df   : > { %v5695_v45 = vunpack.i.h.bf16 %v5693_v42  ;;  %v5694_v26 = vunpack.i.l.bf16 %v5693_v42  ;;  %v5705_v57 = vunpack.i.h.bf16 %v5703_v51  ;;  %v5704_v62 = vunpack.i.l.bf16 %v5703_v51  ;;  %v5341_v42 = vld [vmem:[#allocation8 + $0xf4] sm:$0xf] }
 0x4e1   : > { %v1848_v56 = vsel %vm1420_vm0, %v6645_v41, %v5695_v45  ;;  %v1847_v44 = vsel %vm1420_vm0, %v6641_v35, %v5694_v26  ;;  %v4381_v41 = vld [vmem:[#allocation7 + $0x20] sm:$0xf]  ;;  %v4551_v45 = vld [vmem:[#allocation8 + $0xf8] sm:$0xf0] }
 0x4e2   : > { %v4382_v35 = vor.u32 %v5300_v8, %v4381_v41  ;;  %v4477_v26 = vld [vmem:[#allocation8 + $0x60] sm:$0xf]  ;;  %v4554_v51 = vor.u32 %v5341_v42, %v4551_v45  ;;  %v5337_v41 = vld [vmem:[#allocation8 + $0xd4] sm:$0xf]  ;;  %v4535_v8 = vld [vmem:[#allocation8 + $0xd8] sm:$0xf0] }
 0x4e3   : > { %v4538_v16 = vor.u32 %v5337_v41, %v4535_v8  ;;  %v4517_v42 = vld [vmem:[#allocation8 + $0xb0] sm:$0xf]  ;;  %v5330_v41 = vld [vmem:[#allocation8 + $0x94] sm:$0xf0]  ;;  %v5313_v8 = vld [vmem:[#allocation8 + $0x14] sm:$0xf] }
 0x4e4   : > { %2048 = vmatpush.bf16.msrb.mxu2 %v4382_v35  ;;  %2317 = vmatpush.bf16.msrb.mxu3 %v4554_v51  ;;  %v4474_v35 = vor.u32 %v5321_v5, %v4471_v7  ;;  %v5317_v51 = vld [vmem:[#allocation8 + $0x34] sm:$0xf]  ;;  %v5314_v5 = vld [vmem:[#allocation8 + $0x14] sm:$0xf0] }
 0x4e5   : > { %v4438_v7 = vor.u32 %v5314_v5, %v4437_v54  ;;  %v4589_v5 = vld [vmem:[#allocation10 + $0x40] sm:$0xf] }
 0x4e8   : > { %2049 = vmatpush.bf16.msrb.mxu2 %v4374_v17  ;;  %v5319_v17 = vld [vmem:[#allocation8 + $0x44] sm:$0xf] }
 0x4ec   : > { %2050 = vmatpush.bf16.msrb.mxu2 %v4366_v23  ;;  %v4466_v23 = vor.u32 %v5319_v17, %v4463_v18  ;;  %v5312_v17 = vld [vmem:[#allocation8 + $0x4] sm:$0xf0]  ;;  %v4493_v18 = vld [vmem:[#allocation8 + $0x80] sm:$0xf] }
 0x4ed   : > { %v5698_v52 = vpop.permute.xlu0 %5697  ;;  %v4430_v20 = vor.u32 %v5312_v17, %v4429_v3 }
 0x4ee   : > { %v5700_v53 = vunpack.i.h.bf16 %v5698_v52  ;;  %v5699_v55 = vunpack.i.l.bf16 %v5698_v52  ;;  %v5324_v52 = vld [vmem:[#allocation8 + $0x64] sm:$0xf0] }
 0x4f0   : > { %v1850_v63 = vsel %vm1849_vm3, %v1847_v44, %v5699_v55  ;;  %v1851_v0 = vsel %vm1849_vm3, %v1848_v56, %v5700_v53  ;;  %v4541_v53 = vld [vmem:[#allocation8 + $0xe0] sm:$0xf]  ;;  %v5340_v55 = vld [vmem:[#allocation8 + $0xe4] sm:$0xf0]  ;;  %2303 = vmatpush.bf16.msra.mxu2 %v4490_v43  ;;  %v4478_v56 = vor.u32 %v5324_v52, %v4477_v26  ;;  %v5318_v43 = vld [vmem:[#allocation8 + $0x34] sm:$0xf0] }
 0x4f1   : > { %v1853_v1 = vsel %vm1852_vm4, %v1850_v63, %v5704_v62  ;;  %v1854_v10 = vsel %vm1852_vm4, %v1851_v0, %v5705_v57  ;;  %v4542_v44 = vor.u32 %v5340_v55, %v4541_v53  ;;  %v5323_v57 = vld [vmem:[#allocation8 + $0x64] sm:$0xf]  ;;  %v4479_v62 = vld [vmem:[#allocation8 + $0x68] sm:$0xf0]  ;;  %v4454_v45 = vor.u32 %v5318_v43, %v4453_v40  ;;  %v5334_v26 = vld [vmem:[#allocation8 + $0xb4] sm:$0xf0] }
 0x4f2   : > { %v1855_v38 = vpack.c.bf16 %v1854_v10, %v1853_v1  ;;  %v5339_v63 = vld [vmem:[#allocation8 + $0xe4] sm:$0xf]  ;;  %v4482_v0 = vor.u32 %v5323_v57, %v4479_v62  ;;  %v4543_v1 = vld [vmem:[#allocation8 + $0xe8] sm:$0xf0]  ;;  %v4469_v10 = vld [vmem:[#allocation8 + $0x50] sm:$0xf]  ;;  %2276 = vmatpush.bf16.msrb.mxu0 %v4478_v56  ;;  %v4518_v53 = vor.u32 %v5334_v26, %v4517_v42 }
 0x4f3   : > { %v4546_v2 = vor.u32 %v5339_v63, %v4543_v1  ;;  %2290 = vmatpush.bf16.msra.mxu1 %v4542_v44  ;;  %v4455_v52 = vld [vmem:[#allocation8 + $0x38] sm:$0xf0]  ;;  %v5333_v56 = vld [vmem:[#allocation8 + $0xb4] sm:$0xf]  ;;  %v5332_v62 = vld [vmem:[#allocation8 + $0xa4] sm:$0xf0] }
 0x4f4   : > { %1932 = vmatmul.bf16.vlgmr.msrb.gmra.mxu1 %v1855_v38  ;;  %v5322_v38 = vld [vmem:[#allocation8 + $0x54] sm:$0xf0]  ;;  %2304 = vmatpush.bf16.msra.mxu2 %v4482_v0  ;;  %v4458_v55 = vor.u32 %v5317_v51, %v4455_v52  ;;  %v4519_v44 = vld [vmem:[#allocation8 + $0xb8] sm:$0xf0]  ;;  %v5315_v63 = vld [vmem:[#allocation8 + $0x24] sm:$0xf] }
 0x4f5   : > { %v4470_v6 = vor.u32 %v5322_v38, %v4469_v10  ;;  %2318 = vmatpush.bf16.msrb.mxu3 %v4546_v2  ;;  %v4522_v58 = vor.u32 %v5333_v56, %v4519_v44  ;;  %v4447_v0 = vld [vmem:[#allocation8 + $0x28] sm:$0xf0]  ;;  %v5331_v38 = vld [vmem:[#allocation8 + $0xa4] sm:$0xf]  ;;  %v4605_v40 = vld [vmem:[#allocation10 + $0x60] sm:$0xf] }
 0x4f6   : > { %v4450_v10 = vor.u32 %v5315_v63, %v4447_v0  ;;  %v4511_v2 = vld [vmem:[#allocation8 + $0xa8] sm:$0xf0]  ;;  %v5356_v43 = vld [vmem:[#allocation10 + $0x64] sm:$0xf0]  ;;  %v4677_v51 = vld [vmem:[#allocation10 + $0xf0] sm:$0xf] }
 0x4f7   : > { %2277 = vmatpush.bf16.msrb.mxu0 %v4470_v6  ;;  %2291 = vmatpush.bf16.msra.mxu1 %v4534_v9  ;;  %v4514_v4 = vor.u32 %v5331_v38, %v4511_v2  ;;  %v4501_v6 = vld [vmem:[#allocation8 + $0x90] sm:$0xf]  ;;  %v4439_v9 = vld [vmem:[#allocation8 + $0x18] sm:$0xf0]  ;;  %v4607_v26 = vld [vmem:[#allocation10 + $0x68] sm:$0xf0]  ;;  %v4606_v52 = vor.u32 %v5356_v43, %v4605_v40 }
 0x4f8   : > { %2305 = vmatpush.bf16.msra.mxu2 %v4474_v35  ;;  %v4502_v35 = vor.u32 %v5330_v41, %v4501_v6  ;;  %v4442_v11 = vor.u32 %v5313_v8, %v4439_v9  ;;  %v4679_v56 = vld [vmem:[#allocation10 + $0xf8] sm:$0xf0]  ;;  %v4669_v63 = vld [vmem:[#allocation10 + $0xe0] sm:$0xf]  ;;  %v5372_v0 = vld [vmem:[#allocation10 + $0xe4] sm:$0xf0] }
 0x4f9   : > { %2319 = vmatpush.bf16.msrb.mxu3 %v4538_v16  ;;  %v4506_v16 = vor.u32 %v5329_v13, %v4503_v14  ;;  %v4671_v38 = vld [vmem:[#allocation10 + $0xe8] sm:$0xf0]  ;;  %v5352_v6 = vld [vmem:[#allocation10 + $0x44] sm:$0xf0]  ;;  %v4581_v43 = vld [vmem:[#allocation10 + $0x30] sm:$0xf] }
 0x4fa   : > { %v4591_v41 = vld [vmem:[#allocation10 + $0x48] sm:$0xf0]  ;;  %v4590_v8 = vor.u32 %v5352_v6, %v4589_v5  ;;  %v4565_v5 = vld [vmem:[#allocation10 + $0x10] sm:$0xf]  ;;  %v5346_v6 = vld [vmem:[#allocation10 + $0x14] sm:$0xf0] }
 0x4fb   : > { %2278 = vmatpush.bf16.msrb.mxu0 %v4462_v22  ;;  %2292 = vmatpush.bf16.msra.mxu1 %v4526_v12  ;;  %v5311_v22 = vld [vmem:[#allocation8 + $0x4] sm:$0xf]  ;;  %v4431_v12 = vld [vmem:[#allocation8 + $0x8] sm:$0xf0] }
 0x4fc   : > { %2306 = vmatpush.bf16.msra.mxu2 %v4466_v23  ;;  %v4494_v23 = vor.u32 %v5328_v21, %v4493_v18 }
 0x4fd   : > { %2320 = vmatpush.bf16.msrb.mxu3 %v4530_v31  ;;  %v4434_v31 = vor.u32 %v5311_v22, %v4431_v12 }
 0x4ff   : > { %2279 = vmatpush.bf16.msrb.mxu0 %v4454_v45  ;;  %2293 = vmatpush.bf16.msra.mxu1 %v4518_v53  ;;  %v5355_v45 = vld [vmem:[#allocation10 + $0x64] sm:$0xf]  ;;  %v5374_v53 = vld [vmem:[#allocation10 + $0xf4] sm:$0xf0] }
 0x500   : > { %2307 = vmatpush.bf16.msra.mxu2 %v4458_v55  ;;  %v5373_v55 = vld [vmem:[#allocation10 + $0xf4] sm:$0xf]  ;;  %v4610_v44 = vor.u32 %v5355_v45, %v4607_v26 }
 0x501   : > { %2321 = vmatpush.bf16.msrb.mxu3 %v4522_v58  ;;  %v4678_v58 = vor.u32 %v5374_v53, %v4677_v51  ;;  %v5349_v45 = vld [vmem:[#allocation10 + $0x34] sm:$0xf]  ;;  %v4583_v51 = vld [vmem:[#allocation10 + $0x38] sm:$0xf0]  ;;  %v4653_v53 = vld [vmem:[#allocation10 + $0xc0] sm:$0xf] }
 0x504   : > { %2308 = vmatpush.bf16.msra.mxu2 %v4450_v10  ;;  %v5371_v10 = vld [vmem:[#allocation10 + $0xe4] sm:$0xf] }
 0x505   : > { %2322 = vmatpush.bf16.msrb.mxu3 %v4514_v4  ;;  %v4674_v4 = vor.u32 %v5371_v10, %v4671_v38  ;;  %v5366_v10 = vld [vmem:[#allocation10 + $0xb4] sm:$0xf0]  ;;  %v5365_v38 = vld [vmem:[#allocation10 + $0xb4] sm:$0xf] }
 0x508   : > { %2309 = vmatpush.bf16.msra.mxu2 %v4442_v11 }
 0x509   : > { %2323 = vmatpush.bf16.msrb.mxu3 %v4506_v16 }
 0x50c   : > { %2310 = vmatpush.bf16.msra.mxu2 %v4434_v31 }
 0x571   : > { %v1933_v32 = vpop.f32.mrf.mxu1 }
 0x572   : > { %v1934_v15 = vadd.f32 %v5713_v33, %v1933_v32  ;;  %v5327_v32 = vld [vmem:[#allocation8 + $0x84] sm:$0xf] }
 0x574   : > { %v1938_v36 = vadd.f32 %v1934_v15, %v1123_v60  ;;  %v5316_v60 = vld [vmem:[#allocation8 + $0x24] sm:$0xf0] }
 0x575   : > { %v4446_v57 = vor.u32 %v5316_v60, %v4445_v59  ;;  %v4682_v59 = vor.u32 %v5373_v55, %v4679_v56  ;;  %v4597_v60 = vld [vmem:[#allocation10 + $0x50] sm:$0xf]  ;;  %v5368_v55 = vld [vmem:[#allocation10 + $0xc4] sm:$0xf0]  ;;  %v5367_v56 = vld [vmem:[#allocation10 + $0xc4] sm:$0xf] }
 0x577   : > { %2280 = vmatpush.bf16.msrb.mxu0 %v4446_v57  ;;  %v5353_v57 = vld [vmem:[#allocation10 + $0x54] sm:$0xf] }
 0x579   : > { %v1935_v34 = vpop.f32.mrf.mxu1 }
 0x57a   : > { %v1936_v19 = vadd.f32 %v5713_v33, %v1935_v34  ;;  %v4495_v33 = vld [vmem:[#allocation8 + $0x88] sm:$0xf0]  ;;  %v4613_v34 = vld [vmem:[#allocation10 + $0x70] sm:$0xf] }
 0x57b   : > { %2281 = vmatpush.bf16.msrb.mxu0 %v4438_v7  ;;  %v4498_v15 = vor.u32 %v5327_v32, %v4495_v33  ;;  %v5351_v7 = vld [vmem:[#allocation10 + $0x44] sm:$0xf] }
 0x57c   : > { %v1939_v37 = vadd.f32 %v1936_v19, %v1124_v61  ;;  %v4509_v61 = vld [vmem:[#allocation8 + $0xa0] sm:$0xf]  ;;  %v5358_v19 = vld [vmem:[#allocation10 + $0x74] sm:$0xf0]  ;;  %v4594_v9 = vor.u32 %v5351_v7, %v4591_v41  ;;  %v5345_v7 = vld [vmem:[#allocation10 + $0x14] sm:$0xf]  ;;  %v4566_v41 = vor.u32 %v5346_v6, %v4565_v5 }
 0x57d   : > { %v4510_v1 = vor.u32 %v5332_v62, %v4509_v61  ;;  %2324 = vmatpush.bf16.msrb.mxu3 %v4498_v15  ;;  %v5354_v61 = vld [vmem:[#allocation10 + $0x54] sm:$0xf0]  ;;  %v4599_v62 = vld [vmem:[#allocation10 + $0x58] sm:$0xf0] }
 0x57e   : > { %v1940_v39 = vpack.c.bf16 %v1939_v37, %v1938_v36  ;;  %v5357_v36 = vld [vmem:[#allocation10 + $0x74] sm:$0xf]  ;;  %v4614_v37 = vor.u32 %v5358_v19, %v4613_v34  ;;  %v4598_v2 = vor.u32 %v5354_v61, %v4597_v60  ;;  %v4602_v54 = vor.u32 %v5353_v57, %v4599_v62  ;;  %v4661_v34 = vld [vmem:[#allocation10 + $0xd0] sm:$0xf]  ;;  %v5370_v19 = vld [vmem:[#allocation10 + $0xd4] sm:$0xf0] }
 0x57f   : > { %2294 = vmatpush.bf16.msra.mxu1 %v4510_v1  ;;  %2282 = vmatpush.bf16.msrb.mxu0 %v4430_v20  ;;  %v4670_v1 = vor.u32 %v5372_v0, %v4669_v63  ;;  %v4573_v60 = vld [vmem:[#allocation10 + $0x20] sm:$0xf]  ;;  %v5348_v61 = vld [vmem:[#allocation10 + $0x24] sm:$0xf0]  ;;  %v5347_v57 = vld [vmem:[#allocation10 + $0x24] sm:$0xf] }
 0x580   : > { %2051 = vmatmul.bf16.vlgmr.msrb.gmra.mxu2 %v1940_v39  ;;  %2065 = vmatmul.bf16.vlgmr.msra.gmra.mxu3 %v1940_v39  ;;  %v4615_v39 = vld [vmem:[#allocation10 + $0x78] sm:$0xf0]  ;;  %v4574_v62 = vor.u32 %v5348_v61, %v4573_v60  ;;  %v4575_v63 = vld [vmem:[#allocation10 + $0x28] sm:$0xf0]  ;;  %v5406_v61 = vld [vmem:[#allocation11 + $0xf4] sm:$0xf0] }
 0x581   : > { %v4618_v42 = vor.u32 %v5357_v36, %v4615_v39  ;;  %2577 = vmatpush.bf16.msra.mxu3 %v4682_v59  ;;  %v5369_v36 = vld [vmem:[#allocation10 + $0xd4] sm:$0xf]  ;;  %v4663_v39 = vld [vmem:[#allocation10 + $0xd8] sm:$0xf0]  ;;  %v4578_v0 = vor.u32 %v5347_v57, %v4575_v63 }
 0x582   : > { %v4666_v40 = vor.u32 %v5369_v36, %v4663_v39  ;;  %v5360_v36 = vld [vmem:[#allocation10 + $0x84] sm:$0xf0]  ;;  %v5405_v57 = vld [vmem:[#allocation11 + $0xf4] sm:$0xf] }
 0x583   : > { %2295 = vmatpush.bf16.msra.mxu1 %v4502_v35  ;;  %2535 = vmatpush.bf16.msra.mxu0 %v4614_v37  ;;  %v1957_v35 = vld [vmem:[%s6732_s2] sm:$0x3]  ;;  %v4662_v37 = vor.u32 %v5370_v19, %v4661_v34 }
 0x584   : > { %2563 = vmatpush.bf16.msrb.mxu2 %v4618_v42  ;;  %v1959_v14 = vperm.slane %v1957_v35, 0  ;;  %v1960_v16 = vperm.slane %v1957_v35, 1  ;;  %v5350_v42 = vld [vmem:[#allocation10 + $0x34] sm:$0xf0]  ;;  %v4637_v35 = vld [vmem:[#allocation10 + $0xa0] sm:$0xf] }
 0x585   : > { %2578 = vmatpush.bf16.msra.mxu3 %v4674_v4  ;;  %v4582_v26 = vor.u32 %v5350_v42, %v4581_v43  ;;  %v4647_v4 = vld [vmem:[#allocation10 + $0xb8] sm:$0xf0]  ;;  %v4621_v19 = vld [vmem:[#allocation10 + $0x80] sm:$0xf]  ;;  %v4741_v42 = vld [vmem:[#allocation11 + $0x70] sm:$0xf] }
 0x586   : > { %v4622_v39 = vor.u32 %v5360_v36, %v4621_v19 }
 0x587   : > { %2296 = vmatpush.bf16.msra.mxu1 %v4494_v23  ;;  %2536 = vmatpush.bf16.msra.mxu0 %v4606_v52  ;;  %v4586_v52 = vor.u32 %v5349_v45, %v4583_v51  ;;  %v5390_v45 = vld [vmem:[#allocation11 + $0x74] sm:$0xf0] }
 0x588   : > { %2564 = vmatpush.bf16.msrb.mxu2 %v4610_v44  ;;  %v4654_v44 = vor.u32 %v5368_v55, %v4653_v53  ;;  %v4742_v51 = vor.u32 %v5390_v45, %v4741_v42  ;;  %v4733_v53 = vld [vmem:[#allocation11 + $0x60] sm:$0xf]  ;;  %v5388_v55 = vld [vmem:[#allocation11 + $0x64] sm:$0xf0]  ;;  %v4799_v42 = vld [vmem:[#allocation11 + $0xe8] sm:$0xf0] }
 0x589   : > { %2579 = vmatpush.bf16.msra.mxu3 %v4666_v40  ;;  %v4623_v40 = vld [vmem:[#allocation10 + $0x88] sm:$0xf0]  ;;  %v4734_v60 = vor.u32 %v5388_v55, %v4733_v53 }
 0x58a   : > { %v4719_v55 = vld [vmem:[#allocation11 + $0x48] sm:$0xf0] }
 0x58b   : > { %2549 = vmatpush.bf16.msrb.mxu1 %v4678_v58  ;;  %2537 = vmatpush.bf16.msra.mxu0 %v4598_v2  ;;  %v4655_v58 = vld [vmem:[#allocation10 + $0xc8] sm:$0xf0] }
 0x58c   : > { %2565 = vmatpush.bf16.msrb.mxu2 %v4602_v54  ;;  %v4658_v59 = vor.u32 %v5367_v56, %v4655_v58  ;;  %v4650_v54 = vor.u32 %v5365_v38, %v4647_v4  ;;  %v4735_v58 = vld [vmem:[#allocation11 + $0x68] sm:$0xf0]  ;;  %v5386_v38 = vld [vmem:[#allocation11 + $0x54] sm:$0xf0]  ;;  %v4727_v4 = vld [vmem:[#allocation11 + $0x58] sm:$0xf0] }
 0x58e   : > { %2580 = vmatpush.bf16.msra.mxu3 %v4658_v59  ;;  %v4805_v59 = vld [vmem:[#allocation11 + $0xf0] sm:$0xf] }
 0x58f   : > { %2550 = vmatpush.bf16.msrb.mxu1 %v4670_v1  ;;  %2538 = vmatpush.bf16.msra.mxu0 %v4590_v8  ;;  %v4645_v1 = vld [vmem:[#allocation10 + $0xb0] sm:$0xf]  ;;  %v4567_v8 = vld [vmem:[#allocation10 + $0x18] sm:$0xf0] }
 0x590   : > { %2566 = vmatpush.bf16.msrb.mxu2 %v4594_v9  ;;  %v4646_v2 = vor.u32 %v5366_v10, %v4645_v1  ;;  %v4570_v9 = vor.u32 %v5345_v7, %v4567_v8  ;;  %v4725_v10 = vld [vmem:[#allocation11 + $0x50] sm:$0xf] }
 0x591   : > { %v4726_v5 = vor.u32 %v5386_v38, %v4725_v10  ;;  %v4711_v10 = vld [vmem:[#allocation11 + $0x38] sm:$0xf0] }
 0x592   : > { %2581 = vmatpush.bf16.msra.mxu3 %v4650_v54  ;;  %v2109_v54 = vld [vmem:[%s6733_s26] sm:$0x3] }
 0x593   : > { %2551 = vmatpush.bf16.msrb.mxu1 %v4662_v37  ;;  %2539 = vmatpush.bf16.msra.mxu0 %v4582_v26  ;;  %v5359_v37 = vld [vmem:[#allocation10 + $0x84] sm:$0xf]  ;;  %v5389_v26 = vld [vmem:[#allocation11 + $0x74] sm:$0xf]  ;;  %v2111_v8 = vperm.slane %v2109_v54, 0 }
 0x594   : > { %2567 = vmatpush.bf16.msrb.mxu2 %v4586_v52  ;;  %v4626_v43 = vor.u32 %v5359_v37, %v4623_v40  ;;  %v4743_v52 = vld [vmem:[#allocation11 + $0x78] sm:$0xf0]  ;;  %v4797_v37 = vld [vmem:[#allocation11 + $0xe0] sm:$0xf]  ;;  %v5403_v40 = vld [vmem:[#allocation11 + $0xe4] sm:$0xf] }
 0x595   : > { %v4746_v56 = vor.u32 %v5389_v26, %v4743_v52  ;;  %v4802_v45 = vor.u32 %v5403_v40, %v4799_v42  ;;  %v4717_v26 = vld [vmem:[#allocation11 + $0x40] sm:$0xf]  ;;  %v5383_v52 = vld [vmem:[#allocation11 + $0x44] sm:$0xf]  ;;  %v5376_v40 = vld [vmem:[#allocation11 + $0x4] sm:$0xf0] }
 0x597   : > { %2552 = vmatpush.bf16.msrb.mxu1 %v4654_v44  ;;  %2540 = vmatpush.bf16.msra.mxu0 %v4574_v62  ;;  %v5387_v44 = vld [vmem:[#allocation11 + $0x64] sm:$0xf]  ;;  %v4807_v62 = vld [vmem:[#allocation11 + $0xf8] sm:$0xf0] }
 0x598   : > { %2568 = vmatpush.bf16.msrb.mxu2 %v4578_v0  ;;  %v4738_v63 = vor.u32 %v5387_v44, %v4735_v58  ;;  %v4806_v0 = vor.u32 %v5406_v61, %v4805_v59  ;;  %v4810_v1 = vor.u32 %v5405_v57, %v4807_v62  ;;  %v5402_v44 = vld [vmem:[#allocation11 + $0xd4] sm:$0xf0]  ;;  %v4722_v58 = vor.u32 %v5383_v52, %v4719_v55  ;;  %v4791_v61 = vld [vmem:[#allocation11 + $0xd8] sm:$0xf0]  ;;  %v4709_v62 = vld [vmem:[#allocation11 + $0x30] sm:$0xf] }
 0x599   : > { %v5394_v52 = vld [vmem:[#allocation11 + $0x94] sm:$0xf0] }
 0x59b   : > { %2553 = vmatpush.bf16.msrb.mxu1 %v4646_v2  ;;  %2541 = vmatpush.bf16.msra.mxu0 %v4566_v41  ;;  %v5385_v2 = vld [vmem:[#allocation11 + $0x54] sm:$0xf] }
 0x59c   : > { %2569 = vmatpush.bf16.msrb.mxu2 %v4570_v9  ;;  %v4730_v41 = vor.u32 %v5385_v2, %v4727_v4  ;;  %v4781_v2 = vld [vmem:[#allocation11 + $0xc0] sm:$0xf]  ;;  %v5400_v4 = vld [vmem:[#allocation11 + $0xc4] sm:$0xf0] }
 0x603   : > { %v2052_v11 = vpop.f32.mrf.mxu2  ;;  %v2066_v13 = vpop.f32.mrf.mxu3 }
 0x604   : > { %v2053_v3 = vadd.f32 %v2052_v11, %v1959_v14  ;;  %v2067_v17 = vadd.f32 %v2066_v13, %v1960_v16  ;;  %v5364_v11 = vld [vmem:[#allocation10 + $0xa4] sm:$0xf0]  ;;  %v5363_v13 = vld [vmem:[#allocation10 + $0xa4] sm:$0xf] }
 0x606   : > { %v2071_v12 = vmax.f32 %v2053_v3, 0.0  ;;  %v2072_v23 = vmax.f32 %v2067_v17, 0.0  ;;  %v4557_v17 = vld [vmem:[#allocation10] sm:$0xf] }
 0x60b   : > { %v2054_v18 = vpop.f32.mrf.mxu2  ;;  %v2068_v20 = vpop.f32.mrf.mxu3 }
 0x60c   : > { %v2055_v21 = vadd.f32 %v2054_v18, %v1959_v14  ;;  %v2069_v22 = vadd.f32 %v2068_v20, %v1960_v16  ;;  %v4638_v14 = vor.u32 %v5364_v11, %v4637_v35  ;;  %v4639_v16 = vld [vmem:[#allocation10 + $0xa8] sm:$0xf0]  ;;  %v5344_v18 = vld [vmem:[#allocation10 + $0x4] sm:$0xf0]  ;;  %v5343_v20 = vld [vmem:[#allocation10 + $0x4] sm:$0xf] }
 0x60d   : > { %v4642_v3 = vor.u32 %v5363_v13, %v4639_v16  ;;  %v2112_v13 = vperm.slane %v2109_v54, 1  ;;  %v4782_v54 = vor.u32 %v5400_v4, %v4781_v2  ;;  %v4861_v2 = vld [vmem:[#allocation13 + $0x60] sm:$0xf]  ;;  %v5420_v4 = vld [vmem:[#allocation13 + $0x64] sm:$0xf0] }
 0x60e   : > { %v2073_v31 = vmax.f32 %v2055_v21, 0.0  ;;  %v2074_v32 = vmax.f32 %v2069_v22, 0.0  ;;  %2554 = vmatpush.bf16.msrb.mxu1 %v4638_v14  ;;  %v4558_v21 = vor.u32 %v5344_v18, %v4557_v17  ;;  %v4559_v22 = vld [vmem:[#allocation10 + $0x8] sm:$0xf0] }
 0x60f   : > { %2582 = vmatpush.bf16.msra.mxu3 %v4642_v3 }
 0x610   : > { %v2075_v33 = vpack.c.bf16 %v2073_v31, %v2071_v12  ;;  %v2076_v15 = vpack.c.bf16 %v2074_v32, %v2072_v23  ;;  %v4562_v12 = vor.u32 %v5343_v20, %v4559_v22  ;;  %v4629_v23 = vld [vmem:[#allocation10 + $0x90] sm:$0xf]  ;;  %v5362_v31 = vld [vmem:[#allocation10 + $0x94] sm:$0xf0]  ;;  %v5361_v32 = vld [vmem:[#allocation10 + $0x94] sm:$0xf]  ;;  %2542 = vmatpush.bf16.msra.mxu0 %v4558_v21 }
 0x612   : > { %2283 = vmatmul.bf16.vlgmr.msrb.gmra.mxu0 %v2075_v33  ;;  %2297 = vmatmul.bf16.vlgmr.msra.gmra.mxu1 %v2076_v15 }
 0x613   : > { %2311 = vmatmul.bf16.vlgmr.msra.gmra.mxu2 %v2075_v33  ;;  %2325 = vmatmul.bf16.vlgmr.msrb.gmra.mxu3 %v2076_v15  ;;  %v4630_v33 = vor.u32 %v5362_v31, %v4629_v23  ;;  %v4631_v15 = vld [vmem:[#allocation10 + $0x98] sm:$0xf0] }
 0x614   : > { %2570 = vmatpush.bf16.msrb.mxu2 %v4562_v12  ;;  %v4634_v34 = vor.u32 %v5361_v32, %v4631_v15  ;;  %2795 = vmatpush.bf16.msrb.mxu0 %v4742_v51  ;;  %v5384_v51 = vld [vmem:[#allocation11 + $0x44] sm:$0xf0] }
 0x615   : > { %2555 = vmatpush.bf16.msrb.mxu1 %v4630_v33  ;;  %v4718_v53 = vor.u32 %v5384_v51, %v4717_v26  ;;  %v4757_v51 = vld [vmem:[#allocation11 + $0x90] sm:$0xf] }
 0x616   : > { %2583 = vmatpush.bf16.msra.mxu3 %v4634_v34  ;;  %v4758_v55 = vor.u32 %v5394_v52, %v4757_v51 }
 0x618   : > { %2823 = vmatpush.bf16.msra.mxu2 %v4746_v56  ;;  %2796 = vmatpush.bf16.msrb.mxu0 %v4734_v60  ;;  %v4789_v56 = vld [vmem:[#allocation11 + $0xd0] sm:$0xf]  ;;  %v5401_v60 = vld [vmem:[#allocation11 + $0xd4] sm:$0xf] }
 0x619   : > { %2556 = vmatpush.bf16.msrb.mxu1 %v4622_v39  ;;  %v5404_v39 = vld [vmem:[#allocation11 + $0xe4] sm:$0xf0]  ;;  %v4790_v59 = vor.u32 %v5402_v44, %v4789_v56  ;;  %v4794_v57 = vor.u32 %v5401_v60, %v4791_v61  ;;  %v4759_v56 = vld [vmem:[#allocation11 + $0x98] sm:$0xf0]  ;;  %v5391_v60 = vld [vmem:[#allocation11 + $0x84] sm:$0xf] }
 0x61a   : > { %2584 = vmatpush.bf16.msra.mxu3 %v4626_v43  ;;  %v4798_v43 = vor.u32 %v5404_v39, %v4797_v37  ;;  %v4685_v39 = vld [vmem:[#allocation11] sm:$0xf] }
 0x61b   : > { %v4686_v42 = vor.u32 %v5376_v40, %v4685_v39 }
 0x61c   : > { %2824 = vmatpush.bf16.msra.mxu2 %v4738_v63  ;;  %2797 = vmatpush.bf16.msrb.mxu0 %v4726_v5  ;;  %v5382_v63 = vld [vmem:[#allocation11 + $0x34] sm:$0xf0]  ;;  %v5399_v5 = vld [vmem:[#allocation11 + $0xc4] sm:$0xf] }
 0x61d   : > { %2809 = vmatpush.bf16.msra.mxu1 %v4806_v0  ;;  %v5381_v0 = vld [vmem:[#allocation11 + $0x34] sm:$0xf] }
 0x61e   : > { %2837 = vmatpush.bf16.msrb.mxu3 %v4810_v1  ;;  %v4710_v1 = vor.u32 %v5382_v63, %v4709_v62  ;;  %v4714_v38 = vor.u32 %v5381_v0, %v4711_v10  ;;  %v4869_v63 = vld [vmem:[#allocation13 + $0x70] sm:$0xf]  ;;  %v5422_v0 = vld [vmem:[#allocation13 + $0x74] sm:$0xf0] }
 0x61f   : > { %v4870_v10 = vor.u32 %v5422_v0, %v4869_v63  ;;  %v4927_v63 = vld [vmem:[#allocation13 + $0xe8] sm:$0xf0] }
 0x620   : > { %2825 = vmatpush.bf16.msra.mxu2 %v4730_v41  ;;  %2798 = vmatpush.bf16.msrb.mxu0 %v4718_v53  ;;  %v4701_v41 = vld [vmem:[#allocation11 + $0x20] sm:$0xf]  ;;  %v5393_v53 = vld [vmem:[#allocation11 + $0x94] sm:$0xf] }
 0x621   : > { %2810 = vmatpush.bf16.msra.mxu1 %v4798_v43  ;;  %v5375_v43 = vld [vmem:[#allocation11 + $0x4] sm:$0xf]  ;;  %v4762_v44 = vor.u32 %v5393_v53, %v4759_v56 }
 0x622   : > { %2838 = vmatpush.bf16.msrb.mxu3 %v4802_v45  ;;  %v4687_v45 = vld [vmem:[#allocation11 + $0x8] sm:$0xf0] }
 0x623   : > { %v4690_v26 = vor.u32 %v5375_v43, %v4687_v45 }
 0x624   : > { %2826 = vmatpush.bf16.msra.mxu2 %v4722_v58  ;;  %2799 = vmatpush.bf16.msrb.mxu0 %v4710_v1  ;;  %v4749_v58 = vld [vmem:[#allocation11 + $0x80] sm:$0xf]  ;;  %v5421_v1 = vld [vmem:[#allocation13 + $0x74] sm:$0xf] }
 0x625   : > { %2811 = vmatpush.bf16.msra.mxu1 %v4790_v59  ;;  %v5392_v59 = vld [vmem:[#allocation11 + $0x84] sm:$0xf0] }
 0x626   : > { %2839 = vmatpush.bf16.msrb.mxu3 %v4794_v57  ;;  %v4750_v61 = vor.u32 %v5392_v59, %v4749_v58  ;;  %v4751_v57 = vld [vmem:[#allocation11 + $0x88] sm:$0xf0] }
 0x627   : > { %v4754_v62 = vor.u32 %v5391_v60, %v4751_v57  ;;  %v4925_v60 = vld [vmem:[#allocation13 + $0xe0] sm:$0xf]  ;;  %v5435_v57 = vld [vmem:[#allocation13 + $0xe4] sm:$0xf] }
 0x628   : > { %2827 = vmatpush.bf16.msra.mxu2 %v4714_v38  ;;  %v4871_v38 = vld [vmem:[#allocation13 + $0x78] sm:$0xf0]  ;;  %v4930_v0 = vor.u32 %v5435_v57, %v4927_v63  ;;  %v5408_v57 = vld [vmem:[#allocation13 + $0x4] sm:$0xf0] }
 0x629   : > { %2812 = vmatpush.bf16.msra.mxu1 %v4782_v54  ;;  %v4874_v54 = vor.u32 %v5421_v1, %v4871_v38  ;;  %v4845_v1 = vld [vmem:[#allocation13 + $0x40] sm:$0xf]  ;;  %v5415_v38 = vld [vmem:[#allocation13 + $0x44] sm:$0xf] }
 0x68f   : > { %v2284_v6 = vpop.f32.mrf.mxu0  ;;  %v2298_v7 = vpop.f32.mrf.mxu1 }
 0x690   : > { %v2285_v9 = vadd.f32 %v2284_v6, %v2111_v8  ;;  %v4783_v6 = vld [vmem:[#allocation11 + $0xc8] sm:$0xf0] }
 0x692   : > { %v2299_v16 = vadd.f32 %v2298_v7, %v2285_v9  ;;  %v4786_v7 = vor.u32 %v5399_v5, %v4783_v6  ;;  %v5379_v9 = vld [vmem:[#allocation11 + $0x24] sm:$0xf]  ;;  %v4863_v6 = vld [vmem:[#allocation13 + $0x68] sm:$0xf0] }
 0x693   : > { %v5419_v5 = vld [vmem:[#allocation13 + $0x64] sm:$0xf] }
 0x694   : > { %v2331_v21 = vmax.f32 %v2299_v16, 0.0  ;;  %2840 = vmatpush.bf16.msrb.mxu3 %v4786_v7  ;;  %v5398_v16 = vld [vmem:[#allocation11 + $0xb4] sm:$0xf0]  ;;  %v4933_v7 = vld [vmem:[#allocation13 + $0xf0] sm:$0xf] }
 0x696   : > { %v2312_v35 = vpop.f32.mrf.mxu2  ;;  %v2326_v11 = vpop.f32.mrf.mxu3 }
 0x697   : > { %v2286_v14 = vpop.f32.mrf.mxu0  ;;  %v2300_v17 = vpop.f32.mrf.mxu1  ;;  %v2313_v20 = vadd.f32 %v2312_v35, %v2112_v13 }
 0x698   : > { %v2287_v3 = vadd.f32 %v2286_v14, %v2111_v8  ;;  %v5380_v8 = vld [vmem:[#allocation11 + $0x24] sm:$0xf0]  ;;  %v4773_v14 = vld [vmem:[#allocation11 + $0xb0] sm:$0xf] }
 0x699   : > { %v2327_v31 = vadd.f32 %v2326_v11, %v2313_v20  ;;  %v4702_v35 = vor.u32 %v5380_v8, %v4701_v41  ;;  %v4703_v11 = vld [vmem:[#allocation11 + $0x28] sm:$0xf0]  ;;  %v4862_v41 = vor.u32 %v5420_v4, %v4861_v2  ;;  %v5438_v8 = vld [vmem:[#allocation13 + $0xf4] sm:$0xf0] }
 0x69a   : > { %v2301_v18 = vadd.f32 %v2300_v17, %v2287_v3  ;;  %v5397_v3 = vld [vmem:[#allocation11 + $0xb4] sm:$0xf]  ;;  %v4774_v17 = vor.u32 %v5398_v16, %v4773_v14  ;;  %v4853_v16 = vld [vmem:[#allocation13 + $0x50] sm:$0xf]  ;;  %v4847_v4 = vld [vmem:[#allocation13 + $0x48] sm:$0xf0] }
 0x69b   : > { %v2332_v34 = vmax.f32 %v2327_v31, 0.0  ;;  %2800 = vmatpush.bf16.msrb.mxu0 %v4702_v35  ;;  %v4695_v31 = vld [vmem:[#allocation11 + $0x18] sm:$0xf0] }
 0x69c   : > { %v2333_v22 = vmax.f32 %v2301_v18, 0.0  ;;  %v4775_v18 = vld [vmem:[#allocation11 + $0xb8] sm:$0xf0]  ;;  %2813 = vmatpush.bf16.msra.mxu1 %v4774_v17 }
 0x69d   : > { %v4778_v20 = vor.u32 %v5397_v3, %v4775_v18  ;;  %v4935_v35 = vld [vmem:[#allocation13 + $0xf8] sm:$0xf0]  ;;  %v5418_v3 = vld [vmem:[#allocation13 + $0x54] sm:$0xf0]  ;;  %v5417_v18 = vld [vmem:[#allocation13 + $0x54] sm:$0xf] }
 0x69e   : > { %v2335_v12 = vpack.c.bf16 %v2333_v22, %v2331_v21  ;;  %v2314_v23 = vpop.f32.mrf.mxu2  ;;  %v2328_v33 = vpop.f32.mrf.mxu3  ;;  %v4693_v21 = vld [vmem:[#allocation11 + $0x10] sm:$0xf]  ;;  %v5378_v22 = vld [vmem:[#allocation11 + $0x14] sm:$0xf0] }
 0x69f   : > { %v2315_v32 = vadd.f32 %v2314_v23, %v2112_v13  ;;  %v4706_v13 = vor.u32 %v5379_v9, %v4703_v11  ;;  %v4694_v23 = vor.u32 %v5378_v22, %v4693_v21  ;;  %2841 = vmatpush.bf16.msrb.mxu3 %v4778_v20  ;;  %v5437_v9 = vld [vmem:[#allocation13 + $0xf4] sm:$0xf]  ;;  %v4866_v11 = vor.u32 %v5419_v5, %v4863_v6  ;;  %v4855_v20 = vld [vmem:[#allocation13 + $0x58] sm:$0xf0]  ;;  %v4917_v5 = vld [vmem:[#allocation13 + $0xd0] sm:$0xf] }
 0x6a0   : > { %2543 = vmatmul.bf16.vlgmr.msra.gmra.mxu0 %v2335_v12  ;;  %2571 = vmatmul.bf16.vlgmr.msrb.gmra.mxu2 %v2335_v12  ;;  %v5377_v12 = vld [vmem:[#allocation11 + $0x14] sm:$0xf]  ;;  %v4938_v14 = vor.u32 %v5437_v9, %v4935_v35  ;;  %v4854_v21 = vor.u32 %v5418_v3, %v4853_v16  ;;  %v4858_v22 = vor.u32 %v5417_v18, %v4855_v20  ;;  %v5434_v6 = vld [vmem:[#allocation13 + $0xd4] sm:$0xf0]  ;;  %v4837_v35 = vld [vmem:[#allocation13 + $0x30] sm:$0xf] }
 0x6a1   : > { %v2329_v15 = vadd.f32 %v2328_v33, %v2315_v32  ;;  %2828 = vmatpush.bf16.msra.mxu2 %v4706_v13  ;;  %v4698_v32 = vor.u32 %v5377_v12, %v4695_v31  ;;  %v4765_v33 = vld [vmem:[#allocation11 + $0xa0] sm:$0xf]  ;;  %2801 = vmatpush.bf16.msrb.mxu0 %v4694_v23  ;;  %v4934_v13 = vor.u32 %v5438_v8, %v4933_v7  ;;  %v5433_v7 = vld [vmem:[#allocation13 + $0xd4] sm:$0xf]  ;;  %v4919_v8 = vld [vmem:[#allocation13 + $0xd8] sm:$0xf0] }
 0x6a2   : > { %v2369_v12 = vld [vmem:[%s6734_s0] sm:$0x3]  ;;  %v4922_v9 = vor.u32 %v5433_v7, %v4919_v8  ;;  %v5432_v18 = vld [vmem:[#allocation13 + $0xc4] sm:$0xf0] }
 0x6a3   : > { %v2334_v19 = vmax.f32 %v2329_v15, 0.0  ;;  %v5396_v15 = vld [vmem:[#allocation11 + $0xa4] sm:$0xf0]  ;;  %v4839_v16 = vld [vmem:[#allocation13 + $0x38] sm:$0xf0] }
 0x6a4   : > { %v5424_v7 = vld [vmem:[#allocation13 + $0x84] sm:$0xf0] }
 0x6a5   : > { %v2336_v36 = vpack.c.bf16 %v2334_v19, %v2332_v34  ;;  %v5395_v34 = vld [vmem:[#allocation11 + $0xa4] sm:$0xf]  ;;  %v4766_v19 = vor.u32 %v5396_v15, %v4765_v33  ;;  %2829 = vmatpush.bf16.msra.mxu2 %v4698_v32  ;;  %2802 = vmatpush.bf16.msrb.mxu0 %v4686_v42  ;;  %v2371_v32 = vperm.slane %v2369_v12, 0 }
 0x6a7   : > { %2557 = vmatmul.bf16.vlgmr.msrb.gmra.mxu1 %v2336_v36  ;;  %2585 = vmatmul.bf16.vlgmr.msra.gmra.mxu3 %v2336_v36  ;;  %v4767_v36 = vld [vmem:[#allocation11 + $0xa8] sm:$0xf0] }
 0x6a8   : > { %v4770_v37 = vor.u32 %v5395_v34, %v4767_v36  ;;  %2814 = vmatpush.bf16.msra.mxu1 %v4766_v19  ;;  %v2372_v36 = vperm.slane %v2369_v12, 1 }
 0x6a9   : > { %2830 = vmatpush.bf16.msra.mxu2 %v4690_v26  ;;  %3089 = vmatpush.bf16.msra.mxu0 %v4870_v10  ;;  %v5416_v10 = vld [vmem:[#allocation13 + $0x44] sm:$0xf0] }
 0x6aa   : > { %2842 = vmatpush.bf16.msrb.mxu3 %v4770_v37  ;;  %v4846_v2 = vor.u32 %v5416_v10, %v4845_v1  ;;  %v4885_v10 = vld [vmem:[#allocation13 + $0x90] sm:$0xf] }
 0x6ac   : > { %2815 = vmatpush.bf16.msra.mxu1 %v4758_v55 }
 0x6ad   : > { %3117 = vmatpush.bf16.msrb.mxu2 %v4874_v54  ;;  %3090 = vmatpush.bf16.msra.mxu0 %v4862_v41  ;;  %v4850_v54 = vor.u32 %v5415_v38, %v4847_v4  ;;  %v4918_v41 = vor.u32 %v5434_v6, %v4917_v5  ;;  %v5426_v38 = vld [vmem:[#allocation13 + $0x94] sm:$0xf0]  ;;  %v4877_v6 = vld [vmem:[#allocation13 + $0x80] sm:$0xf] }
 0x6ae   : > { %2843 = vmatpush.bf16.msrb.mxu3 %v4762_v44  ;;  %v4886_v4 = vor.u32 %v5426_v38, %v4885_v10  ;;  %v4878_v8 = vor.u32 %v5424_v7, %v4877_v6  ;;  %v5063_v10 = vld [vmem:[#allocation14 + $0xf8] sm:$0xf0]  ;;  %v5053_v7 = vld [vmem:[#allocation14 + $0xe0] sm:$0xf] }
 0x6af   : > { %v4983_v6 = vld [vmem:[#allocation14 + $0x58] sm:$0xf0] }
 0x6b0   : > { %2816 = vmatpush.bf16.msra.mxu1 %v4750_v61  ;;  %v5436_v61 = vld [vmem:[#allocation13 + $0xe4] sm:$0xf0] }
 0x6b1   : > { %3118 = vmatpush.bf16.msrb.mxu2 %v4866_v11  ;;  %3091 = vmatpush.bf16.msra.mxu0 %v4854_v21  ;;  %v5414_v11 = vld [vmem:[#allocation13 + $0x34] sm:$0xf0]  ;;  %v5431_v21 = vld [vmem:[#allocation13 + $0xc4] sm:$0xf] }
 0x6b2   : > { %2844 = vmatpush.bf16.msrb.mxu3 %v4754_v62  ;;  %v4926_v62 = vor.u32 %v5436_v61, %v4925_v60  ;;  %v4813_v61 = vld [vmem:[#allocation13] sm:$0xf] }
 0x6b3   : > { %v4814_v63 = vor.u32 %v5408_v57, %v4813_v61 }
 0x6b4   : > { %3103 = vmatpush.bf16.msrb.mxu1 %v4934_v13  ;;  %v5413_v13 = vld [vmem:[#allocation13 + $0x34] sm:$0xf] }
 0x6b5   : > { %3119 = vmatpush.bf16.msrb.mxu2 %v4858_v22  ;;  %3092 = vmatpush.bf16.msra.mxu0 %v4846_v2  ;;  %v4842_v3 = vor.u32 %v5413_v13, %v4839_v16  ;;  %v4911_v22 = vld [vmem:[#allocation13 + $0xc8] sm:$0xf0]  ;;  %v5425_v2 = vld [vmem:[#allocation13 + $0x94] sm:$0xf]  ;;  %v5454_v13 = vld [vmem:[#allocation14 + $0x74] sm:$0xf0] }
 0x6b6   : > { %3131 = vmatpush.bf16.msra.mxu3 %v4938_v14  ;;  %v4838_v14 = vor.u32 %v5414_v11, %v4837_v35  ;;  %v4914_v12 = vor.u32 %v5431_v21, %v4911_v22  ;;  %v4997_v11 = vld [vmem:[#allocation14 + $0x70] sm:$0xf]  ;;  %v5451_v21 = vld [vmem:[#allocation14 + $0x64] sm:$0xf]  ;;  %v4991_v22 = vld [vmem:[#allocation14 + $0x68] sm:$0xf0] }
 0x6b7   : > { %v4998_v16 = vor.u32 %v5454_v13, %v4997_v11  ;;  %v5055_v11 = vld [vmem:[#allocation14 + $0xe8] sm:$0xf0] }
 0x6b8   : > { %3104 = vmatpush.bf16.msrb.mxu1 %v4926_v62  ;;  %v5407_v62 = vld [vmem:[#allocation13 + $0x4] sm:$0xf] }
 0x6b9   : > { %3120 = vmatpush.bf16.msrb.mxu2 %v4850_v54  ;;  %3093 = vmatpush.bf16.msra.mxu0 %v4838_v14  ;;  %v4887_v54 = vld [vmem:[#allocation13 + $0x98] sm:$0xf0]  ;;  %v5453_v14 = vld [vmem:[#allocation14 + $0x74] sm:$0xf] }
 0x6ba   : > { %3132 = vmatpush.bf16.msra.mxu3 %v4930_v0  ;;  %v4815_v0 = vld [vmem:[#allocation13 + $0x8] sm:$0xf0]  ;;  %v4890_v5 = vor.u32 %v5425_v2, %v4887_v54  ;;  %v4981_v2 = vld [vmem:[#allocation14 + $0x50] sm:$0xf]  ;;  %v5449_v54 = vld [vmem:[#allocation14 + $0x54] sm:$0xf] }
 0x6bb   : > { %v4818_v1 = vor.u32 %v5407_v62, %v4815_v0  ;;  %v5061_v62 = vld [vmem:[#allocation14 + $0xf0] sm:$0xf]  ;;  %v5469_v0 = vld [vmem:[#allocation14 + $0xf4] sm:$0xf] }
 0x6bc   : > { %3105 = vmatpush.bf16.msrb.mxu1 %v4918_v41  ;;  %v5423_v41 = vld [vmem:[#allocation13 + $0x84] sm:$0xf]  ;;  %v5066_v38 = vor.u32 %v5469_v0, %v5063_v10  ;;  %v5442_v0 = vld [vmem:[#allocation14 + $0x14] sm:$0xf0]  ;;  %v5441_v10 = vld [vmem:[#allocation14 + $0x14] sm:$0xf] }
 0x6bd   : > { %3121 = vmatpush.bf16.msrb.mxu2 %v4842_v3  ;;  %v4999_v3 = vld [vmem:[#allocation14 + $0x78] sm:$0xf0] }
 0x6be   : > { %3133 = vmatpush.bf16.msra.mxu3 %v4922_v9  ;;  %v4879_v9 = vld [vmem:[#allocation13 + $0x88] sm:$0xf0] }
 0x6bf   : > { %v4882_v35 = vor.u32 %v5423_v41, %v4879_v9  ;;  %v5468_v41 = vld [vmem:[#allocation14 + $0xe4] sm:$0xf0] }
 0x6c0   : > { %v5054_v9 = vor.u32 %v5468_v41, %v5053_v7  ;;  %v5023_v7 = vld [vmem:[#allocation14 + $0xa8] sm:$0xf0] }
 0x6c2   : > { %3134 = vmatpush.bf16.msra.mxu3 %v4914_v12 }
 0x71d   : > { %v2544_v17 = vpop.f32.mrf.mxu0 }
 0x71e   : > { %v2545_v15 = vadd.f32 %v2544_v17, %v2371_v32  ;;  %v4909_v17 = vld [vmem:[#allocation13 + $0xc0] sm:$0xf] }
 0x71f   : > { %v4910_v20 = vor.u32 %v5432_v18, %v4909_v17  ;;  %v4989_v17 = vld [vmem:[#allocation14 + $0x60] sm:$0xf]  ;;  %v5452_v18 = vld [vmem:[#allocation14 + $0x64] sm:$0xf0] }
 0x720   : > { %v4990_v12 = vor.u32 %v5452_v18, %v4989_v17  ;;  %v4975_v18 = vld [vmem:[#allocation14 + $0x48] sm:$0xf0] }
 0x721   : > { %3106 = vmatpush.bf16.msrb.mxu1 %v4910_v20  ;;  %v5002_v20 = vor.u32 %v5453_v14, %v4999_v3  ;;  %v4973_v14 = vld [vmem:[#allocation14 + $0x40] sm:$0xf]  ;;  %v5447_v3 = vld [vmem:[#allocation14 + $0x44] sm:$0xf] }
 0x723   : > { %v2572_v31 = vpop.f32.mrf.mxu2 }
 0x724   : > { %v2558_v23 = vpop.f32.mrf.mxu1  ;;  %v2573_v45 = vadd.f32 %v2572_v31, %v2372_v36  ;;  %v5412_v31 = vld [vmem:[#allocation13 + $0x24] sm:$0xf0] }
 0x725   : > { %v2546_v33 = vpop.f32.mrf.mxu0  ;;  %v2559_v19 = vadd.f32 %v2558_v23, %v2545_v15  ;;  %v4829_v23 = vld [vmem:[#allocation13 + $0x20] sm:$0xf]  ;;  %v4831_v15 = vld [vmem:[#allocation13 + $0x28] sm:$0xf0] }
 0x726   : > { %v2547_v37 = vadd.f32 %v2546_v33, %v2371_v32  ;;  %v5411_v32 = vld [vmem:[#allocation13 + $0x24] sm:$0xf]  ;;  %v4830_v33 = vor.u32 %v5412_v31, %v4829_v23  ;;  %v4994_v23 = vor.u32 %v5451_v21, %v4991_v22  ;;  %v5045_v21 = vld [vmem:[#allocation14 + $0xd0] sm:$0xf]  ;;  %v5466_v22 = vld [vmem:[#allocation14 + $0xd4] sm:$0xf0] }
 0x727   : > { %v2591_v42 = vmax.f32 %v2559_v19, 0.0  ;;  %v4901_v19 = vld [vmem:[#allocation13 + $0xb0] sm:$0xf] }
 0x728   : > { %3094 = vmatpush.bf16.msra.mxu0 %v4830_v33 }
 0x72a   : > { %v2586_v34 = vpop.f32.mrf.mxu3 }
 0x72b   : > { %v2574_v43 = vpop.f32.mrf.mxu2  ;;  %v2587_v51 = vadd.f32 %v2586_v34, %v2573_v45  ;;  %v4834_v34 = vor.u32 %v5411_v32, %v4831_v15  ;;  %v5410_v45 = vld [vmem:[#allocation13 + $0x14] sm:$0xf0]  ;;  %v2629_v32 = vld [vmem:[%s6735_s10] sm:$0x3] }
 0x72c   : > { %v2560_v39 = vpop.f32.mrf.mxu1  ;;  %v2575_v53 = vadd.f32 %v2574_v43, %v2372_v36  ;;  %v5430_v36 = vld [vmem:[#allocation13 + $0xb4] sm:$0xf0] }
 0x72d   : > { %v2561_v40 = vadd.f32 %v2560_v39, %v2547_v37  ;;  %v2592_v44 = vmax.f32 %v2587_v51, 0.0  ;;  %v5429_v37 = vld [vmem:[#allocation13 + $0xb4] sm:$0xf]  ;;  %v4902_v39 = vor.u32 %v5430_v36, %v4901_v19  ;;  %3122 = vmatpush.bf16.msrb.mxu2 %v4834_v34  ;;  %v2631_v34 = vperm.slane %v2629_v32, 0 }
 0x72f   : > { %v2593_v26 = vmax.f32 %v2561_v40, 0.0  ;;  %v4903_v40 = vld [vmem:[#allocation13 + $0xb8] sm:$0xf0]  ;;  %3107 = vmatpush.bf16.msrb.mxu1 %v4902_v39 }
 0x730   : > { %v4906_v43 = vor.u32 %v5429_v37, %v4903_v40  ;;  %v2632_v40 = vperm.slane %v2629_v32, 1 }
 0x731   : > { %v2595_v52 = vpack.c.bf16 %v2593_v26, %v2591_v42  ;;  %v4821_v42 = vld [vmem:[#allocation13 + $0x10] sm:$0xf]  ;;  %v5409_v26 = vld [vmem:[#allocation13 + $0x14] sm:$0xf] }
 0x732   : > { %v2588_v55 = vpop.f32.mrf.mxu3  ;;  %v4822_v51 = vor.u32 %v5410_v45, %v4821_v42  ;;  %3135 = vmatpush.bf16.msra.mxu3 %v4906_v43 }
 0x733   : > { %v2589_v56 = vadd.f32 %v2588_v55, %v2575_v53  ;;  %2803 = vmatmul.bf16.vlgmr.msrb.gmra.mxu0 %v2595_v52  ;;  %2831 = vmatmul.bf16.vlgmr.msra.gmra.mxu2 %v2595_v52  ;;  %v4823_v52 = vld [vmem:[#allocation13 + $0x18] sm:$0xf0]  ;;  %v4893_v55 = vld [vmem:[#allocation13 + $0xa0] sm:$0xf] }
 0x734   : > { %v4826_v53 = vor.u32 %v5409_v26, %v4823_v52  ;;  %3095 = vmatpush.bf16.msra.mxu0 %v4822_v51 }
 0x735   : > { %v2594_v58 = vmax.f32 %v2589_v56, 0.0  ;;  %v5428_v56 = vld [vmem:[#allocation13 + $0xa4] sm:$0xf0] }
 0x736   : > { %3123 = vmatpush.bf16.msrb.mxu2 %v4826_v53 }
 0x737   : > { %v2596_v59 = vpack.c.bf16 %v2594_v58, %v2592_v44  ;;  %v5427_v44 = vld [vmem:[#allocation13 + $0xa4] sm:$0xf]  ;;  %v4894_v58 = vor.u32 %v5428_v56, %v4893_v55 }
 0x738   : > { %3096 = vmatpush.bf16.msra.mxu0 %v4814_v63  ;;  %v5470_v63 = vld [vmem:[#allocation14 + $0xf4] sm:$0xf0] }
 0x739   : > { %2817 = vmatmul.bf16.vlgmr.msra.gmra.mxu1 %v2596_v59  ;;  %2845 = vmatmul.bf16.vlgmr.msrb.gmra.mxu3 %v2596_v59  ;;  %v4895_v59 = vld [vmem:[#allocation13 + $0xa8] sm:$0xf0] }
 0x73a   : > { %v4898_v60 = vor.u32 %v5427_v44, %v4895_v59  ;;  %3108 = vmatpush.bf16.msrb.mxu1 %v4894_v58  ;;  %3124 = vmatpush.bf16.msrb.mxu2 %v4818_v1  ;;  %v5062_v1 = vor.u32 %v5470_v63, %v5061_v62  ;;  %v4949_v63 = vld [vmem:[#allocation14 + $0x10] sm:$0xf] }
 0x73c   : > { %3136 = vmatpush.bf16.msra.mxu3 %v4898_v60  ;;  %3363 = vmatpush.bf16.msrb.mxu0 %v4998_v16  ;;  %v5448_v16 = vld [vmem:[#allocation14 + $0x44] sm:$0xf0] }
 0x73d   : > { %v4974_v17 = vor.u32 %v5448_v16, %v4973_v14  ;;  %v5013_v16 = vld [vmem:[#allocation14 + $0x90] sm:$0xf] }
 0x73e   : > { %3109 = vmatpush.bf16.msrb.mxu1 %v4886_v4  ;;  %3391 = vmatpush.bf16.msra.mxu2 %v5002_v20  ;;  %v5450_v4 = vld [vmem:[#allocation14 + $0x54] sm:$0xf0]  ;;  %v4978_v20 = vor.u32 %v5447_v3, %v4975_v18 }
 0x73f   : > { %v5458_v3 = vld [vmem:[#allocation14 + $0x94] sm:$0xf0] }
 0x740   : > { %3137 = vmatpush.bf16.msra.mxu3 %v4890_v5  ;;  %3364 = vmatpush.bf16.msrb.mxu0 %v4990_v12  ;;  %v4982_v5 = vor.u32 %v5450_v4, %v4981_v2  ;;  %v5465_v12 = vld [vmem:[#allocation14 + $0xd4] sm:$0xf]  ;;  %v5021_v4 = vld [vmem:[#allocation14 + $0xa0] sm:$0xf]  ;;  %v5014_v18 = vor.u32 %v5458_v3, %v5013_v16 }
 0x741   : > { %v5501_v3 = vld [vmem:[#allocation16 + $0xf4] sm:$0xf] }
 0x742   : > { %3110 = vmatpush.bf16.msrb.mxu1 %v4878_v8  ;;  %3392 = vmatpush.bf16.msra.mxu2 %v4994_v23  ;;  %v4986_v8 = vor.u32 %v5449_v54, %v4983_v6  ;;  %v5046_v23 = vor.u32 %v5466_v22, %v5045_v21  ;;  %v5460_v54 = vld [vmem:[#allocation14 + $0xa4] sm:$0xf0]  ;;  %v5005_v22 = vld [vmem:[#allocation14 + $0x80] sm:$0xf] }
 0x743   : > { %v5022_v6 = vor.u32 %v5460_v54, %v5021_v4 }
 0x744   : > { %3138 = vmatpush.bf16.msra.mxu3 %v4882_v35  ;;  %v5467_v35 = vld [vmem:[#allocation14 + $0xe4] sm:$0xf]  ;;  %3365 = vmatpush.bf16.msrb.mxu0 %v4982_v5 }
 0x745   : > { %v5058_v13 = vor.u32 %v5467_v35, %v5055_v11  ;;  %v5459_v5 = vld [vmem:[#allocation14 + $0xa4] sm:$0xf] }
 0x746   : > { %3377 = vmatpush.bf16.msra.mxu1 %v5062_v1  ;;  %3393 = vmatpush.bf16.msra.mxu2 %v4986_v8  ;;  %v4950_v1 = vor.u32 %v5442_v0, %v4949_v63  ;;  %v5026_v41 = vor.u32 %v5459_v5, %v5023_v7  ;;  %v4941_v8 = vld [vmem:[#allocation14] sm:$0xf]  ;;  %v5439_v35 = vld [vmem:[#allocation14 + $0x4] sm:$0xf] }
 0x748   : > { %3405 = vmatpush.bf16.msrb.mxu3 %v5066_v38  ;;  %3366 = vmatpush.bf16.msrb.mxu0 %v4974_v17  ;;  %v4951_v38 = vld [vmem:[#allocation14 + $0x18] sm:$0xf0]  ;;  %v5457_v17 = vld [vmem:[#allocation14 + $0x94] sm:$0xf] }
 0x749   : > { %v4954_v2 = vor.u32 %v5441_v10, %v4951_v38 }
 0x74a   : > { %3378 = vmatpush.bf16.msra.mxu1 %v5054_v9  ;;  %3394 = vmatpush.bf16.msra.mxu2 %v4978_v20  ;;  %v5440_v9 = vld [vmem:[#allocation14 + $0x4] sm:$0xf0]  ;;  %v5015_v20 = vld [vmem:[#allocation14 + $0x98] sm:$0xf0] }
 0x74b   : > { %v4942_v11 = vor.u32 %v5440_v9, %v4941_v8  ;;  %v5018_v21 = vor.u32 %v5457_v17, %v5015_v20  ;;  %v5189_v8 = vld [vmem:[#allocation16 + $0xf0] sm:$0xf]  ;;  %v5191_v17 = vld [vmem:[#allocation16 + $0xf8] sm:$0xf0]  ;;  %v5117_v20 = vld [vmem:[#allocation16 + $0x60] sm:$0xf] }
 0x74c   : > { %3406 = vmatpush.bf16.msrb.mxu3 %v5058_v13  ;;  %v4943_v13 = vld [vmem:[#allocation14 + $0x8] sm:$0xf0] }
 0x74d   : > { %v4946_v14 = vor.u32 %v5439_v35, %v4943_v13  ;;  %v5502_v35 = vld [vmem:[#allocation16 + $0xf4] sm:$0xf0]  ;;  %v5127_v13 = vld [vmem:[#allocation16 + $0x78] sm:$0xf0] }
 0x74e   : > { %3379 = vmatpush.bf16.msra.mxu1 %v5046_v23  ;;  %v5455_v23 = vld [vmem:[#allocation14 + $0x84] sm:$0xf] }
 0x7b0   : > { %v2804_v31 = vpop.f32.mrf.mxu0 }
 0x7b1   : > { %v2805_v36 = vadd.f32 %v2804_v31, %v2631_v34  ;;  %v5047_v31 = vld [vmem:[#allocation14 + $0xd8] sm:$0xf0] }
 0x7b2   : > { %v5050_v32 = vor.u32 %v5465_v12, %v5047_v31  ;;  %v5456_v12 = vld [vmem:[#allocation14 + $0x84] sm:$0xf0] }
 0x7b3   : > { %v5006_v31 = vor.u32 %v5456_v12, %v5005_v22  ;;  %v5181_v22 = vld [vmem:[#allocation16 + $0xe0] sm:$0xf] }
 0x7b4   : > { %3407 = vmatpush.bf16.msrb.mxu3 %v5050_v32  ;;  %v5007_v32 = vld [vmem:[#allocation14 + $0x88] sm:$0xf0] }
 0x7b6   : > { %v2818_v33 = vpop.f32.mrf.mxu1  ;;  %v2832_v15 = vpop.f32.mrf.mxu2 }
 0x7b7   : > { %v2819_v39 = vadd.f32 %v2818_v33, %v2805_v36  ;;  %v2833_v52 = vadd.f32 %v2832_v15, %v2632_v40  ;;  %v4965_v33 = vld [vmem:[#allocation14 + $0x30] sm:$0xf]  ;;  %v5446_v15 = vld [vmem:[#allocation14 + $0x34] sm:$0xf0]  ;;  %v4967_v36 = vld [vmem:[#allocation14 + $0x38] sm:$0xf0] }
 0x7b8   : > { %v2806_v19 = vpop.f32.mrf.mxu0 }
 0x7b9   : > { %v2807_v43 = vadd.f32 %v2806_v19, %v2631_v34  ;;  %v2851_v51 = vmax.f32 %v2819_v39, 0.0  ;;  %v5445_v34 = vld [vmem:[#allocation14 + $0x34] sm:$0xf]  ;;  %v4966_v19 = vor.u32 %v5446_v15, %v4965_v33  ;;  %v5037_v39 = vld [vmem:[#allocation14 + $0xc0] sm:$0xf]  ;;  %v5010_v33 = vor.u32 %v5455_v23, %v5007_v32 }
 0x7ba   : > { %v6142_v15 = vmov 3   ;;  %v5500_v23 = vld [vmem:[#allocation16 + $0xe4] sm:$0xf0]  ;;  %v5119_v32 = vld [vmem:[#allocation16 + $0x68] sm:$0xf0] }
 0x7bb   : > { %3367 = vmatpush.bf16.msrb.mxu0 %v4966_v19  ;;  %5707 = vset.pattern.permute.xlu2 %v6142_v15  ;;  %v5757_v19 = vld [vmem:[%s6489_s28 + $0x8] sm:$0xff] }
 0x7bc   : > { %v2846_v37 = vpop.f32.mrf.mxu3  ;;  %3757 = vperm.xlu2 %5707, %v5757_v19   ;;  %5706 = vset.pattern.permute.xlu0 %v6142_v15 }
 0x7bd   : > { %v2847_v55 = vadd.f32 %v2846_v37, %v2833_v52  ;;  %v4970_v37 = vor.u32 %v5445_v34, %v4967_v36  ;;  %v5444_v52 = vld [vmem:[#allocation14 + $0x24] sm:$0xf0]  ;;  %v6143_v34 = vmov 4   ;;  %v5758_v36 = vld [vmem:[%s6489_s28] sm:$0xff]  ;;  %s6739_s28 = sld [smem:[#allocation35_spill]] }
 0x7be   : > { %v2820_v42 = vpop.f32.mrf.mxu1  ;;  %v2834_v26 = vpop.f32.mrf.mxu2  ;;  %5709 = vset.pattern.permute.xlu1 %v6143_v34  ;;  %3753 = vperm.xlu0 %5706, %v5758_v36  }
 0x7bf   : > { %v2821_v45 = vadd.f32 %v2820_v42, %v2807_v43  ;;  %v2835_v44 = vadd.f32 %v2834_v26, %v2632_v40  ;;  %v2852_v60 = vmax.f32 %v2847_v55, 0.0  ;;  %v5464_v40 = vld [vmem:[#allocation14 + $0xc4] sm:$0xf0]  ;;  %v5463_v42 = vld [vmem:[#allocation14 + $0xc4] sm:$0xf]  ;;  %3395 = vmatpush.bf16.msra.mxu2 %v4970_v37  ;;  %3768 = vperm.xlu1 %5709, %v5757_v19  }
 0x7c0   : > { %v5038_v43 = vor.u32 %v5464_v40, %v5037_v39  ;;  %v2877_v40 = vmul.f32 %v6495_v24, %v6519_v49  ;;  %v2868_v24 = vmul.f32 %v6505_v30, %v6521_v50 }
 0x7c1   : > { %v2853_v53 = vmax.f32 %v2821_v45, 0.0  ;;  %v5039_v45 = vld [vmem:[#allocation14 + $0xc8] sm:$0xf0] }
 0x7c2   : > { %v5042_v26 = vor.u32 %v5463_v42, %v5039_v45  ;;  %3380 = vmatpush.bf16.msra.mxu1 %v5038_v43  ;;  %v2867_v43 = vmul.f32 %v6503_v29, %v6521_v50  ;;  %v3149_v45 = vld [vmem:[%s6736_s23] sm:$0x3] }
 0x7c3   : > { %v2855_v56 = vpack.c.bf16 %v2853_v53, %v2851_v51  ;;  %v4957_v51 = vld [vmem:[#allocation14 + $0x20] sm:$0xf]  ;;  %v5443_v53 = vld [vmem:[#allocation14 + $0x24] sm:$0xf] }
 0x7c4   : > { %v2848_v58 = vpop.f32.mrf.mxu3  ;;  %v4958_v55 = vor.u32 %v5444_v52, %v4957_v51  ;;  %3408 = vmatpush.bf16.msrb.mxu3 %v5042_v26  ;;  %5708 = vset.pattern.permute.xlu2 %v6143_v34  ;;  %v2881_v51 = vadd.f32 %v2877_v40, %v2867_v43  ;;  %v6144_v52 = vmov 5   ;;  %v5499_v34 = vld [vmem:[#allocation16 + $0xe4] sm:$0xf]  ;;  %v5173_v43 = vld [vmem:[#allocation16 + $0xd0] sm:$0xf] }
 0x7c5   : > { %v2849_v59 = vadd.f32 %v2848_v58, %v2835_v44  ;;  %3097 = vmatmul.bf16.vlgmr.msra.gmra.mxu0 %v2855_v56  ;;  %3125 = vmatmul.bf16.vlgmr.msrb.gmra.mxu2 %v2855_v56  ;;  %v4959_v56 = vld [vmem:[#allocation14 + $0x28] sm:$0xf0]  ;;  %v5029_v58 = vld [vmem:[#allocation14 + $0xb0] sm:$0xf] }
 0x7c6   : > { %v4962_v44 = vor.u32 %v5443_v53, %v4959_v56  ;;  %3368 = vmatpush.bf16.msrb.mxu0 %v4958_v55  ;;  %3764 = vperm.xlu2 %5708, %v5758_v36   ;;  %v2891_v53 = vmul.f32 %v6499_v27, %v6517_v48  ;;  %v2878_v56 = vmul.f32 %v6497_v25, %v6519_v49  ;;  %v3152_v49 = vperm.slane %v3149_v45, 1 }
 0x7c7   : > { %v2854_v61 = vmax.f32 %v2849_v59, 0.0  ;;  %v5462_v59 = vld [vmem:[#allocation14 + $0xb4] sm:$0xf0]  ;;  %5710 = vset.pattern.permute.xlu0 %v6144_v52  ;;  %v2892_v27 = vmul.f32 %v6501_v28, %v6517_v48 }
 0x7c8   : > { %3396 = vmatpush.bf16.msra.mxu2 %v4962_v44  ;;  %3777 = vperm.xlu0 %5710, %v5758_v36   ;;  %v3151_v44 = vperm.slane %v3149_v45, 0  ;;  %v5486_v48 = vld [vmem:[#allocation16 + $0x74] sm:$0xf0]  ;;  %v5481_v45 = vld [vmem:[#allocation16 + $0x54] sm:$0xf] }
 0x7c9   : > { %v2856_v57 = vpack.c.bf16 %v2854_v61, %v2852_v60  ;;  %v5461_v60 = vld [vmem:[#allocation14 + $0xb4] sm:$0xf]  ;;  %v5030_v61 = vor.u32 %v5462_v59, %v5029_v58 }
 0x7ca   : > { %3369 = vmatpush.bf16.msrb.mxu0 %v4950_v1 }
 0x7cb   : > { %3111 = vmatmul.bf16.vlgmr.msrb.gmra.mxu1 %v2856_v57  ;;  %3139 = vmatmul.bf16.vlgmr.msra.gmra.mxu3 %v2856_v57  ;;  %v5031_v57 = vld [vmem:[#allocation14 + $0xb8] sm:$0xf0] }
 0x7cc   : > { %v5034_v62 = vor.u32 %v5461_v60, %v5031_v57  ;;  %3381 = vmatpush.bf16.msra.mxu1 %v5030_v61  ;;  %3397 = vmatpush.bf16.msra.mxu2 %v4954_v2  ;;  %v2895_v61 = vadd.f32 %v2891_v53, %v2881_v51  ;;  %v5111_v51 = vld [vmem:[#allocation16 + $0x58] sm:$0xf0] }
 0x7cd   : > { %v5175_v53 = vld [vmem:[#allocation16 + $0xd8] sm:$0xf0] }
 0x7ce   : > { %3409 = vmatpush.bf16.msrb.mxu3 %v5034_v62  ;;  %3370 = vmatpush.bf16.msrb.mxu0 %v4942_v11  ;;  %v2882_v62 = vadd.f32 %v2878_v56, %v2868_v24  ;;  %v5485_v11 = vld [vmem:[#allocation16 + $0x74] sm:$0xf]  ;;  %v5101_v24 = vld [vmem:[#allocation16 + $0x40] sm:$0xf] }
 0x7cf   : > { %5711 = vset.pattern.permute.xlu2 %v6144_v52  ;;  %v5130_v16 = vor.u32 %v5485_v11, %v5127_v13  ;;  %v5497_v52 = vld [vmem:[#allocation16 + $0xd4] sm:$0xf]  ;;  %v5491_v11 = vld [vmem:[#allocation16 + $0xa4] sm:$0xf]  ;;  %v5151_v13 = vld [vmem:[#allocation16 + $0xa8] sm:$0xf0] }
 0x7d0   : > { %3382 = vmatpush.bf16.msra.mxu1 %v5022_v6  ;;  %3398 = vmatpush.bf16.msra.mxu2 %v4946_v14  ;;  %v2896_v38 = vadd.f32 %v2892_v27, %v2882_v62  ;;  %v5190_v14 = vor.u32 %v5502_v35, %v5189_v8  ;;  %v5178_v56 = vor.u32 %v5497_v52, %v5175_v53  ;;  %v5087_v8 = vld [vmem:[#allocation16 + $0x28] sm:$0xf0]  ;;  %v5510_v52 = vld [vmem:[#allocation17 + $0x38] sm:$0xff] }
 0x7d1   : > { %3781 = vperm.xlu2 %5711, %v5757_v19   ;;  %v5183_v19 = vld [vmem:[#allocation16 + $0xe8] sm:$0xf0]  ;;  %v3197_v53 = vld [vmem:[%s6737_s1] sm:$0x3] }
 0x7d2   : > { %3410 = vmatpush.bf16.msrb.mxu3 %v5026_v41  ;;  %v5186_v36 = vor.u32 %v5499_v34, %v5183_v19  ;;  %v5472_v34 = vld [vmem:[#allocation16 + $0x4] sm:$0xf0]  ;;  %v5133_v19 = vld [vmem:[#allocation16 + $0x80] sm:$0xf] }
 0x7d4   : > { %3383 = vmatpush.bf16.msra.mxu1 %v5014_v18  ;;  %v5194_v18 = vor.u32 %v5501_v3, %v5191_v17  ;;  %3689 = vmatpush.bf16.msrb.mxu2 %v5130_v16  ;;  %v5077_v16 = vld [vmem:[#allocation16 + $0x10] sm:$0xf]  ;;  %v5474_v3 = vld [vmem:[#allocation16 + $0x14] sm:$0xf0] }
 0x7d5   : > { %v5141_v17 = vld [vmem:[#allocation16 + $0x90] sm:$0xf] }
 0x7d6   : > { %3411 = vmatpush.bf16.msrb.mxu3 %v5018_v21  ;;  %v5484_v21 = vld [vmem:[#allocation16 + $0x64] sm:$0xf0] }
 0x7d7   : > { %v5118_v12 = vor.u32 %v5484_v21, %v5117_v20  ;;  %v5490_v20 = vld [vmem:[#allocation16 + $0x94] sm:$0xf0]  ;;  %v5473_v21 = vld [vmem:[#allocation16 + $0x14] sm:$0xf] }
 0x7d8   : > { %3384 = vmatpush.bf16.msra.mxu1 %v5006_v31  ;;  %v5483_v31 = vld [vmem:[#allocation16 + $0x64] sm:$0xf] }
 0x7d9   : > { %v5122_v15 = vor.u32 %v5483_v31, %v5119_v32  ;;  %v5489_v31 = vld [vmem:[#allocation16 + $0x94] sm:$0xf]  ;;  %v5143_v32 = vld [vmem:[#allocation16 + $0x98] sm:$0xf0] }
 0x7da   : > { %3412 = vmatpush.bf16.msrb.mxu3 %v5010_v33  ;;  %v5182_v33 = vor.u32 %v5500_v23, %v5181_v22  ;;  %v5079_v22 = vld [vmem:[#allocation16 + $0x18] sm:$0xf0] }
 0x7db   : > { %3690 = vmatpush.bf16.msrb.mxu2 %v5122_v15  ;;  %v5082_v23 = vor.u32 %v5473_v21, %v5079_v22  ;;  %v5069_v15 = vld [vmem:[#allocation16] sm:$0xf]  ;;  %v5509_v21 = vld [vmem:[#allocation17 + $0x30] sm:$0xff]  ;;  %v5518_v22 = vld [vmem:[#allocation17 + $0x78] sm:$0xff] }
 0x7dc   : > { %3675 = vmatpush.bf16.msrb.mxu1 %v5190_v14  ;;  %v5154_v14 = vor.u32 %v5491_v11, %v5151_v13 }
 0x7de   : > { %3703 = vmatpush.bf16.msra.mxu3 %v5194_v18  ;;  %v5078_v18 = vor.u32 %v5474_v3, %v5077_v16 }
 0x7e0   : > { %3676 = vmatpush.bf16.msrb.mxu1 %v5182_v33  ;;  %v5146_v33 = vor.u32 %v5489_v31, %v5143_v32  ;;  %v5507_v31 = vld [vmem:[#allocation17 + $0x20] sm:$0xff]  ;;  %v5516_v32 = vld [vmem:[#allocation17 + $0x68] sm:$0xff] }
 0x7e2   : > { %3704 = vmatpush.bf16.msra.mxu3 %v5186_v36  ;;  %v5070_v36 = vor.u32 %v5472_v34, %v5069_v15  ;;  %v5515_v15 = vld [vmem:[#allocation17 + $0x60] sm:$0xff]  ;;  %v5505_v34 = vld [vmem:[#allocation17 + $0x10] sm:$0xff] }
 0x7e6   : > { %3705 = vmatpush.bf16.msra.mxu3 %v5178_v56  ;;  %v3199_v56 = vperm.slane %v3197_v53, 0 }
 0x842   : > { %v3098_v37 = vpop.f32.mrf.mxu0 }
 0x848   : > { %v3112_v39 = vpop.f32.mrf.mxu1  ;;  %v3126_v26 = vpop.f32.mrf.mxu2 }
 0x849   : > { %v3113_v42 = vadd.f32 %v3112_v39, %v3098_v37  ;;  %v5109_v37 = vld [vmem:[#allocation16 + $0x50] sm:$0xf]  ;;  %v5482_v39 = vld [vmem:[#allocation16 + $0x54] sm:$0xf0] }
 0x84a   : > { %v3100_v58 = vpop.f32.mrf.mxu0  ;;  %v5110_v40 = vor.u32 %v5482_v39, %v5109_v37  ;;  %v5488_v37 = vld [vmem:[#allocation16 + $0x84] sm:$0xf0]  ;;  %v5471_v39 = vld [vmem:[#allocation16 + $0x4] sm:$0xf] }
 0x84b   : > { %v3145_v29 = vadd.f32 %v3113_v42, %v6513_v46  ;;  %v5498_v42 = vld [vmem:[#allocation16 + $0xd4] sm:$0xf0] }
 0x84d   : > { %v3155_v63 = vadd.f32 %v3151_v44, %v3145_v29  ;;  %v5480_v29 = vld [vmem:[#allocation16 + $0x44] sm:$0xf0] }
 0x84e   : > { %v3140_v55 = vpop.f32.mrf.mxu3 }
 0x84f   : > { %v3141_v60 = vadd.f32 %v3140_v55, %v3126_v26  ;;  %v3159_v50 = vmax.f32 %v3155_v63, 0.0  ;;  %v5174_v26 = vor.u32 %v5498_v42, %v5173_v43  ;;  %v5114_v55 = vor.u32 %v5481_v45, %v5111_v51  ;;  %v5495_v63 = vld [vmem:[#allocation16 + $0xc4] sm:$0xf] }
 0x850   : > { %v3114_v59 = vpop.f32.mrf.mxu1  ;;  %v3128_v30 = vpop.f32.mrf.mxu2  ;;  %v5134_v43 = vor.u32 %v5488_v37, %v5133_v19  ;;  %v5487_v45 = vld [vmem:[#allocation16 + $0x84] sm:$0xf]  ;;  %v5514_v19 = vld [vmem:[#allocation17 + $0x58] sm:$0xff]  ;;  %v5513_v37 = vld [vmem:[#allocation17 + $0x50] sm:$0xff] }
 0x851   : > { %v3115_v57 = vadd.f32 %v3114_v59, %v3100_v58  ;;  %v3146_v25 = vadd.f32 %v3141_v60, %v6515_v47  ;;  %v5125_v47 = vld [vmem:[#allocation16 + $0x70] sm:$0xf]  ;;  %3677 = vmatpush.bf16.msrb.mxu1 %v5174_v26  ;;  %3691 = vmatpush.bf16.msrb.mxu2 %v5114_v55  ;;  %v5102_v58 = vor.u32 %v5480_v29, %v5101_v24  ;;  %v5496_v59 = vld [vmem:[#allocation16 + $0xc4] sm:$0xf0]  ;;  %v5479_v60 = vld [vmem:[#allocation16 + $0x44] sm:$0xf] }
 0x852   : > { %v5126_v9 = vor.u32 %v5486_v48, %v5125_v47  ;;  %v5492_v47 = vld [vmem:[#allocation16 + $0xa4] sm:$0xf0]  ;;  %v5475_v48 = vld [vmem:[#allocation16 + $0x24] sm:$0xf]  ;;  %v5135_v26 = vld [vmem:[#allocation16 + $0x88] sm:$0xf0] }
 0x853   : > { %v3147_v0 = vadd.f32 %v3115_v57, %v2895_v61  ;;  %v3156_v4 = vadd.f32 %v3152_v49, %v3146_v25  ;;  %v5103_v61 = vld [vmem:[#allocation16 + $0x48] sm:$0xf0]  ;;  %v5093_v25 = vld [vmem:[#allocation16 + $0x30] sm:$0xf]  ;;  %v5090_v35 = vor.u32 %v5475_v48, %v5087_v8  ;;  %v5138_v51 = vor.u32 %v5487_v45, %v5135_v26 }
 0x854   : > { %3661 = vmatpush.bf16.msra.mxu0 %v5126_v9  ;;  %v5106_v62 = vor.u32 %v5479_v60, %v5103_v61 }
 0x855   : > { %v3157_v1 = vadd.f32 %v3151_v44, %v3147_v0  ;;  %v3160_v7 = vmax.f32 %v3156_v4, 0.0  ;;  %v5165_v44 = vld [vmem:[#allocation16 + $0xc0] sm:$0xf]  ;;  %v5167_v0 = vld [vmem:[#allocation16 + $0xc8] sm:$0xf0] }
 0x856   : > { %v3142_v46 = vpop.f32.mrf.mxu3  ;;  %v5166_v57 = vor.u32 %v5496_v59, %v5165_v44  ;;  %v5170_v27 = vor.u32 %v5495_v63, %v5167_v0  ;;  %3692 = vmatpush.bf16.msrb.mxu2 %v5106_v62  ;;  %v5493_v4 = vld [vmem:[#allocation16 + $0xb4] sm:$0xf]  ;;  %v3200_v44 = vperm.slane %v3197_v53, 1  ;;  %v3429_v63 = vld [vmem:[%s6738_s11] sm:$0x3] }
 0x857   : > { %v3161_v10 = vmax.f32 %v3157_v1, 0.0  ;;  %v3143_v2 = vadd.f32 %v3142_v46, %v3128_v30  ;;  %v5157_v1 = vld [vmem:[#allocation16 + $0xb0] sm:$0xf]  ;;  %v5494_v46 = vld [vmem:[#allocation16 + $0xb4] sm:$0xf0] }
 0x858   : > { %3662 = vmatpush.bf16.msra.mxu0 %v5118_v12  ;;  %3678 = vmatpush.bf16.msrb.mxu1 %v5166_v57  ;;  %v5142_v12 = vor.u32 %v5490_v20, %v5141_v17 }
 0x859   : > { %v3163_v54 = vpack.c.bf16 %v3161_v10, %v3159_v50  ;;  %v3148_v5 = vadd.f32 %v3143_v2, %v2896_v38  ;;  %3706 = vmatpush.bf16.msra.mxu3 %v5170_v27  ;;  %v5477_v50 = vld [vmem:[#allocation16 + $0x34] sm:$0xf]  ;;  %v5095_v10 = vld [vmem:[#allocation16 + $0x38] sm:$0xf0]  ;;  %v5158_v38 = vor.u32 %v5494_v46, %v5157_v1  ;;  %v3431_v46 = vperm.slane %v3429_v63, 0 }
 0x85a   : > { %v5098_v2 = vor.u32 %v5477_v50, %v5095_v10  ;;  %v3432_v50 = vperm.slane %v3429_v63, 1 }
 0x85b   : > { %v3158_v6 = vadd.f32 %v3152_v49, %v3148_v5  ;;  %3371 = vmatmul.bf16.vlgmr.msrb.gmra.mxu0 %v3163_v54  ;;  %3399 = vmatmul.bf16.vlgmr.msra.gmra.mxu2 %v3163_v54  ;;  %v5478_v49 = vld [vmem:[#allocation16 + $0x34] sm:$0xf0]  ;;  %v5159_v54 = vld [vmem:[#allocation16 + $0xb8] sm:$0xf0] }
 0x85c   : > { %3663 = vmatpush.bf16.msra.mxu0 %v5110_v40  ;;  %v5094_v30 = vor.u32 %v5478_v49, %v5093_v25  ;;  %v5162_v5 = vor.u32 %v5493_v4, %v5159_v54  ;;  %3679 = vmatpush.bf16.msrb.mxu1 %v5158_v38  ;;  %v5071_v40 = vld [vmem:[#allocation16 + $0x8] sm:$0xf0] }
 0x85d   : > { %v3162_v41 = vmax.f32 %v3158_v6, 0.0  ;;  %v5085_v6 = vld [vmem:[#allocation16 + $0x20] sm:$0xf]  ;;  %3693 = vmatpush.bf16.msrb.mxu2 %v5098_v2  ;;  %v5074_v42 = vor.u32 %v5471_v39, %v5071_v40  ;;  %v5512_v40 = vld [vmem:[#allocation17 + $0x48] sm:$0xff] }
 0x85e   : > { %3707 = vmatpush.bf16.msra.mxu3 %v5162_v5  ;;  %v5503_v39 = vld [vmem:[#allocation17] sm:$0xff] }
 0x85f   : > { %v3164_v28 = vpack.c.bf16 %v3162_v41, %v3160_v7  ;;  %v5476_v7 = vld [vmem:[#allocation16 + $0x24] sm:$0xf0]  ;;  %v5149_v41 = vld [vmem:[#allocation16 + $0xa0] sm:$0xf] }
 0x860   : > { %3664 = vmatpush.bf16.msra.mxu0 %v5102_v58  ;;  %v5150_v9 = vor.u32 %v5492_v47, %v5149_v41 }
 0x861   : > { %3385 = vmatmul.bf16.vlgmr.msra.gmra.mxu1 %v3164_v28  ;;  %3413 = vmatmul.bf16.vlgmr.msrb.gmra.mxu3 %v3164_v28  ;;  %v5086_v28 = vor.u32 %v5476_v7, %v5085_v6 }
 0x862   : > { %3680 = vmatpush.bf16.msrb.mxu1 %v5150_v9  ;;  %3694 = vmatpush.bf16.msrb.mxu2 %v5090_v35 }
 0x863   : > { %3708 = vmatpush.bf16.msra.mxu3 %v5154_v14 }
 0x864   : > { %3665 = vmatpush.bf16.msra.mxu0 %v5094_v30 }
 0x866   : > { %3681 = vmatpush.bf16.msrb.mxu1 %v5142_v12  ;;  %3695 = vmatpush.bf16.msrb.mxu2 %v5082_v23  ;;  %v5508_v12 = vld [vmem:[#allocation17 + $0x28] sm:$0xff]  ;;  %v5517_v23 = vld [vmem:[#allocation17 + $0x70] sm:$0xff] }
 0x867   : > { %3709 = vmatpush.bf16.msra.mxu3 %v5146_v33  ;;  %v5506_v33 = vld [vmem:[#allocation17 + $0x18] sm:$0xff] }
 0x868   : > { %3666 = vmatpush.bf16.msra.mxu0 %v5086_v28 }
 0x86a   : > { %3682 = vmatpush.bf16.msrb.mxu1 %v5134_v43  ;;  %3696 = vmatpush.bf16.msrb.mxu2 %v5074_v42  ;;  %v5511_v43 = vld [vmem:[#allocation17 + $0x40] sm:$0xff] }
 0x86b   : > { %3710 = vmatpush.bf16.msra.mxu3 %v5138_v51  ;;  %v3485_v42 = vld [vmem:[%s6739_s28] sm:$0x3] }
 0x86c   : > { %3667 = vmatpush.bf16.msra.mxu0 %v5078_v18  ;;  %v3487_v51 = vperm.slane %v3485_v42, 0 }
 0x86e   : > { %3899 = vmatpush.bf16.msra.mxu1 %v5518_v22 }
 0x870   : > { %3668 = vmatpush.bf16.msra.mxu0 %v5070_v36  ;;  %v5504_v36 = vld [vmem:[#allocation17 + $0x8] sm:$0xff] }
 0x872   : > { %3900 = vmatpush.bf16.msra.mxu1 %v5517_v23 }
 0x874   : > { %3885 = vmatpush.bf16.msrb.mxu0 %v5510_v52 }
 0x876   : > { %3901 = vmatpush.bf16.msra.mxu1 %v5516_v32 }
 0x878   : > { %3886 = vmatpush.bf16.msrb.mxu0 %v5509_v21 }
 0x87a   : > { %3902 = vmatpush.bf16.msra.mxu1 %v5515_v15 }
 0x87c   : > { %3887 = vmatpush.bf16.msrb.mxu0 %v5508_v12 }
 0x87e   : > { %3903 = vmatpush.bf16.msra.mxu1 %v5514_v19 }
 0x880   : > { %3888 = vmatpush.bf16.msrb.mxu0 %v5507_v31 }
 0x882   : > { %3904 = vmatpush.bf16.msra.mxu1 %v5513_v37 }
 0x884   : > { %3889 = vmatpush.bf16.msrb.mxu0 %v5506_v33 }
 0x886   : > { %3905 = vmatpush.bf16.msra.mxu1 %v5512_v40 }
 0x888   : > { %3890 = vmatpush.bf16.msrb.mxu0 %v5505_v34 }
 0x88a   : > { %3906 = vmatpush.bf16.msra.mxu1 %v5511_v43 }
 0x88c   : > { %3891 = vmatpush.bf16.msrb.mxu0 %v5504_v36 }
 0x890   : > { %3892 = vmatpush.bf16.msrb.mxu0 %v5503_v39 }
 0x8d8   : > { %v3372_v55 = vpop.f32.mrf.mxu0 }
 0x8d9   : > { %v3373_v58 = vadd.f32 %v3372_v55, %v3199_v56 }
 0x8de   : > { %v3386_v24 = vpop.f32.mrf.mxu1  ;;  %v3400_v29 = vpop.f32.mrf.mxu2 }
 0x8df   : > { %v3387_v59 = vadd.f32 %v3386_v24, %v3373_v58  ;;  %v3401_v60 = vadd.f32 %v3400_v29, %v3200_v44  ;;  %v3488_v29 = vperm.slane %v3485_v42, 1 }
 0x8e0   : > { %v3374_v62 = vpop.f32.mrf.mxu0 }
 0x8e1   : > { %v3419_v0 = vmax.f32 %v3387_v59, 0.0  ;;  %v3375_v1 = vadd.f32 %v3374_v62, %v3199_v56 }
 0x8e4   : > { %v3414_v61 = vpop.f32.mrf.mxu3 }
 0x8e5   : > { %v3415_v57 = vadd.f32 %v3414_v61, %v3401_v60 }
 0x8e6   : > { %v3388_v25 = vpop.f32.mrf.mxu1  ;;  %v3402_v49 = vpop.f32.mrf.mxu2 }
 0x8e7   : > { %v3420_v27 = vmax.f32 %v3415_v57, 0.0  ;;  %v3389_v10 = vadd.f32 %v3388_v25, %v3375_v1  ;;  %v3403_v38 = vadd.f32 %v3402_v49, %v3200_v44  ;;  %v3758_v49 = vpop.permute.xlu2 %3757  ;;  %v3754_v1 = vpop.permute.xlu0 %3753 }
 0x8e9   : > { %v3423_v30 = vpack.c.bf16 %v3420_v27, %v3419_v0  ;;  %v3421_v41 = vmax.f32 %v3389_v10, 0.0 }
 0x8eb   : > { %v3425_v2 = vunpack.c.l.bf16 %v3423_v30  ;;  %v3426_v4 = vunpack.c.h.bf16 %v3423_v30  ;;  %v3493_v8 = vunpack.c.l.b16 %v3423_v30  ;;  %v3494_v9 = vunpack.c.h.b16 %v3423_v30  ;;  %v3751_v30 = vld [vmem:[%s6740_s7] sm:$0x7] }
 0x8ec   : > { %v3416_v54 = vpop.f32.mrf.mxu3 }
 0x8ed   : > { %v3417_v5 = vadd.f32 %v3416_v54, %v3403_v38  ;;  %v3435_v6 = vmul.f32 %v3431_v46, %v3425_v2  ;;  %v3436_v7 = vmul.f32 %v3432_v50, %v3426_v4  ;;  %v3784_v54 = vperm.slane %v3751_v30, 2 }
 0x8ef   : > { %v3422_v28 = vmax.f32 %v3417_v5, 0.0  ;;  %v3439_v47 = vadd.f32 %v3436_v7, %v3435_v6  ;;  %v3765_v10 = vpop.permute.xlu2 %3764  ;;  %v3778_v4 = vpop.permute.xlu0 %3777 }
 0x8f0   : > { %v3785_v6 = vmul.f32 %v3784_v54, %v3778_v4 }
 0x8f1   : > { %v3424_v48 = vpack.c.bf16 %v3422_v28, %v3421_v41  ;;  %3440 = vadd.xlane.f32.xlu1 %v3439_v47  ;;  %v3769_v41 = vpop.permute.xlu1 %3768 }
 0x8f3   : > { %v3495_v35 = vunpack.c.l.b16 %v3424_v48  ;;  %v3496_v11 = vunpack.c.h.b16 %v3424_v48  ;;  %v3427_v13 = vunpack.c.l.bf16 %v3424_v48  ;;  %v3428_v14 = vunpack.c.h.bf16 %v3424_v48 }
 0x8f5   : > { %v3497_v16 = vpack.c.b16 %v3495_v35, %v3493_v8  ;;  %v3498_v3 = vpack.c.b16 %v3496_v11, %v3494_v9  ;;  %v3437_v17 = vmul.f32 %v3431_v46, %v3427_v13  ;;  %v3438_v18 = vmul.f32 %v3432_v50, %v3428_v14  ;;  %v5715_v9 = vld [vmem:[%s6282_s21] ss:$0 sm:$0xff] }
 0x8f6   : > { %v3760_v46 = vperm.slane %v3751_v30, 0  ;;  %v3771_v50 = vperm.slane %v3751_v30, 1  ;;  %v3921_v13 = vld [vmem:[%s6287_s30] sm:$0x7] }
 0x8f7   : > { %3669 = vmatmul.bf16.vlgmr.msra.gmra.mxu0 %v3497_v16  ;;  %3683 = vmatmul.bf16.vlgmr.msrb.gmra.mxu1 %v3498_v3  ;;  %v3442_v20 = vadd.f32 %v3438_v18, %v3437_v17  ;;  %v3782_v35 = vpop.permute.xlu2 %3781  ;;  %v3929_v18 = vperm.slane %v3921_v13, 1  ;;  %v3936_v19 = vperm.slane %v3921_v13, 2 }
 0x8f8   : > { %3697 = vmatmul.bf16.vlgmr.msrb.gmra.mxu2 %v3497_v16  ;;  %3711 = vmatmul.bf16.vlgmr.msra.gmra.mxu3 %v3498_v3  ;;  %v3772_v38 = vmul.f32 %v3771_v50, %v3765_v10  ;;  %v3761_v2 = vmul.f32 %v3760_v46, %v3754_v1  ;;  %v3762_v28 = vmul.f32 %v3760_v46, %v3758_v49 }
 0x8f9   : > { %3443 = vadd.xlane.f32.xlu2 %v3442_v20  ;;  %v3773_v47 = vmul.f32 %v3771_v50, %v3769_v41  ;;  %v3786_v16 = vmul.f32 %v3784_v54, %v3782_v35  ;;  %v3922_v20 = vperm.slane %v3921_v13, 0 }
 0x8fa   : > { %v3774_v5 = vadd.f32 %v3772_v38, %v3761_v2 }
 0x8fb   : > { %v3775_v14 = vadd.f32 %v3773_v47, %v3762_v28 }
 0x8fc   : > { %v3787_v48 = vadd.f32 %v3785_v6, %v3774_v5 }
 0x8fd   : > { %v3788_v12 = vadd.f32 %v3786_v16, %v3775_v14 }
 0x96c   : > { %v3444_v42 = vpop.xlane.xlu2 %3443 }
 0x974   : > { %v3670_v45 = vpop.f32.mrf.mxu0  ;;  %v3684_v26 = vpop.f32.mrf.mxu1 }
 0x975   : > { %v3671_v52 = vadd.f32 %v3670_v45, %v3487_v51  ;;  %v5714_v45 = vld [vmem:[#allocation2] ss:$0 sm:$0xff] }
 0x977   : > { %v3685_v58 = vadd.f32 %v3684_v26, %v3671_v52  ;;  %v3450_v26 = vadd.f32 %v5714_v45, %v3444_v42  ;;  %v3441_v52 = vpop.xlane.xlu1 %3440 }
 0x97b   : > { %v3698_v53 = vpop.f32.mrf.mxu2  ;;  %v3712_v55 = vpop.f32.mrf.mxu3 }
 0x97c   : > { %v3672_v56 = vpop.f32.mrf.mxu0  ;;  %v3686_v44 = vpop.f32.mrf.mxu1  ;;  %v3699_v61 = vadd.f32 %v3698_v53, %v3488_v29  ;;  %v3449_v53 = vadd.f32 %v5714_v45, %v3441_v52 }
 0x97d   : > { %v3673_v24 = vadd.f32 %v3672_v56, %v3487_v51  ;;  %v3452_v51 = vmax.f32 %v3450_v26, 0.0 }
 0x97e   : > { %v3713_v0 = vadd.f32 %v3712_v55, %v3699_v61  ;;  %v3451_v55 = vmax.f32 %v3449_v53, 0.0 }
 0x97f   : > { %v3687_v59 = vadd.f32 %v3686_v44, %v3673_v24 }
 0x981   : > { %v3717_v60 = vpack.c.bf16 %v3687_v59, %v3685_v58 }
 0x983   : > { %v3700_v57 = vpop.f32.mrf.mxu2  ;;  %3893 = vmatmul.bf16.vlgmr.msrb.gmra.mxu0 %v3717_v60  ;;  %v3714_v63 = vpop.f32.mrf.mxu3 }
 0x984   : > { %v3701_v62 = vadd.f32 %v3700_v57, %v3488_v29  ;;  %v5716_v29 = vld [vmem:[%s6741_s25] ss:$0 sm:$0xff] }
 0x986   : > { %v3715_v27 = vadd.f32 %v3714_v63, %v3701_v62 }
 0x988   : > { %v3718_v25 = vpack.c.bf16 %v3715_v27, %v3713_v0 }
 0x98a   : > { %3907 = vmatmul.bf16.vlgmr.msra.gmra.mxu1 %v3718_v25 }
 0xa00   : > { %v3894_v7 = vpop.f32.mrf.mxu0 }
 0xa01   : > { %v3895_v8 = vadd.f32 %v3894_v7, %v3787_v48 }
 0xa07   : > { %v3908_v11 = vpop.f32.mrf.mxu1 }
 0xa08   : > { %v3909_v3 = vadd.f32 %v3908_v11, %v3895_v8  ;;  %v3896_v21 = vpop.f32.mrf.mxu0 }
 0xa09   : > { %v3897_v23 = vadd.f32 %v3896_v21, %v3788_v12 }
 0xa0a   : > { %v3917_v17 = vadd.f32 %v5715_v9, %v3909_v3 }
 0xa0c   : > { %v3919_v22 = vmax.f32 %v3917_v17, 0.0 }
 0xa0e   : > { %v3930_v31 = vmul.f32 %v3929_v18, %v3919_v22  ;;  %v3923_v32 = vmul.f32 %v3922_v20, %v3919_v22  ;;  %v3937_v39 = vmul.f32 %v3936_v19, %v3919_v22 }
 0xa0f   : > { %v3910_v33 = vpop.f32.mrf.mxu1 }
 0xa10   : > { %v3911_v15 = vadd.f32 %v3910_v33, %v3897_v23  ;;  %3932 = vadd.xlane.f32.xlu2 %v3930_v31  ;;  %3925 = vadd.xlane.f32.xlu0 %v3923_v32 }
 0xa12   : > { %v3918_v34 = vadd.f32 %v5715_v9, %v3911_v15 }
 0xa14   : > { %v3920_v36 = vmax.f32 %v3918_v34, 0.0 }
 0xa16   : > { %v3938_v37 = vmul.f32 %v3936_v19, %v3920_v36  ;;  %v3924_v40 = vmul.f32 %v3922_v20, %v3920_v36  ;;  %v3931_v43 = vmul.f32 %v3929_v18, %v3920_v36 }
 0xa18   : > { %3941 = vadd.xlane.f32.xlu2 %v3938_v37  ;;  %3939 = vadd.xlane.f32.xlu0 %v3937_v39 }
 0xa19   : > { %3927 = vadd.xlane.f32.xlu1 %v3924_v40 }
 0xa21   : > { %3934 = vadd.xlane.f32.xlu1 %v3931_v43 }
 0xa2c   : > { %3997 = vrot.lane.b32.xlu0 %v3452_v51, %s6145_s15 }
 0xa3a   : > { %3995 = vrot.lane.b32.xlu1 %v3451_v55, %s6145_s15 }
 0xa83   : > { %v3926_v56 = vpop.xlane.xlu0 %3925  ;;  %v3933_v24 = vpop.xlane.xlu2 %3932 }
 0xa84   : > { %v3944_v44 = vsel %vm3943_vm5, %v3926_v56, %v3933_v24 }
 0xa8b   : > { %v3940_v58 = vpop.xlane.xlu0 %3939  ;;  %v3942_v63 = vpop.xlane.xlu2 %3941 }
 0xa8c   : > { %v3947_v59 = vsel %vm3946_vm6, %v3944_v44, %v3940_v58  ;;  %v3928_v60 = vpop.xlane.xlu1 %3927 }
 0xa8d   : > { %v3953_v61 = vadd.f32 %v5716_v29, %v3947_v59 }
 0xa8f   : > { %v5259_v57 = vmul.f32 -1.442695, %v3953_v61 }
 0xa91   : > { %5749 = vpow2.f32 %v5259_v57 }
 0xa94   : > { %v3935_v62 = vpop.xlane.xlu1 %3934 }
 0xa95   : > { %v3945_v0 = vsel %vm3943_vm5, %v3928_v60, %v3935_v62 }
 0xa96   : > { %v3948_v27 = vsel %vm3946_vm6, %v3945_v0, %v3942_v63 }
 0xa97   : > { %v5750_v25 = vpop.eup %5749  ;;  %v3954_v49 = vadd.f32 %v5716_v29, %v3948_v27 }
 0xa98   : > { %v3961_v1 = vadd.f32 1.0, %v5750_v25 }
 0xa99   : > { %v5260_v30 = vmul.f32 -1.442695, %v3954_v49 }
 0xa9a   : > { %5751 = vrcp.f32 %v3961_v1  ;;  %v3974_v4 = vand.u32 2147483648, %v3961_v1  ;;  %v3972_v5 = vand.u32 2147483647, %v3961_v1  ;;  %vm3968_vm8 = vweird.f32 %v3961_v1 }
 0xa9b   : > { %5753 = vpow2.f32 %v5260_v30 }
 0xa9c   : > { %v3975_v7 = vor.u32 1.1754944e-38, %v3974_v4  ;;  %vm3973_vm10 = vcmp.eq.f32.partialorder %v3972_v5, 8.507059e+37 }
 0xa9e   : > { %v3998_v18 = vpop.permute.xlu0 %3997 }
 0xaa0   : > { %v5752_v46 = vpop.eup %5751 }
 0xaa1   : > { %v5754_v50 = vpop.eup %5753  ;;  %v3964_v10 = vmul.f32 %v5752_v46, %v3961_v1  ;;  %vm3969_vm7 = vweird.f32 %v5752_v46 }
 0xaa2   : > { %v3962_v38 = vadd.f32 1.0, %v5754_v50  ;;  %vm3970_vm9 = vmor %vm3968_vm8, %vm3969_vm7 }
 0xaa3   : > { %v3965_v2 = vsub.f32 1.0, %v3964_v10 }
 0xaa4   : > { %5755 = vrcp.f32 %v3962_v38  ;;  %v3989_v11 = vand.u32 2147483648, %v3962_v38  ;;  %v3987_v14 = vand.u32 2147483647, %v3962_v38  ;;  %vm3983_vm14 = vweird.f32 %v3962_v38 }
 0xaa5   : > { %v3966_v54 = vmul.f32 %v5752_v46, %v3965_v2 }
 0xaa6   : > { %v3990_v3 = vor.u32 1.1754944e-38, %v3989_v11  ;;  %vm3988_vm0 = vcmp.eq.f32.partialorder %v3987_v14, 8.507059e+37 }
 0xaa7   : > { %v3967_v6 = vadd.f32 %v5752_v46, %v3966_v54 }
 0xaa9   : > { %v3971_v41 = vsel %vm3970_vm9, %v5752_v46, %v3967_v6 }
 0xaaa   : > { %v5756_v28 = vpop.eup %5755  ;;  %v3976_v47 = vsel %vm3973_vm10, %v3975_v7, %v3971_v41 }
 0xaab   : > { %v3979_v48 = vmul.f32 %v5756_v28, %v3962_v38  ;;  %vm3984_vm13 = vweird.f32 %v5756_v28 }
 0xaac   : > { %v3996_v8 = vpop.permute.xlu1 %3995  ;;  %vm3985_vm15 = vmor %vm3983_vm14, %vm3984_vm13 }
 0xaad   : > { %v3980_v9 = vsub.f32 1.0, %v3979_v48  ;;  %v4002_v35 = vsel %vm4001_vm11, %v3976_v47, %v3996_v8 }
 0xaae   : > { %4005 = vst.msk [vmem:[%s1072_s29] sm:$0xff] %vm4004_vm12, %v4002_v35 }
 0xaaf   : > { %v3981_v13 = vmul.f32 %v5756_v28, %v3980_v9 }
 0xab1   : > { %v3982_v16 = vadd.f32 %v5756_v28, %v3981_v13 }
 0xab3   : > { %v3986_v17 = vsel %vm3985_vm15, %v5756_v28, %v3982_v16 }
 0xab4   : > { %v3991_v20 = vsel %vm3988_vm0, %v3990_v3, %v3986_v17 }
 0xab5   : > { %v4003_v21 = vsel %vm4001_vm11, %v3991_v20, %v3998_v18 }
 0xab6   : > { %4006 = vst.msk [vmem:[%s1072_s29 + $0x8] sm:$0xff] %vm4004_vm12, %v4003_v21 }
 0xab7 PF: > { %s77_s4 = sadd.s32 1, %s6089_s4  }
 0xab8   : > { %p74_p2 = scmp.ge.s32.totalorder %s77_s4, 4  }
 0xaba   :  { %76 = sbr.rel (!%p74_p2) target bundleno = 53 (0x35), region = 236 }
 0xabf   :  { %4029 = vsyncpa [#allocation4], 1 }
 0xac0   :  { %4031 = vsyncpa [#allocation4 + $0x1], 1 }
 0xac1   :  { %4032 = vsyncpa [#allocation6], 1 }
 0xac2   :  { %4033 = vsyncpa [#allocation9], 1 }
 0xac3   :  { %4034 = vsyncpa [#allocation12], 1 }
 0xac4   :  { %4035 = vsyncpa [#allocation15], 1 }
 0xac5   :  { %4036 = vsyncpa [#allocation18], 1 }

</bundles_post_ra>
